<compile_context>
chip_gen: v5e
topology: v5e:2x2
jax: 0.10.0
libtpu: 0.0.40
codegen_flags: <defaults>
</compile_context>

<pallas_src>
import jax
import jax.numpy as jnp
from jax import lax
from jax.experimental import pallas as pl
from jax.experimental.pallas import tpu as pltpu


# ----------------------------- in-kernel helpers -----------------------------
def _ln(x, w, b, eps):
    # One-pass LayerNorm stats: var = E[x^2] - E[x]^2 (single traversal).
    m = jnp.mean(x, axis=-1, keepdims=True)
    m2 = jnp.mean(x * x, axis=-1, keepdims=True)
    var = m2 - m * m
    return (x - m) * lax.rsqrt(var + eps) * w + b


def _silu(x):
    return x * (1.0 / (1.0 + jnp.exp(-x)))


def _erf(x):
    # Abramowitz & Stegun 7.1.26 polynomial, max abs error ~1.5e-7.
    # (Matches torch's exact-erf nn.GELU to well within the check tolerance
    #  without relying on an erf lowering inside the kernel.)
    p = 0.3275911
    a1, a2, a3, a4, a5 = (0.254829592, -0.284496736, 1.421413741,
                          -1.453152027, 1.061405429)
    s = jnp.where(x >= 0.0, 1.0, -1.0)
    ax = jnp.abs(x)
    t = 1.0 / (1.0 + p * ax)
    poly = ((((a5 * t + a4) * t + a3) * t + a2) * t + a1) * t
    return s * (1.0 - poly * jnp.exp(-ax * ax))


def _gelu_exact(x):
    return 0.5 * x * (1.0 + _erf(x * 0.7071067811865476))


# --------------------------------- kernel ------------------------------------
def gau_block_kernel(x_ref,
                     lnb_w_ref, lnb_b_ref, lng_w_ref, lng_b_ref,
                     wh_ref, bh_ref,
                     wsr1_ref, bsr1_ref, ln1_w_ref, ln1_b_ref,
                     wsr2_ref, bsr2_ref, ln2_w_ref, ln2_b_ref,
                     wqk_ref, bqk_ref,
                     g1_ref, be1_ref, g2_ref, be2_ref,
                     wp_ref, bp_ref,
                     out_ref):
    _, N, C = x_ref.shape               # tokens already tap-major permuted
    Np = N // 4
    Cqk = C // 2

    x_all = x_ref[0]                    # (N, C)

    # Block.norm1 (eps=1e-6) then New_GAU.norm (eps=1e-5)
    x1 = _ln(x_all, lnb_w_ref[...], lnb_b_ref[...], 1e-6)
    nx = _ln(x1, lng_w_ref[...], lng_b_ref[...], 1e-5)

    # to_hidden + SiLU -> v, gate
    hid = jnp.dot(nx, wh_ref[...], preferred_element_type=jnp.float32) + bh_ref[...]
    hid = _silu(hid)
    v = hid[:, :C]
    gate = hid[:, C:]

    # --- sr1 branch: 2x2 / stride-2 conv as one im2col matmul ----------------
    # Rows [t*Np:(t+1)*Np] of nx hold tap t of every 2x2 patch (tap-major token
    # order), so the (N/4, 4C) patch matrix is 4 contiguous slabs lane-concat'd.
    patch = jnp.concatenate([nx[t * Np:(t + 1) * Np, :] for t in range(4)], axis=-1)
    y1 = jnp.dot(patch, wsr1_ref[...], preferred_element_type=jnp.float32) + bsr1_ref[...]
    x_1 = _gelu_exact(_ln(y1, ln1_w_ref[...], ln1_b_ref[...], 1e-5))

    # --- sr2 branch: 1x1 / stride-1 conv == plain matmul ----------------------
    y2 = jnp.dot(nx, wsr2_ref[...], preferred_element_type=jnp.float32) + bsr2_ref[...]
    x_2 = _gelu_exact(_ln(y2, ln2_w_ref[...], ln2_b_ref[...], 1e-5))

    # to_qk + SiLU, then per-head gamma / beta
    wqk = wqk_ref[...]
    bqk = bqk_ref[...]
    z1 = _silu(jnp.dot(x_1, wqk, preferred_element_type=jnp.float32) + bqk)
    g1 = g1_ref[...]
    be1 = be1_ref[...]
    q1 = z1 * g1[0:1, :] + be1[0:1, :]
    k1 = z1 * g1[1:2, :] + be1[1:2, :]

    z2 = _silu(jnp.dot(x_2, wqk, preferred_element_type=jnp.float32) + bqk)
    g2 = g2_ref[...]
    be2 = be2_ref[...]
    q2 = z2 * g2[0:1, :] + be2[0:1, :]
    k2 = z2 * g2[1:2, :] + be2[1:2, :]

    # --- gated quadratic attention, two halves --------------------------------
    inv_n = jnp.float32(1.0 / N)
    dn = (((1,), (1,)), ((), ()))        # contract last dims: A @ B^T

    a1 = lax.dot_general(v[:, :Cqk], q1, dn, preferred_element_type=jnp.float32) * inv_n
    a1 = jnp.maximum(a1, 0.0)
    a1 = a1 * a1
    v1 = jnp.dot(a1, k1, preferred_element_type=jnp.float32)

    a2 = lax.dot_general(v[:, Cqk:], q2, dn, preferred_element_type=jnp.float32) * inv_n
    a2 = jnp.maximum(a2, 0.0)
    a2 = a2 * a2
    v2 = jnp.dot(a2, k2, preferred_element_type=jnp.float32)

    xc = jnp.concatenate([v1, v2], axis=-1)             # (N, C)
    value = xc * gate
    out = jnp.dot(value, wp_ref[...], preferred_element_type=jnp.float32) + bp_ref[...]

    # GAU residual (out + xc) then Block residual (+ x)
    out_ref[0] = (x_all + out + xc).astype(out_ref.dtype)


# --------------------------------- wrapper -----------------------------------
def gau_block_forward(x, H, W, params):
    B, N, C = x.shape
    assert N == H * W and H % 2 == 0 and W % 2 == 0 and C % 2 == 0
    Np = N // 4
    Cqk = C // 2
    Chid = 2 * C

    # Tap-major token permutation (kh, kw, h', w') — pure layout plumbing done
    # outside the kernel so the in-kernel conv is one dense matmul.
    xr = (x.reshape(B, H // 2, 2, W // 2, 2, C)
            .transpose(0, 2, 4, 1, 3, 5)               # (B, kh, kw, h', w', C)
            .reshape(B, N, C))                          # tap-major flattened

    def rep(*shape):
        n = len(shape)
        return pl.BlockSpec(shape, lambda b, _n=n: (0,) * _n)

    in_specs = [
        pl.BlockSpec((1, N, C), lambda b: (b, 0, 0)),            # x (permuted)
        rep(1, C), rep(1, C), rep(1, C), rep(1, C),              # Block LN, GAU LN
        rep(C, Chid), rep(1, Chid),                              # to_hidden
        rep(4 * C, C), rep(1, C), rep(1, C), rep(1, C),          # sr1 + norm1
        rep(C, C), rep(1, C), rep(1, C), rep(1, C),              # sr2 + norm2
        rep(C, Cqk), rep(1, Cqk),                                # to_qk
        rep(2, Cqk), rep(2, Cqk), rep(2, Cqk), rep(2, Cqk),      # gamma/beta 1&2
        rep(C, C), rep(1, C),                                    # proj
    ]

    args = (xr,
            params["lnb_w"], params["lnb_b"], params["lng_w"], params["lng_b"],
            params["wh"], params["bh"],
            params["wsr1"], params["bsr1"], params["ln1_w"], params["ln1_b"],
            params["wsr2"], params["bsr2"], params["ln2_w"], params["ln2_b"],
            params["wqk"], params["bqk"],
            params["g1"], params["be1"], params["g2"], params["be2"],
            params["wp"], params["bp"])

    out_perm = pl.pallas_call(
        gau_block_kernel,
        out_shape=jax.ShapeDtypeStruct((B, N, C), jnp.float32),
        grid=(B,),
        in_specs=in_specs,
        out_specs=pl.BlockSpec((1, N, C), lambda b: (b, 0, 0)),
        compiler_params=pltpu.CompilerParams(
            dimension_semantics=("parallel",)),
    )(*args)

    # Undo the token permutation (tap-major -> natural row-major H,W order).
    out = (out_perm.reshape(B, 2, 2, H // 2, W // 2, C)
             .transpose(0, 3, 1, 4, 2, 5)               # (B, h', kh, w', kw, C)
             .reshape(B, N, C))
    return out


# ---------------------------- pure-JAX reference -----------------------------
def _ln_ref(x, w, b, eps):
    m = jnp.mean(x, axis=-1, keepdims=True)
    var = jnp.mean((x - m) ** 2, axis=-1, keepdims=True)
    return (x - m) / jnp.sqrt(var + eps) * w + b


def block_reference(x, H, W, p):
    B, N, C = x.shape
    Cqk = C // 2
    HI = lax.Precision.HIGHEST

    x1 = _ln_ref(x, p["lnb_w"], p["lnb_b"], 1e-6)
    nx = _ln_ref(x1, p["lng_w"], p["lng_b"], 1e-5)
    hid = jax.nn.silu(jnp.dot(nx, p["wh"], precision=HI) + p["bh"])
    v, gate = hid[..., :C], hid[..., C:]

    xg = nx.reshape(B, H, W, C)
    patches = (xg.reshape(B, H // 2, 2, W // 2, 2, C)
                 .transpose(0, 1, 3, 2, 4, 5)           # (B, h', w', kh, kw, C)
                 .reshape(B, (H // 2) * (W // 2), 4 * C))
    y1 = jnp.dot(patches, p["wsr1"], precision=HI) + p["bsr1"]
    x_1 = jax.nn.gelu(_ln_ref(y1, p["ln1_w"], p["ln1_b"], 1e-5), approximate=False)
    y2 = jnp.dot(nx, p["wsr2"], precision=HI) + p["bsr2"]
    x_2 = jax.nn.gelu(_ln_ref(y2, p["ln2_w"], p["ln2_b"], 1e-5), approximate=False)

    z1 = jax.nn.silu(jnp.dot(x_1, p["wqk"], precision=HI) + p["bqk"])
    q1 = z1 * p["g1"][0] + p["be1"][0]
    k1 = z1 * p["g1"][1] + p["be1"][1]
    z2 = jax.nn.silu(jnp.dot(x_2, p["wqk"], precision=HI) + p["bqk"])
    q2 = z2 * p["g2"][0] + p["be2"][0]
    k2 = z2 * p["g2"][1] + p["be2"][1]

    a1 = jnp.einsum("bid,bjd->bij", v[..., :Cqk], q1, precision=HI) / N
    V1 = jnp.einsum("bij,bjd->bid", jnp.maximum(a1, 0.0) ** 2, k1, precision=HI)
    a2 = jnp.einsum("bid,bjd->bij", v[..., Cqk:], q2, precision=HI) / N
    V2 = jnp.einsum("bij,bjd->bid", jnp.maximum(a2, 0.0) ** 2, k2, precision=HI)

    xc = jnp.concatenate([V1, V2], axis=-1)
    out = jnp.dot(xc * gate, p["wp"], precision=HI) + p["bp"]
    return x + out + xc


# ----------------------------------- main ------------------------------------
if __name__ == "__main__":
    key = jax.random.PRNGKey(0)
    B, H, W = 2, 8, 8
    C = 128                      # dim (lane-dense)
    N = H * W
    Cqk = C // 2
    Chid = 2 * C

    keys = iter(jax.random.split(key, 32))

    def nrm(shape, std=0.02):
        return (std * jax.random.normal(next(keys), shape)).astype(jnp.float32)

    x = jax.random.normal(next(keys), (B, N, C), jnp.float32)
    params = dict(
        lnb_w=1.0 + nrm((1, C), 0.1), lnb_b=nrm((1, C), 0.1),
        lng_w=1.0 + nrm((1, C), 0.1), lng_b=nrm((1, C), 0.1),
        wh=nrm((C, Chid)), bh=nrm((1, Chid)),
        wsr1=nrm((4 * C, C), 0.05), bsr1=nrm((1, C)),
        ln1_w=1.0 + nrm((1, C), 0.1), ln1_b=nrm((1, C), 0.1),
        wsr2=nrm((C, C), 0.05), bsr2=nrm((1, C)),
        ln2_w=1.0 + nrm((1, C), 0.1), ln2_b=nrm((1, C), 0.1),
        wqk=nrm((C, Cqk)), bqk=nrm((1, Cqk)),
        g1=1.0 + nrm((2, Cqk)), be1=nrm((2, Cqk)),
        g2=1.0 + nrm((2, Cqk)), be2=nrm((2, Cqk)),
        wp=nrm((C, C)), bp=nrm((1, C)),
    )

    out = gau_block_forward(x, H, W, params)
    out = jax.block_until_ready(out)

    ref = block_reference(x, H, W, params)
    assert out.shape == (B, N, C)
    max_err = float(jnp.max(jnp.abs(out - ref)))
    assert jnp.allclose(out, ref, rtol=2e-3, atol=2e-3), max_err

    print("KERNEL_OK")
</pallas_src>

<mosaic_0001>
module attributes {stable_mosaic.version = 11 : i64} {
  func.func @gau_block_kernel(%arg0: i32, %arg1: memref<1x64x128xf32, #tpu.memory_space<vmem>>, %arg2: memref<1x128xf32, #tpu.memory_space<vmem>>, %arg3: memref<1x128xf32, #tpu.memory_space<vmem>>, %arg4: memref<1x128xf32, #tpu.memory_space<vmem>>, %arg5: memref<1x128xf32, #tpu.memory_space<vmem>>, %arg6: memref<128x256xf32, #tpu.memory_space<vmem>>, %arg7: memref<1x256xf32, #tpu.memory_space<vmem>>, %arg8: memref<512x128xf32, #tpu.memory_space<vmem>>, %arg9: memref<1x128xf32, #tpu.memory_space<vmem>>, %arg10: memref<1x128xf32, #tpu.memory_space<vmem>>, %arg11: memref<1x128xf32, #tpu.memory_space<vmem>>, %arg12: memref<128x128xf32, #tpu.memory_space<vmem>>, %arg13: memref<1x128xf32, #tpu.memory_space<vmem>>, %arg14: memref<1x128xf32, #tpu.memory_space<vmem>>, %arg15: memref<1x128xf32, #tpu.memory_space<vmem>>, %arg16: memref<128x64xf32, #tpu.memory_space<vmem>>, %arg17: memref<1x64xf32, #tpu.memory_space<vmem>>, %arg18: memref<2x64xf32, #tpu.memory_space<vmem>>, %arg19: memref<2x64xf32, #tpu.memory_space<vmem>>, %arg20: memref<2x64xf32, #tpu.memory_space<vmem>>, %arg21: memref<2x64xf32, #tpu.memory_space<vmem>>, %arg22: memref<128x128xf32, #tpu.memory_space<vmem>>, %arg23: memref<1x128xf32, #tpu.memory_space<vmem>>, %arg24: memref<1x64x128xf32, #tpu.memory_space<vmem>>) attributes {dimension_semantics = [#tpu.dimension_semantics<parallel>], iteration_bounds = array<i64: 2>, scalar_prefetch = 0 : i64, scratch_operands = 0 : i64, tpu.core_type = #tpu.core_type<tc>, window_params = [{transform_indices = @transform_0, window_bounds = array<i64: 1, 64, 128>}, {pipeline_mode = #tpu.pipeline_mode<synchronous>, transform_indices = @transform_1, window_bounds = array<i64: 1, 128>}, {pipeline_mode = #tpu.pipeline_mode<synchronous>, transform_indices = @transform_2, window_bounds = array<i64: 1, 128>}, {pipeline_mode = #tpu.pipeline_mode<synchronous>, transform_indices = @transform_3, window_bounds = array<i64: 1, 128>}, {pipeline_mode = #tpu.pipeline_mode<synchronous>, transform_indices = @transform_4, window_bounds = array<i64: 1, 128>}, {pipeline_mode = #tpu.pipeline_mode<synchronous>, transform_indices = @transform_5, window_bounds = array<i64: 128, 256>}, {pipeline_mode = #tpu.pipeline_mode<synchronous>, transform_indices = @transform_6, window_bounds = array<i64: 1, 256>}, {pipeline_mode = #tpu.pipeline_mode<synchronous>, transform_indices = @transform_7, window_bounds = array<i64: 512, 128>}, {pipeline_mode = #tpu.pipeline_mode<synchronous>, transform_indices = @transform_8, window_bounds = array<i64: 1, 128>}, {pipeline_mode = #tpu.pipeline_mode<synchronous>, transform_indices = @transform_9, window_bounds = array<i64: 1, 128>}, {pipeline_mode = #tpu.pipeline_mode<synchronous>, transform_indices = @transform_10, window_bounds = array<i64: 1, 128>}, {pipeline_mode = #tpu.pipeline_mode<synchronous>, transform_indices = @transform_11, window_bounds = array<i64: 128, 128>}, {pipeline_mode = #tpu.pipeline_mode<synchronous>, transform_indices = @transform_12, window_bounds = array<i64: 1, 128>}, {pipeline_mode = #tpu.pipeline_mode<synchronous>, transform_indices = @transform_13, window_bounds = array<i64: 1, 128>}, {pipeline_mode = #tpu.pipeline_mode<synchronous>, transform_indices = @transform_14, window_bounds = array<i64: 1, 128>}, {pipeline_mode = #tpu.pipeline_mode<synchronous>, transform_indices = @transform_15, window_bounds = array<i64: 128, 64>}, {pipeline_mode = #tpu.pipeline_mode<synchronous>, transform_indices = @transform_16, window_bounds = array<i64: 1, 64>}, {pipeline_mode = #tpu.pipeline_mode<synchronous>, transform_indices = @transform_17, window_bounds = array<i64: 2, 64>}, {pipeline_mode = #tpu.pipeline_mode<synchronous>, transform_indices = @transform_18, window_bounds = array<i64: 2, 64>}, {pipeline_mode = #tpu.pipeline_mode<synchronous>, transform_indices = @transform_19, window_bounds = array<i64: 2, 64>}, {pipeline_mode = #tpu.pipeline_mode<synchronous>, transform_indices = @transform_20, window_bounds = array<i64: 2, 64>}, {pipeline_mode = #tpu.pipeline_mode<synchronous>, transform_indices = @transform_21, window_bounds = array<i64: 128, 128>}, {pipeline_mode = #tpu.pipeline_mode<synchronous>, transform_indices = @transform_22, window_bounds = array<i64: 1, 128>}, {transform_indices = @transform_23, window_bounds = array<i64: 1, 64, 128>}]} {
    %c0 = arith.constant 0 : index
    %c0_0 = arith.constant 0 : index
    %c0_1 = arith.constant 0 : index
    %0 = vector.load %arg1[%c0, %c0_0, %c0_1] : memref<1x64x128xf32, #tpu.memory_space<vmem>>, vector<1x64x128xf32>
    %1 = vector.shape_cast %0 : vector<1x64x128xf32> to vector<64x128xf32>
    %c0_2 = arith.constant 0 : index
    %c0_3 = arith.constant 0 : index
    %2 = vector.load %arg2[%c0_2, %c0_3] : memref<1x128xf32, #tpu.memory_space<vmem>>, vector<1x128xf32>
    %c0_4 = arith.constant 0 : index
    %c0_5 = arith.constant 0 : index
    %3 = vector.load %arg3[%c0_4, %c0_5] : memref<1x128xf32, #tpu.memory_space<vmem>>, vector<1x128xf32>
    %cst = arith.constant dense<0.000000e+00> : vector<64xf32>
    %4 = vector.multi_reduction <add>, %1, %cst [1] : vector<64x128xf32> to vector<64xf32>
    %5 = vector.shape_cast %4 : vector<64xf32> to vector<64x1xf32>
    %cst_6 = arith.constant 1.280000e+02 : f32
    %6 = vector.broadcast %cst_6 : f32 to vector<64x1xf32>
    %7 = arith.divf %5, %6 : vector<64x1xf32>
    %8 = arith.mulf %1, %1 : vector<64x128xf32>
    %cst_7 = arith.constant dense<0.000000e+00> : vector<64xf32>
    %9 = vector.multi_reduction <add>, %8, %cst_7 [1] : vector<64x128xf32> to vector<64xf32>
    %10 = vector.shape_cast %9 : vector<64xf32> to vector<64x1xf32>
    %cst_8 = arith.constant 1.280000e+02 : f32
    %11 = vector.broadcast %cst_8 : f32 to vector<64x1xf32>
    %12 = arith.divf %10, %11 : vector<64x1xf32>
    %13 = arith.mulf %7, %7 : vector<64x1xf32>
    %14 = arith.subf %12, %13 : vector<64x1xf32>
    %15 = vector.broadcast %7 : vector<64x1xf32> to vector<64x128xf32>
    %16 = arith.subf %1, %15 : vector<64x128xf32>
    %cst_9 = arith.constant 9.99999997E-7 : f32
    %17 = vector.broadcast %cst_9 : f32 to vector<64x1xf32>
    %18 = arith.addf %14, %17 : vector<64x1xf32>
    %19 = math.rsqrt %18 : vector<64x1xf32>
    %20 = vector.broadcast %19 : vector<64x1xf32> to vector<64x128xf32>
    %21 = arith.mulf %16, %20 : vector<64x128xf32>
    %22 = vector.broadcast %2 : vector<1x128xf32> to vector<64x128xf32>
    %23 = arith.mulf %21, %22 : vector<64x128xf32>
    %24 = vector.broadcast %3 : vector<1x128xf32> to vector<64x128xf32>
    %25 = arith.addf %23, %24 : vector<64x128xf32>
    %c0_10 = arith.constant 0 : index
    %c0_11 = arith.constant 0 : index
    %26 = vector.load %arg4[%c0_10, %c0_11] : memref<1x128xf32, #tpu.memory_space<vmem>>, vector<1x128xf32>
    %c0_12 = arith.constant 0 : index
    %c0_13 = arith.constant 0 : index
    %27 = vector.load %arg5[%c0_12, %c0_13] : memref<1x128xf32, #tpu.memory_space<vmem>>, vector<1x128xf32>
    %cst_14 = arith.constant dense<0.000000e+00> : vector<64xf32>
    %28 = vector.multi_reduction <add>, %25, %cst_14 [1] : vector<64x128xf32> to vector<64xf32>
    %29 = vector.shape_cast %28 : vector<64xf32> to vector<64x1xf32>
    %cst_15 = arith.constant 1.280000e+02 : f32
    %30 = vector.broadcast %cst_15 : f32 to vector<64x1xf32>
    %31 = arith.divf %29, %30 : vector<64x1xf32>
    %32 = arith.mulf %25, %25 : vector<64x128xf32>
    %cst_16 = arith.constant dense<0.000000e+00> : vector<64xf32>
    %33 = vector.multi_reduction <add>, %32, %cst_16 [1] : vector<64x128xf32> to vector<64xf32>
    %34 = vector.shape_cast %33 : vector<64xf32> to vector<64x1xf32>
    %cst_17 = arith.constant 1.280000e+02 : f32
    %35 = vector.broadcast %cst_17 : f32 to vector<64x1xf32>
    %36 = arith.divf %34, %35 : vector<64x1xf32>
    %37 = arith.mulf %31, %31 : vector<64x1xf32>
    %38 = arith.subf %36, %37 : vector<64x1xf32>
    %39 = vector.broadcast %31 : vector<64x1xf32> to vector<64x128xf32>
    %40 = arith.subf %25, %39 : vector<64x128xf32>
    %cst_18 = arith.constant 9.99999974E-6 : f32
    %41 = vector.broadcast %cst_18 : f32 to vector<64x1xf32>
    %42 = arith.addf %38, %41 : vector<64x1xf32>
    %43 = math.rsqrt %42 : vector<64x1xf32>
    %44 = vector.broadcast %43 : vector<64x1xf32> to vector<64x128xf32>
    %45 = arith.mulf %40, %44 : vector<64x128xf32>
    %46 = vector.broadcast %26 : vector<1x128xf32> to vector<64x128xf32>
    %47 = arith.mulf %45, %46 : vector<64x128xf32>
    %48 = vector.broadcast %27 : vector<1x128xf32> to vector<64x128xf32>
    %49 = arith.addf %47, %48 : vector<64x128xf32>
    %c0_19 = arith.constant 0 : index
    %c0_20 = arith.constant 0 : index
    %50 = vector.load %arg6[%c0_19, %c0_20] : memref<128x256xf32, #tpu.memory_space<vmem>>, vector<128x256xf32>
    %cst_21 = arith.constant dense<0.000000e+00> : vector<64x256xf32>
    %51 = tpu.matmul %49, %50, %cst_21 {dimension_numbers = #tpu.dot_dimension_numbers<[1], [0], [0], [1], [0, 0, 1, 1], [], []>} : vector<64x128xf32>, vector<128x256xf32>, vector<64x256xf32> -> vector<64x256xf32>
    %c0_22 = arith.constant 0 : index
    %c0_23 = arith.constant 0 : index
    %52 = vector.load %arg7[%c0_22, %c0_23] : memref<1x256xf32, #tpu.memory_space<vmem>>, vector<1x256xf32>
    %53 = vector.broadcast %52 : vector<1x256xf32> to vector<64x256xf32>
    %54 = arith.addf %51, %53 : vector<64x256xf32>
    %cst_24 = arith.constant 0.000000e+00 : f32
    %55 = vector.broadcast %cst_24 : f32 to vector<64x256xf32>
    %56 = arith.subf %55, %54 : vector<64x256xf32>
    %57 = math.exp %56 : vector<64x256xf32>
    %cst_25 = arith.constant 1.000000e+00 : f32
    %58 = vector.broadcast %cst_25 : f32 to vector<64x256xf32>
    %59 = arith.addf %58, %57 : vector<64x256xf32>
    %cst_26 = arith.constant 1.000000e+00 : f32
    %60 = vector.broadcast %cst_26 : f32 to vector<64x256xf32>
    %61 = arith.divf %60, %59 : vector<64x256xf32>
    %62 = arith.mulf %54, %61 : vector<64x256xf32>
    %63 = vector.extract_strided_slice %62 {offsets = [0, 0], sizes = [64, 128], strides = [1, 1]} : vector<64x256xf32> to vector<64x128xf32>
    %64 = vector.extract_strided_slice %62 {offsets = [0, 128], sizes = [64, 128], strides = [1, 1]} : vector<64x256xf32> to vector<64x128xf32>
    %65 = vector.extract_strided_slice %49 {offsets = [0, 0], sizes = [16, 128], strides = [1, 1]} : vector<64x128xf32> to vector<16x128xf32>
    %66 = vector.extract_strided_slice %49 {offsets = [16, 0], sizes = [16, 128], strides = [1, 1]} : vector<64x128xf32> to vector<16x128xf32>
    %67 = vector.extract_strided_slice %49 {offsets = [32, 0], sizes = [16, 128], strides = [1, 1]} : vector<64x128xf32> to vector<16x128xf32>
    %68 = vector.extract_strided_slice %49 {offsets = [48, 0], sizes = [16, 128], strides = [1, 1]} : vector<64x128xf32> to vector<16x128xf32>
    %69 = tpu.concatenate %65, %66, %67, %68 in 1 : vector<16x128xf32>, vector<16x128xf32>, vector<16x128xf32>, vector<16x128xf32> -> vector<16x512xf32>
    %c0_27 = arith.constant 0 : index
    %c0_28 = arith.constant 0 : index
    %70 = vector.load %arg8[%c0_27, %c0_28] : memref<512x128xf32, #tpu.memory_space<vmem>>, vector<512x128xf32>
    %cst_29 = arith.constant dense<0.000000e+00> : vector<16x128xf32>
    %71 = tpu.matmul %69, %70, %cst_29 {dimension_numbers = #tpu.dot_dimension_numbers<[1], [0], [0], [1], [0, 0, 1, 1], [], []>} : vector<16x512xf32>, vector<512x128xf32>, vector<16x128xf32> -> vector<16x128xf32>
    %c0_30 = arith.constant 0 : index
    %c0_31 = arith.constant 0 : index
    %72 = vector.load %arg9[%c0_30, %c0_31] : memref<1x128xf32, #tpu.memory_space<vmem>>, vector<1x128xf32>
    %73 = vector.broadcast %72 : vector<1x128xf32> to vector<16x128xf32>
    %74 = arith.addf %71, %73 : vector<16x128xf32>
    %c0_32 = arith.constant 0 : index
    %c0_33 = arith.constant 0 : index
    %75 = vector.load %arg10[%c0_32, %c0_33] : memref<1x128xf32, #tpu.memory_space<vmem>>, vector<1x128xf32>
    %c0_34 = arith.constant 0 : index
    %c0_35 = arith.constant 0 : index
    %76 = vector.load %arg11[%c0_34, %c0_35] : memref<1x128xf32, #tpu.memory_space<vmem>>, vector<1x128xf32>
    %cst_36 = arith.constant dense<0.000000e+00> : vector<16xf32>
    %77 = vector.multi_reduction <add>, %74, %cst_36 [1] : vector<16x128xf32> to vector<16xf32>
    %78 = vector.shape_cast %77 : vector<16xf32> to vector<16x1xf32>
    %cst_37 = arith.constant 1.280000e+02 : f32
    %79 = vector.broadcast %cst_37 : f32 to vector<16x1xf32>
    %80 = arith.divf %78, %79 : vector<16x1xf32>
    %81 = arith.mulf %74, %74 : vector<16x128xf32>
    %cst_38 = arith.constant dense<0.000000e+00> : vector<16xf32>
    %82 = vector.multi_reduction <add>, %81, %cst_38 [1] : vector<16x128xf32> to vector<16xf32>
    %83 = vector.shape_cast %82 : vector<16xf32> to vector<16x1xf32>
    %cst_39 = arith.constant 1.280000e+02 : f32
    %84 = vector.broadcast %cst_39 : f32 to vector<16x1xf32>
    %85 = arith.divf %83, %84 : vector<16x1xf32>
    %86 = arith.mulf %80, %80 : vector<16x1xf32>
    %87 = arith.subf %85, %86 : vector<16x1xf32>
    %88 = vector.broadcast %80 : vector<16x1xf32> to vector<16x128xf32>
    %89 = arith.subf %74, %88 : vector<16x128xf32>
    %cst_40 = arith.constant 9.99999974E-6 : f32
    %90 = vector.broadcast %cst_40 : f32 to vector<16x1xf32>
    %91 = arith.addf %87, %90 : vector<16x1xf32>
    %92 = math.rsqrt %91 : vector<16x1xf32>
    %93 = vector.broadcast %92 : vector<16x1xf32> to vector<16x128xf32>
    %94 = arith.mulf %89, %93 : vector<16x128xf32>
    %95 = vector.broadcast %75 : vector<1x128xf32> to vector<16x128xf32>
    %96 = arith.mulf %94, %95 : vector<16x128xf32>
    %97 = vector.broadcast %76 : vector<1x128xf32> to vector<16x128xf32>
    %98 = arith.addf %96, %97 : vector<16x128xf32>
    %cst_41 = arith.constant 5.000000e-01 : f32
    %99 = vector.broadcast %cst_41 : f32 to vector<16x128xf32>
    %100 = arith.mulf %99, %98 : vector<16x128xf32>
    %cst_42 = arith.constant 0.707106769 : f32
    %101 = vector.broadcast %cst_42 : f32 to vector<16x128xf32>
    %102 = arith.mulf %98, %101 : vector<16x128xf32>
    %cst_43 = arith.constant 0.000000e+00 : f32
    %103 = vector.broadcast %cst_43 : f32 to vector<16x128xf32>
    %104 = arith.cmpf oge, %102, %103 : vector<16x128xf32>
    %cst_44 = arith.constant 1.000000e+00 : f32
    %cst_45 = arith.constant -1.000000e+00 : f32
    %105 = vector.broadcast %cst_44 : f32 to vector<16x128xf32>
    %106 = vector.broadcast %cst_45 : f32 to vector<16x128xf32>
    %107 = arith.select %104, %105, %106 : vector<16x128xi1>, vector<16x128xf32>
    %108 = math.absf %102 : vector<16x128xf32>
    %cst_46 = arith.constant 0.327591091 : f32
    %109 = vector.broadcast %cst_46 : f32 to vector<16x128xf32>
    %110 = arith.mulf %109, %108 : vector<16x128xf32>
    %cst_47 = arith.constant 1.000000e+00 : f32
    %111 = vector.broadcast %cst_47 : f32 to vector<16x128xf32>
    %112 = arith.addf %111, %110 : vector<16x128xf32>
    %cst_48 = arith.constant 1.000000e+00 : f32
    %113 = vector.broadcast %cst_48 : f32 to vector<16x128xf32>
    %114 = arith.divf %113, %112 : vector<16x128xf32>
    %cst_49 = arith.constant 1.06140542 : f32
    %115 = vector.broadcast %cst_49 : f32 to vector<16x128xf32>
    %116 = arith.mulf %115, %114 : vector<16x128xf32>
    %cst_50 = arith.constant -1.45315206 : f32
    %117 = vector.broadcast %cst_50 : f32 to vector<16x128xf32>
    %118 = arith.addf %116, %117 : vector<16x128xf32>
    %119 = arith.mulf %118, %114 : vector<16x128xf32>
    %cst_51 = arith.constant 1.42141378 : f32
    %120 = vector.broadcast %cst_51 : f32 to vector<16x128xf32>
    %121 = arith.addf %119, %120 : vector<16x128xf32>
    %122 = arith.mulf %121, %114 : vector<16x128xf32>
    %cst_52 = arith.constant -0.284496725 : f32
    %123 = vector.broadcast %cst_52 : f32 to vector<16x128xf32>
    %124 = arith.addf %122, %123 : vector<16x128xf32>
    %125 = arith.mulf %124, %114 : vector<16x128xf32>
    %cst_53 = arith.constant 0.254829586 : f32
    %126 = vector.broadcast %cst_53 : f32 to vector<16x128xf32>
    %127 = arith.addf %125, %126 : vector<16x128xf32>
    %128 = arith.mulf %127, %114 : vector<16x128xf32>
    %cst_54 = arith.constant 0.000000e+00 : f32
    %129 = vector.broadcast %cst_54 : f32 to vector<16x128xf32>
    %130 = arith.subf %129, %108 : vector<16x128xf32>
    %131 = arith.mulf %130, %108 : vector<16x128xf32>
    %132 = math.exp %131 : vector<16x128xf32>
    %133 = arith.mulf %128, %132 : vector<16x128xf32>
    %cst_55 = arith.constant 1.000000e+00 : f32
    %134 = vector.broadcast %cst_55 : f32 to vector<16x128xf32>
    %135 = arith.subf %134, %133 : vector<16x128xf32>
    %136 = arith.mulf %107, %135 : vector<16x128xf32>
    %cst_56 = arith.constant 1.000000e+00 : f32
    %137 = vector.broadcast %cst_56 : f32 to vector<16x128xf32>
    %138 = arith.addf %137, %136 : vector<16x128xf32>
    %139 = arith.mulf %100, %138 : vector<16x128xf32>
    %c0_57 = arith.constant 0 : index
    %c0_58 = arith.constant 0 : index
    %140 = vector.load %arg12[%c0_57, %c0_58] : memref<128x128xf32, #tpu.memory_space<vmem>>, vector<128x128xf32>
    %cst_59 = arith.constant dense<0.000000e+00> : vector<64x128xf32>
    %141 = tpu.matmul %49, %140, %cst_59 {dimension_numbers = #tpu.dot_dimension_numbers<[1], [0], [0], [1], [0, 0, 1, 1], [], []>} : vector<64x128xf32>, vector<128x128xf32>, vector<64x128xf32> -> vector<64x128xf32>
    %c0_60 = arith.constant 0 : index
    %c0_61 = arith.constant 0 : index
    %142 = vector.load %arg13[%c0_60, %c0_61] : memref<1x128xf32, #tpu.memory_space<vmem>>, vector<1x128xf32>
    %143 = vector.broadcast %142 : vector<1x128xf32> to vector<64x128xf32>
    %144 = arith.addf %141, %143 : vector<64x128xf32>
    %c0_62 = arith.constant 0 : index
    %c0_63 = arith.constant 0 : index
    %145 = vector.load %arg14[%c0_62, %c0_63] : memref<1x128xf32, #tpu.memory_space<vmem>>, vector<1x128xf32>
    %c0_64 = arith.constant 0 : index
    %c0_65 = arith.constant 0 : index
    %146 = vector.load %arg15[%c0_64, %c0_65] : memref<1x128xf32, #tpu.memory_space<vmem>>, vector<1x128xf32>
    %cst_66 = arith.constant dense<0.000000e+00> : vector<64xf32>
    %147 = vector.multi_reduction <add>, %144, %cst_66 [1] : vector<64x128xf32> to vector<64xf32>
    %148 = vector.shape_cast %147 : vector<64xf32> to vector<64x1xf32>
    %cst_67 = arith.constant 1.280000e+02 : f32
    %149 = vector.broadcast %cst_67 : f32 to vector<64x1xf32>
    %150 = arith.divf %148, %149 : vector<64x1xf32>
    %151 = arith.mulf %144, %144 : vector<64x128xf32>
    %cst_68 = arith.constant dense<0.000000e+00> : vector<64xf32>
    %152 = vector.multi_reduction <add>, %151, %cst_68 [1] : vector<64x128xf32> to vector<64xf32>
    %153 = vector.shape_cast %152 : vector<64xf32> to vector<64x1xf32>
    %cst_69 = arith.constant 1.280000e+02 : f32
    %154 = vector.broadcast %cst_69 : f32 to vector<64x1xf32>
    %155 = arith.divf %153, %154 : vector<64x1xf32>
    %156 = arith.mulf %150, %150 : vector<64x1xf32>
    %157 = arith.subf %155, %156 : vector<64x1xf32>
    %158 = vector.broadcast %150 : vector<64x1xf32> to vector<64x128xf32>
    %159 = arith.subf %144, %158 : vector<64x128xf32>
    %cst_70 = arith.constant 9.99999974E-6 : f32
    %160 = vector.broadcast %cst_70 : f32 to vector<64x1xf32>
    %161 = arith.addf %157, %160 : vector<64x1xf32>
    %162 = math.rsqrt %161 : vector<64x1xf32>
    %163 = vector.broadcast %162 : vector<64x1xf32> to vector<64x128xf32>
    %164 = arith.mulf %159, %163 : vector<64x128xf32>
    %165 = vector.broadcast %145 : vector<1x128xf32> to vector<64x128xf32>
    %166 = arith.mulf %164, %165 : vector<64x128xf32>
    %167 = vector.broadcast %146 : vector<1x128xf32> to vector<64x128xf32>
    %168 = arith.addf %166, %167 : vector<64x128xf32>
    %cst_71 = arith.constant 5.000000e-01 : f32
    %169 = vector.broadcast %cst_71 : f32 to vector<64x128xf32>
    %170 = arith.mulf %169, %168 : vector<64x128xf32>
    %cst_72 = arith.constant 0.707106769 : f32
    %171 = vector.broadcast %cst_72 : f32 to vector<64x128xf32>
    %172 = arith.mulf %168, %171 : vector<64x128xf32>
    %cst_73 = arith.constant 0.000000e+00 : f32
    %173 = vector.broadcast %cst_73 : f32 to vector<64x128xf32>
    %174 = arith.cmpf oge, %172, %173 : vector<64x128xf32>
    %cst_74 = arith.constant 1.000000e+00 : f32
    %cst_75 = arith.constant -1.000000e+00 : f32
    %175 = vector.broadcast %cst_74 : f32 to vector<64x128xf32>
    %176 = vector.broadcast %cst_75 : f32 to vector<64x128xf32>
    %177 = arith.select %174, %175, %176 : vector<64x128xi1>, vector<64x128xf32>
    %178 = math.absf %172 : vector<64x128xf32>
    %cst_76 = arith.constant 0.327591091 : f32
    %179 = vector.broadcast %cst_76 : f32 to vector<64x128xf32>
    %180 = arith.mulf %179, %178 : vector<64x128xf32>
    %cst_77 = arith.constant 1.000000e+00 : f32
    %181 = vector.broadcast %cst_77 : f32 to vector<64x128xf32>
    %182 = arith.addf %181, %180 : vector<64x128xf32>
    %cst_78 = arith.constant 1.000000e+00 : f32
    %183 = vector.broadcast %cst_78 : f32 to vector<64x128xf32>
    %184 = arith.divf %183, %182 : vector<64x128xf32>
    %cst_79 = arith.constant 1.06140542 : f32
    %185 = vector.broadcast %cst_79 : f32 to vector<64x128xf32>
    %186 = arith.mulf %185, %184 : vector<64x128xf32>
    %cst_80 = arith.constant -1.45315206 : f32
    %187 = vector.broadcast %cst_80 : f32 to vector<64x128xf32>
    %188 = arith.addf %186, %187 : vector<64x128xf32>
    %189 = arith.mulf %188, %184 : vector<64x128xf32>
    %cst_81 = arith.constant 1.42141378 : f32
    %190 = vector.broadcast %cst_81 : f32 to vector<64x128xf32>
    %191 = arith.addf %189, %190 : vector<64x128xf32>
    %192 = arith.mulf %191, %184 : vector<64x128xf32>
    %cst_82 = arith.constant -0.284496725 : f32
    %193 = vector.broadcast %cst_82 : f32 to vector<64x128xf32>
    %194 = arith.addf %192, %193 : vector<64x128xf32>
    %195 = arith.mulf %194, %184 : vector<64x128xf32>
    %cst_83 = arith.constant 0.254829586 : f32
    %196 = vector.broadcast %cst_83 : f32 to vector<64x128xf32>
    %197 = arith.addf %195, %196 : vector<64x128xf32>
    %198 = arith.mulf %197, %184 : vector<64x128xf32>
    %cst_84 = arith.constant 0.000000e+00 : f32
    %199 = vector.broadcast %cst_84 : f32 to vector<64x128xf32>
    %200 = arith.subf %199, %178 : vector<64x128xf32>
    %201 = arith.mulf %200, %178 : vector<64x128xf32>
    %202 = math.exp %201 : vector<64x128xf32>
    %203 = arith.mulf %198, %202 : vector<64x128xf32>
    %cst_85 = arith.constant 1.000000e+00 : f32
    %204 = vector.broadcast %cst_85 : f32 to vector<64x128xf32>
    %205 = arith.subf %204, %203 : vector<64x128xf32>
    %206 = arith.mulf %177, %205 : vector<64x128xf32>
    %cst_86 = arith.constant 1.000000e+00 : f32
    %207 = vector.broadcast %cst_86 : f32 to vector<64x128xf32>
    %208 = arith.addf %207, %206 : vector<64x128xf32>
    %209 = arith.mulf %170, %208 : vector<64x128xf32>
    %c0_87 = arith.constant 0 : index
    %c0_88 = arith.constant 0 : index
    %210 = vector.load %arg16[%c0_87, %c0_88] : memref<128x64xf32, #tpu.memory_space<vmem>>, vector<128x64xf32>
    %c0_89 = arith.constant 0 : index
    %c0_90 = arith.constant 0 : index
    %211 = vector.load %arg17[%c0_89, %c0_90] : memref<1x64xf32, #tpu.memory_space<vmem>>, vector<1x64xf32>
    %cst_91 = arith.constant dense<0.000000e+00> : vector<16x64xf32>
    %212 = tpu.matmul %139, %210, %cst_91 {dimension_numbers = #tpu.dot_dimension_numbers<[1], [0], [0], [1], [0, 0, 1, 1], [], []>} : vector<16x128xf32>, vector<128x64xf32>, vector<16x64xf32> -> vector<16x64xf32>
    %213 = vector.broadcast %211 : vector<1x64xf32> to vector<16x64xf32>
    %214 = arith.addf %212, %213 : vector<16x64xf32>
    %cst_92 = arith.constant 0.000000e+00 : f32
    %215 = vector.broadcast %cst_92 : f32 to vector<16x64xf32>
    %216 = arith.subf %215, %214 : vector<16x64xf32>
    %217 = math.exp %216 : vector<16x64xf32>
    %cst_93 = arith.constant 1.000000e+00 : f32
    %218 = vector.broadcast %cst_93 : f32 to vector<16x64xf32>
    %219 = arith.addf %218, %217 : vector<16x64xf32>
    %cst_94 = arith.constant 1.000000e+00 : f32
    %220 = vector.broadcast %cst_94 : f32 to vector<16x64xf32>
    %221 = arith.divf %220, %219 : vector<16x64xf32>
    %222 = arith.mulf %214, %221 : vector<16x64xf32>
    %c0_95 = arith.constant 0 : index
    %c0_96 = arith.constant 0 : index
    %223 = vector.load %arg18[%c0_95, %c0_96] : memref<2x64xf32, #tpu.memory_space<vmem>>, vector<2x64xf32>
    %c0_97 = arith.constant 0 : index
    %c0_98 = arith.constant 0 : index
    %224 = vector.load %arg19[%c0_97, %c0_98] : memref<2x64xf32, #tpu.memory_space<vmem>>, vector<2x64xf32>
    %225 = vector.extract_strided_slice %223 {offsets = [0, 0], sizes = [1, 64], strides = [1, 1]} : vector<2x64xf32> to vector<1x64xf32>
    %226 = vector.broadcast %225 : vector<1x64xf32> to vector<16x64xf32>
    %227 = arith.mulf %222, %226 : vector<16x64xf32>
    %228 = vector.extract_strided_slice %224 {offsets = [0, 0], sizes = [1, 64], strides = [1, 1]} : vector<2x64xf32> to vector<1x64xf32>
    %229 = vector.broadcast %228 : vector<1x64xf32> to vector<16x64xf32>
    %230 = arith.addf %227, %229 : vector<16x64xf32>
    %231 = vector.extract_strided_slice %223 {offsets = [1, 0], sizes = [1, 64], strides = [1, 1]} : vector<2x64xf32> to vector<1x64xf32>
    %232 = vector.broadcast %231 : vector<1x64xf32> to vector<16x64xf32>
    %233 = arith.mulf %222, %232 : vector<16x64xf32>
    %234 = vector.extract_strided_slice %224 {offsets = [1, 0], sizes = [1, 64], strides = [1, 1]} : vector<2x64xf32> to vector<1x64xf32>
    %235 = vector.broadcast %234 : vector<1x64xf32> to vector<16x64xf32>
    %236 = arith.addf %233, %235 : vector<16x64xf32>
    %cst_99 = arith.constant dense<0.000000e+00> : vector<64x64xf32>
    %237 = tpu.matmul %209, %210, %cst_99 {dimension_numbers = #tpu.dot_dimension_numbers<[1], [0], [0], [1], [0, 0, 1, 1], [], []>} : vector<64x128xf32>, vector<128x64xf32>, vector<64x64xf32> -> vector<64x64xf32>
    %238 = vector.broadcast %211 : vector<1x64xf32> to vector<64x64xf32>
    %239 = arith.addf %237, %238 : vector<64x64xf32>
    %cst_100 = arith.constant 0.000000e+00 : f32
    %240 = vector.broadcast %cst_100 : f32 to vector<64x64xf32>
    %241 = arith.subf %240, %239 : vector<64x64xf32>
    %242 = math.exp %241 : vector<64x64xf32>
    %cst_101 = arith.constant 1.000000e+00 : f32
    %243 = vector.broadcast %cst_101 : f32 to vector<64x64xf32>
    %244 = arith.addf %243, %242 : vector<64x64xf32>
    %cst_102 = arith.constant 1.000000e+00 : f32
    %245 = vector.broadcast %cst_102 : f32 to vector<64x64xf32>
    %246 = arith.divf %245, %244 : vector<64x64xf32>
    %247 = arith.mulf %239, %246 : vector<64x64xf32>
    %c0_103 = arith.constant 0 : index
    %c0_104 = arith.constant 0 : index
    %248 = vector.load %arg20[%c0_103, %c0_104] : memref<2x64xf32, #tpu.memory_space<vmem>>, vector<2x64xf32>
    %c0_105 = arith.constant 0 : index
    %c0_106 = arith.constant 0 : index
    %249 = vector.load %arg21[%c0_105, %c0_106] : memref<2x64xf32, #tpu.memory_space<vmem>>, vector<2x64xf32>
    %250 = vector.extract_strided_slice %248 {offsets = [0, 0], sizes = [1, 64], strides = [1, 1]} : vector<2x64xf32> to vector<1x64xf32>
    %251 = vector.broadcast %250 : vector<1x64xf32> to vector<64x64xf32>
    %252 = arith.mulf %247, %251 : vector<64x64xf32>
    %253 = vector.extract_strided_slice %249 {offsets = [0, 0], sizes = [1, 64], strides = [1, 1]} : vector<2x64xf32> to vector<1x64xf32>
    %254 = vector.broadcast %253 : vector<1x64xf32> to vector<64x64xf32>
    %255 = arith.addf %252, %254 : vector<64x64xf32>
    %256 = vector.extract_strided_slice %248 {offsets = [1, 0], sizes = [1, 64], strides = [1, 1]} : vector<2x64xf32> to vector<1x64xf32>
    %257 = vector.broadcast %256 : vector<1x64xf32> to vector<64x64xf32>
    %258 = arith.mulf %247, %257 : vector<64x64xf32>
    %259 = vector.extract_strided_slice %249 {offsets = [1, 0], sizes = [1, 64], strides = [1, 1]} : vector<2x64xf32> to vector<1x64xf32>
    %260 = vector.broadcast %259 : vector<1x64xf32> to vector<64x64xf32>
    %261 = arith.addf %258, %260 : vector<64x64xf32>
    %262 = vector.extract_strided_slice %63 {offsets = [0, 0], sizes = [64, 64], strides = [1, 1]} : vector<64x128xf32> to vector<64x64xf32>
    %cst_107 = arith.constant dense<0.000000e+00> : vector<64x16xf32>
    %263 = tpu.matmul %262, %230, %cst_107 {dimension_numbers = #tpu.dot_dimension_numbers<[1], [1], [0], [0], [0, 0, 1, 0], [], []>} : vector<64x64xf32>, vector<16x64xf32>, vector<64x16xf32> -> vector<64x16xf32>
    %cst_108 = arith.constant 1.562500e-02 : f32
    %264 = vector.broadcast %cst_108 : f32 to vector<64x16xf32>
    %265 = arith.mulf %263, %264 : vector<64x16xf32>
    %cst_109 = arith.constant 0.000000e+00 : f32
    %266 = vector.broadcast %cst_109 : f32 to vector<64x16xf32>
    %267 = arith.maximumf %265, %266 : vector<64x16xf32>
    %268 = arith.mulf %267, %267 : vector<64x16xf32>
    %cst_110 = arith.constant dense<0.000000e+00> : vector<64x64xf32>
    %269 = tpu.matmul %268, %236, %cst_110 {dimension_numbers = #tpu.dot_dimension_numbers<[1], [0], [0], [1], [0, 0, 1, 1], [], []>} : vector<64x16xf32>, vector<16x64xf32>, vector<64x64xf32> -> vector<64x64xf32>
    %270 = vector.extract_strided_slice %63 {offsets = [0, 64], sizes = [64, 64], strides = [1, 1]} : vector<64x128xf32> to vector<64x64xf32>
    %cst_111 = arith.constant dense<0.000000e+00> : vector<64x64xf32>
    %271 = tpu.matmul %270, %255, %cst_111 {dimension_numbers = #tpu.dot_dimension_numbers<[1], [1], [0], [0], [0, 0, 1, 0], [], []>} : vector<64x64xf32>, vector<64x64xf32>, vector<64x64xf32> -> vector<64x64xf32>
    %cst_112 = arith.constant 1.562500e-02 : f32
    %272 = vector.broadcast %cst_112 : f32 to vector<64x64xf32>
    %273 = arith.mulf %271, %272 : vector<64x64xf32>
    %cst_113 = arith.constant 0.000000e+00 : f32
    %274 = vector.broadcast %cst_113 : f32 to vector<64x64xf32>
    %275 = arith.maximumf %273, %274 : vector<64x64xf32>
    %276 = arith.mulf %275, %275 : vector<64x64xf32>
    %cst_114 = arith.constant dense<0.000000e+00> : vector<64x64xf32>
    %277 = tpu.matmul %276, %261, %cst_114 {dimension_numbers = #tpu.dot_dimension_numbers<[1], [0], [0], [1], [0, 0, 1, 1], [], []>} : vector<64x64xf32>, vector<64x64xf32>, vector<64x64xf32> -> vector<64x64xf32>
    %278 = tpu.concatenate %269, %277 in 1 : vector<64x64xf32>, vector<64x64xf32> -> vector<64x128xf32>
    %279 = arith.mulf %278, %64 : vector<64x128xf32>
    %c0_115 = arith.constant 0 : index
    %c0_116 = arith.constant 0 : index
    %280 = vector.load %arg22[%c0_115, %c0_116] : memref<128x128xf32, #tpu.memory_space<vmem>>, vector<128x128xf32>
    %cst_117 = arith.constant dense<0.000000e+00> : vector<64x128xf32>
    %281 = tpu.matmul %279, %280, %cst_117 {dimension_numbers = #tpu.dot_dimension_numbers<[1], [0], [0], [1], [0, 0, 1, 1], [], []>} : vector<64x128xf32>, vector<128x128xf32>, vector<64x128xf32> -> vector<64x128xf32>
    %c0_118 = arith.constant 0 : index
    %c0_119 = arith.constant 0 : index
    %282 = vector.load %arg23[%c0_118, %c0_119] : memref<1x128xf32, #tpu.memory_space<vmem>>, vector<1x128xf32>
    %283 = vector.broadcast %282 : vector<1x128xf32> to vector<64x128xf32>
    %284 = arith.addf %281, %283 : vector<64x128xf32>
    %285 = arith.addf %1, %284 : vector<64x128xf32>
    %286 = arith.addf %285, %278 : vector<64x128xf32>
    %c0_120 = arith.constant 0 : index
    %c0_121 = arith.constant 0 : index
    %c0_122 = arith.constant 0 : index
    %287 = vector.load %arg24[%c0_120, %c0_121, %c0_122] : memref<1x64x128xf32, #tpu.memory_space<vmem>>, vector<1x64x128xf32>
    %288 = vector.shape_cast %287 : vector<1x64x128xf32> to vector<64x128xf32>
    %289 = vector.shape_cast %286 : vector<64x128xf32> to vector<1x64x128xf32>
    tpu.vector_store %arg24[%c0_120, %c0_121, %c0_122], %289 {strides = array<i32>} : memref<1x64x128xf32, #tpu.memory_space<vmem>>, vector<1x64x128xf32>,
    return
  }
  func.func @transform_0(%arg0: i32) -> (i32, i32, i32) {
    %c0_i32 = arith.constant 0 : i32
    %c0_i32_0 = arith.constant 0 : i32
    %c0_i32_1 = arith.constant 0 : i32
    return %arg0, %c0_i32, %c0_i32_0 : i32, i32, i32
  }
  func.func @transform_1(%arg0: i32) -> (i32, i32) {
    %c0_i32 = arith.constant 0 : i32
    %c0_i32_0 = arith.constant 0 : i32
    %c0_i32_1 = arith.constant 0 : i32
    return %c0_i32, %c0_i32_0 : i32, i32
  }
  func.func @transform_2(%arg0: i32) -> (i32, i32) {
    %c0_i32 = arith.constant 0 : i32
    %c0_i32_0 = arith.constant 0 : i32
    %c0_i32_1 = arith.constant 0 : i32
    return %c0_i32, %c0_i32_0 : i32, i32
  }
  func.func @transform_3(%arg0: i32) -> (i32, i32) {
    %c0_i32 = arith.constant 0 : i32
    %c0_i32_0 = arith.constant 0 : i32
    %c0_i32_1 = arith.constant 0 : i32
    return %c0_i32, %c0_i32_0 : i32, i32
  }
  func.func @transform_4(%arg0: i32) -> (i32, i32) {
    %c0_i32 = arith.constant 0 : i32
    %c0_i32_0 = arith.constant 0 : i32
    %c0_i32_1 = arith.constant 0 : i32
    return %c0_i32, %c0_i32_0 : i32, i32
  }
  func.func @transform_5(%arg0: i32) -> (i32, i32) {
    %c0_i32 = arith.constant 0 : i32
    %c0_i32_0 = arith.constant 0 : i32
    %c0_i32_1 = arith.constant 0 : i32
    return %c0_i32, %c0_i32_0 : i32, i32
  }
  func.func @transform_6(%arg0: i32) -> (i32, i32) {
    %c0_i32 = arith.constant 0 : i32
    %c0_i32_0 = arith.constant 0 : i32
    %c0_i32_1 = arith.constant 0 : i32
    return %c0_i32, %c0_i32_0 : i32, i32
  }
  func.func @transform_7(%arg0: i32) -> (i32, i32) {
    %c0_i32 = arith.constant 0 : i32
    %c0_i32_0 = arith.constant 0 : i32
    %c0_i32_1 = arith.constant 0 : i32
    return %c0_i32, %c0_i32_0 : i32, i32
  }
  func.func @transform_8(%arg0: i32) -> (i32, i32) {
    %c0_i32 = arith.constant 0 : i32
    %c0_i32_0 = arith.constant 0 : i32
    %c0_i32_1 = arith.constant 0 : i32
    return %c0_i32, %c0_i32_0 : i32, i32
  }
  func.func @transform_9(%arg0: i32) -> (i32, i32) {
    %c0_i32 = arith.constant 0 : i32
    %c0_i32_0 = arith.constant 0 : i32
    %c0_i32_1 = arith.constant 0 : i32
    return %c0_i32, %c0_i32_0 : i32, i32
  }
  func.func @transform_10(%arg0: i32) -> (i32, i32) {
    %c0_i32 = arith.constant 0 : i32
    %c0_i32_0 = arith.constant 0 : i32
    %c0_i32_1 = arith.constant 0 : i32
    return %c0_i32, %c0_i32_0 : i32, i32
  }
  func.func @transform_11(%arg0: i32) -> (i32, i32) {
    %c0_i32 = arith.constant 0 : i32
    %c0_i32_0 = arith.constant 0 : i32
    %c0_i32_1 = arith.constant 0 : i32
    return %c0_i32, %c0_i32_0 : i32, i32
  }
  func.func @transform_12(%arg0: i32) -> (i32, i32) {
    %c0_i32 = arith.constant 0 : i32
    %c0_i32_0 = arith.constant 0 : i32
    %c0_i32_1 = arith.constant 0 : i32
    return %c0_i32, %c0_i32_0 : i32, i32
  }
  func.func @transform_13(%arg0: i32) -> (i32, i32) {
    %c0_i32 = arith.constant 0 : i32
    %c0_i32_0 = arith.constant 0 : i32
    %c0_i32_1 = arith.constant 0 : i32
    return %c0_i32, %c0_i32_0 : i32, i32
  }
  func.func @transform_14(%arg0: i32) -> (i32, i32) {
    %c0_i32 = arith.constant 0 : i32
    %c0_i32_0 = arith.constant 0 : i32
    %c0_i32_1 = arith.constant 0 : i32
    return %c0_i32, %c0_i32_0 : i32, i32
  }
  func.func @transform_15(%arg0: i32) -> (i32, i32) {
    %c0_i32 = arith.constant 0 : i32
    %c0_i32_0 = arith.constant 0 : i32
    %c0_i32_1 = arith.constant 0 : i32
    return %c0_i32, %c0_i32_0 : i32, i32
  }
  func.func @transform_16(%arg0: i32) -> (i32, i32) {
    %c0_i32 = arith.constant 0 : i32
    %c0_i32_0 = arith.constant 0 : i32
    %c0_i32_1 = arith.constant 0 : i32
    return %c0_i32, %c0_i32_0 : i32, i32
  }
  func.func @transform_17(%arg0: i32) -> (i32, i32) {
    %c0_i32 = arith.constant 0 : i32
    %c0_i32_0 = arith.constant 0 : i32
    %c0_i32_1 = arith.constant 0 : i32
    return %c0_i32, %c0_i32_0 : i32, i32
  }
  func.func @transform_18(%arg0: i32) -> (i32, i32) {
    %c0_i32 = arith.constant 0 : i32
    %c0_i32_0 = arith.constant 0 : i32
    %c0_i32_1 = arith.constant 0 : i32
    return %c0_i32, %c0_i32_0 : i32, i32
  }
  func.func @transform_19(%arg0: i32) -> (i32, i32) {
    %c0_i32 = arith.constant 0 : i32
    %c0_i32_0 = arith.constant 0 : i32
    %c0_i32_1 = arith.constant 0 : i32
    return %c0_i32, %c0_i32_0 : i32, i32
  }
  func.func @transform_20(%arg0: i32) -> (i32, i32) {
    %c0_i32 = arith.constant 0 : i32
    %c0_i32_0 = arith.constant 0 : i32
    %c0_i32_1 = arith.constant 0 : i32
    return %c0_i32, %c0_i32_0 : i32, i32
  }
  func.func @transform_21(%arg0: i32) -> (i32, i32) {
    %c0_i32 = arith.constant 0 : i32
    %c0_i32_0 = arith.constant 0 : i32
    %c0_i32_1 = arith.constant 0 : i32
    return %c0_i32, %c0_i32_0 : i32, i32
  }
  func.func @transform_22(%arg0: i32) -> (i32, i32) {
    %c0_i32 = arith.constant 0 : i32
    %c0_i32_0 = arith.constant 0 : i32
    %c0_i32_1 = arith.constant 0 : i32
    return %c0_i32, %c0_i32_0 : i32, i32
  }
  func.func @transform_23(%arg0: i32) -> (i32, i32, i32) {
    %c0_i32 = arith.constant 0 : i32
    %c0_i32_0 = arith.constant 0 : i32
    %c0_i32_1 = arith.constant 0 : i32
    return %arg0, %c0_i32, %c0_i32_0 : i32, i32, i32
  }
}

</mosaic_0001>

<bundles_post_ra>
// kernel: tpu_custom_call.1
= control target key start
LH: loop header
LB: loop body
LE: loop exit
PB: predicated region body
PF: predicated region fallthrough
CT: control target
= control target key end

     0   :  { %s6250_s0 = inlined_call_operand.vmem [shape: f32[2,64,128], index: 0, kind: input, shape index: {}]   ;;  %s6251_s1 = inlined_call_operand.vmem [shape: f32[1,128], index: 1, kind: input, shape index: {}]   ;;  %s6252_s2 = inlined_call_operand.vmem [shape: f32[1,128], index: 2, kind: input, shape index: {}]   ;;  %s6253_s3 = inlined_call_operand.vmem [shape: f32[1,128], index: 3, kind: input, shape index: {}]   ;;  %s6254_s4 = inlined_call_operand.vmem [shape: f32[1,128], index: 4, kind: input, shape index: {}]   ;;  %s6255_s5 = inlined_call_operand.hbm [shape: f32[128,256], index: 5, kind: input, shape index: {}]   ;;  %s6256_s6 = inlined_call_operand.vmem [shape: f32[1,256], index: 6, kind: input, shape index: {}]   ;;  %s6257_s7 = inlined_call_operand.hbm [shape: f32[512,128], index: 7, kind: input, shape index: {}]   ;;  %s6258_s8 = inlined_call_operand.vmem [shape: f32[1,128], index: 8, kind: input, shape index: {}]   ;;  %s6259_s9 = inlined_call_operand.vmem [shape: f32[1,128], index: 9, kind: input, shape index: {}]   ;;  %s6260_s10 = inlined_call_operand.vmem [shape: f32[1,128], index: 10, kind: input, shape index: {}]   ;;  %s6261_s11 = inlined_call_operand.hbm [shape: f32[128,128], index: 11, kind: input, shape index: {}]   ;;  %s6262_s12 = inlined_call_operand.vmem [shape: f32[1,128], index: 12, kind: input, shape index: {}]   ;;  %s6263_s13 = inlined_call_operand.vmem [shape: f32[1,128], index: 13, kind: input, shape index: {}]   ;;  %s6264_s14 = inlined_call_operand.vmem [shape: f32[1,128], index: 14, kind: input, shape index: {}]   ;;  %s6265_s15 = inlined_call_operand.vmem [shape: f32[128,64], index: 15, kind: input, shape index: {}]   ;;  %s6266_s16 = inlined_call_operand.vmem [shape: f32[1,64], index: 16, kind: input, shape index: {}]   ;;  %s6267_s17 = inlined_call_operand.vmem [shape: f32[2,64], index: 17, kind: input, shape index: {}]   ;;  %s6268_s18 = inlined_call_operand.vmem [shape: f32[2,64], index: 18, kind: input, shape index: {}]   ;;  %s6269_s19 = inlined_call_operand.vmem [shape: f32[2,64], index: 19, kind: input, shape index: {}]   ;;  %s6270_s20 = inlined_call_operand.vmem [shape: f32[2,64], index: 20, kind: input, shape index: {}]   ;;  %s6271_s21 = inlined_call_operand.hbm [shape: f32[128,128], index: 21, kind: input, shape index: {}]   ;;  %s6272_s22 = inlined_call_operand.vmem [shape: f32[1,128], index: 22, kind: input, shape index: {}]   ;;  %s6273_s23 = inlined_call_operand.hbm [shape: f32[2,64,128], index: 23, kind: output, shape index: {}]  }
   0x1   :  { %6288 = sst [smem:[#allocation23_spill]] %s6250_s0 }
   0x2   :  { %6289 = sst [smem:[#allocation24_spill]] %s6251_s1 }
   0x3   :  { %6290 = sst [smem:[#allocation25_spill]] %s6252_s2 }
   0x4   :  { %6291 = sst [smem:[#allocation26_spill]] %s6253_s3 }
   0x5   :  { %6292 = sst [smem:[#allocation27_spill]] %s6254_s4 }
   0x6   :  { %6293 = sst [smem:[#allocation28_spill]] %s6255_s5 }
   0x7   :  { %6294 = sst [smem:[#allocation29_spill]] %s6256_s6 }
   0x8   :  { %6295 = sst [smem:[#allocation30_spill]] %s6257_s7 }
   0x9   :  { %6296 = sst [smem:[#allocation31_spill]] %s6269_s19 }
   0xa   :  { %6297 = sst [smem:[#allocation32_spill]] %s6270_s20 }
   0xb   :  { %6298 = sst [smem:[#allocation33_spill]] %s6272_s22 }
   0xc   :  { %6299 = sst [smem:[#allocation34_spill]] %s6273_s23 }
   0xd   :  { %28 = vsyncpa [#allocation3], 0 }
   0xe   :  { %29 = vsyncpa [#allocation6], 0 }
   0xf   :  { %30 = vsyncpa [#allocation9], 0 }
  0x10   :  { %31 = vsyncpa [#allocation4], 0 }
  0x11   :  { %33 = vsyncpa [#allocation4 + $0x1], 0  ;;  %s4177_s4 = smov 0   ;;  %s4179_s30 = smov 0  }
  0x12   :  { %s4181_s24 = smov 0   ;;  %s4183_s25 = smov 0  }
  0x13 LB: > { %6300 = sst [smem:[#allocation15_spill]] %s4030_s4  ;;  %s4198_s5 = sadd.s32 4294967295, %s4042_s25   ;;  %s4042_s25 = sphi %s4183_s25, %s6385_s25   ;;  %s4038_s24 = sphi %s4181_s24, %s6388_s24   ;;  %s4034_s30 = sphi %s4179_s30, %s6387_s30   ;;  %s4030_s4 = sphi %s4177_s4, %s6386_s4  }
  0x14   : > { %6301 = sst [smem:[#allocation16_spill]] %s4034_s30  ;;  %s3444_s1 = sadd.s32 4294967294, %s4042_s25  }
  0x15   : > { %6302 = sst [smem:[#allocation17_spill]] %s4038_s24  ;;  %s4202_s26 = sadd.s32 1, %s4042_s25  }
  0x16   : > { %6303 = sst [smem:[#allocation18_spill]] %s4042_s25  ;;  %s534_s2 = sadd.s32 1, %s4038_s24 }
  0x17   : > { %6304 = sst [smem:[#allocation19_spill]] %s4202_s26  ;;  %s531_s6 = ssub.s32 %s4042_s25, %s4202_s26 }
  0x18   : > { %p544_p0 = scmp.ne.s32.totalorder %s4038_s24, %s4034_s30  ;;  %p532_p1 = scmp.eq.s32.totalorder %s531_s6, 0 }
  0x19   : > { %p545_p2 = scmp.eq.s32.totalorder %s4198_s5, 1  ;;  %p550_p3 = scmp.ne.s32.totalorder %s4034_s30, %s4030_s4 }
  0x1a   : > { %p551_p4 = scmp.eq.s32.totalorder %s3444_s1, 1  ;;  %p3445_p7 = scmp.ge.s32.totalorder %s4042_s25, 1 }
  0x1b   : > { %s4213_s27 = scalar_select %p532_p1, %s4038_s24, %s534_s2  }
  0x1c   : > { %p4215_p5 = por %p545_p2, %p544_p0  ;;  %p4219_p6 = por %p551_p4, %p550_p3 }
  0x1d   : > { %6305 = sst [smem:[#allocation20_spill]] %s4213_s27  ;;  %p558_p8 = scmp.lt.s32.totalorder %s4042_s25, 3 }
  0x1e   : > { %s6306_s7 = scalar_select %p4215_p5, 1, 0 }
  0x1f   : > { %s6308_s28 = scalar_select %p4219_p6, 1, 0 }
  0x20   : > { %6307 = sst [smem:[#allocation21_spill]] %s6306_s7  ;;  %p3575_p9 = scmp.eq.s32.totalorder %s4198_s5, 0 }
  0x21   : > { %6309 = sst [smem:[#allocation22_spill]] %s6308_s28  ;;  %p4226_p10 = pnand %p3445_p7, %p558_p8 }
  0x22   : > { %s6311_s1 = sld [smem:[#allocation30_spill]]  ;;  %s4044_s6 = smov [#allocation5]  }
  0x23   : > { %p3558_p11 = pneg %p4226_p10  ;;  %s600_s27 = sshll.u32 %s4044_s6, 4  ;;  %s601_s27 = int_to_ptr.vmem [resolvable:$true] %s600_s27 }
  0x24   : > { %s6313_s4 = sld [smem:[#allocation28_spill]]  ;;  %s4045_s3 = smov 128  }
  0x25   : > { %p4237_p12 = pnand %p3575_p9, %p3558_p11  ;;  %s4046_s0 = smov 8  }
  0x26   : > { %s4048_s7 = smov 256   ;;  %s4049_s23 = smov 16  }
  0x27   : > { %s621_s26 = sshll.u32 %s6261_s11, 4  ;;  %s622_s26 = int_to_ptr.hbm [resolvable:$true] %s621_s26 }
  0x28   : > { %s598_s2 = sshll.u32 %s6311_s1, 4  ;;  %s4047_s1 = smov [#allocation2]   ;;  %s599_s2 = int_to_ptr.hbm [resolvable:$true] %s598_s2 }
  0x29   : > { %3564 = dma.hbm_to_vmem [thread:$0]  (!%p4237_p12), %s599_s2, 8192, %s601_s27, [#allocation6], %s4045_s3, %s4045_s3, %s4046_s0  }
  0x2a   : > { %s581_s25 = sshll.u32 %s6313_s4, 4  ;;  %s583_s6 = sshll.u32 %s4047_s1, 4  ;;  %s582_s25 = int_to_ptr.hbm [resolvable:$true] %s581_s25  ;;  %s584_s6 = int_to_ptr.vmem [resolvable:$true] %s583_s6 }
  0x2b   : > { %3561 = dma.hbm_to_vmem [thread:$0]  (!%p4237_p12), %s582_s25, 4096, %s584_s6, [#allocation3], %s4048_s7, %s4048_s7, %s4049_s23  }
  0x2c   : > { %s4050_s4 = smov [#allocation7]   ;;  %s662_s27 = sshll.u32 %s6271_s21, 4  ;;  %s663_s27 = int_to_ptr.hbm [resolvable:$true] %s662_s27 }
  0x2d   : > { %s623_s28 = sshll.u32 %s4050_s4, 4  ;;  %s4051_s2 = smov [#allocation8]   ;;  %s624_s28 = int_to_ptr.vmem [resolvable:$true] %s623_s28 }
  0x2e   : > { %3567 = dma.hbm_to_vmem [thread:$0]  (!%p4237_p12), %s622_s26, 2048, %s624_s28, [#allocation6], %s4045_s3, %s4045_s3, %s4046_s0  }
  0x2f   : > { %s664_s1 = sshll.u32 %s4051_s2, 4  ;;  %691 = sbr.rel (%p4226_p10) target bundleno = 1595 (0x63b), region = 112  ;;  %s665_s1 = int_to_ptr.vmem [resolvable:$true] %s664_s1 }
  0x30   : > { %3570 = dma.hbm_to_vmem [thread:$0]  (!%p4237_p12), %s663_s27, 2048, %s665_s1, [#allocation9], %s4045_s3, %s4045_s3, %s4046_s0  }
  0x34   : > { %4013 = dma.done.wait (%p3575_p9), [#allocation3], 4096  }
  0x35   : > { %4015 = vsyncadd (%p3575_p9), [#allocation3], 4294963200 }
  0x36   : > { %4017 = dma.done.wait (%p3575_p9), [#allocation6], 10240  }
  0x37   : > { %4019 = vsyncadd (%p3575_p9), [#allocation6], 4294957056 }
  0x38   : > { %4021 = dma.done.wait (%p3575_p9), [#allocation9], 2048  }
  0x39   : > { %4023 = vsyncadd (%p3575_p9), [#allocation9], 4294965248  ;;  %p771_p13 = scmp.lt.s32.totalorder %s4198_s5, 1  ;;  %s6314_s30 = sld [smem:[#allocation23_spill]]  ;;  %v4052_v16 = vmov 128.0  }
  0x3a   : > { %3641 = vrcp.f32 %v4052_v16  ;;  %s6321_s29 = sld [smem:[#allocation24_spill]]  ;;  %s3507_s3 = sshll.u32 %s4198_s5, 6 }
  0x3b   : > { %s772_s19 = scalar_select %p771_p13, %s4198_s5, 1 }
  0x3c   : > { %s6322_s6 = sld [smem:[#allocation25_spill]] }
  0x3d   : > { %s3506_s20 = sshll.u32 %s772_s19, 6  ;;  %s6329_s28 = sld [smem:[#allocation26_spill]] }
  0x3e   : > { %s6330_s1 = sld [smem:[#allocation27_spill]] }
  0x3f   : > { %s4277_s24 = scalar_lea.vmem %s6314_s30, %s3506_s20  ;;  %s6333_s7 = sld [smem:[#allocation29_spill]] }
  0x40   : > { %v4280_v0 = vld [vmem:[%s4277_s24 + $0x10] sm:$0xff]  ;;  %v4283_v1 = vld [vmem:[%s4277_s24 + $0x8] sm:$0xff]  ;;  %v4286_v2 = vld [vmem:[%s4277_s24] sm:$0xff]  ;;  %v3642_v17 = vpop.eup %3641  ;;  %s6360_s26 = sld [smem:[#allocation31_spill]] }
  0x41   : > { %790 = vadd.xlane.f32.xlu2 %v4280_v0  ;;  %788 = vadd.xlane.f32.xlu1 %v4283_v1  ;;  %v819_v3 = vmul.f32 %v4280_v0, %v4280_v0  ;;  %v818_v4 = vmul.f32 %v4283_v1, %v4283_v1  ;;  %v817_v5 = vmul.f32 %v4286_v2, %v4286_v2  ;;  %v4298_v6 = vld [vmem:[%s4277_s24 + $0x18] sm:$0xff]  ;;  %v4303_v8 = vld [vmem:[%s4277_s24 + $0x20] sm:$0xff]  ;;  %v4308_v9 = vld [vmem:[%s4277_s24 + $0x30] sm:$0xff]  ;;  %v803_v18 = vmul.f32 128.0, %v3642_v17  ;;  %s6373_s27 = sld [smem:[#allocation32_spill]] }
  0x42   : > { %786 = vadd.xlane.f32.xlu0 %v4286_v2  ;;  %v820_v7 = vmul.f32 %v4298_v6, %v4298_v6  ;;  %v821_v10 = vmul.f32 %v4303_v8, %v4303_v8  ;;  %v823_v11 = vmul.f32 %v4308_v9, %v4308_v9  ;;  %v4316_v12 = vld [vmem:[%s4277_s24 + $0x28] sm:$0xff]  ;;  %v4321_v14 = vld [vmem:[%s4277_s24 + $0x38] sm:$0xff]  ;;  %vm807_vm0 = vweird.f32 %v3642_v17  ;;  %s6379_s22 = sld [smem:[#allocation33_spill]] }
  0x43   : > { %v822_v13 = vmul.f32 %v4316_v12, %v4316_v12  ;;  %v824_v15 = vmul.f32 %v4321_v14, %v4321_v14  ;;  %v804_v19 = vsub.f32 1.0, %v803_v18 }
  0x45   : > { %v805_v20 = vmul.f32 %v3642_v17, %v804_v19 }
  0x47   : > { %v806_v21 = vadd.f32 %v3642_v17, %v805_v20 }
  0x49   : > { %829 = vadd.xlane.f32.xlu2 %v819_v3  ;;  %827 = vadd.xlane.f32.xlu1 %v818_v4  ;;  %v4327_v25 = vsel %vm807_vm0, %v3642_v17, %v806_v21 }
  0x4a   : > { %825 = vadd.xlane.f32.xlu0 %v817_v5 }
  0x51   : > { %831 = vadd.xlane.f32.xlu1 %v820_v7  ;;  %794 = vadd.xlane.f32.xlu2 %v4303_v8 }
  0x52   : > { %792 = vadd.xlane.f32.xlu0 %v4298_v6 }
  0x59   : > { %833 = vadd.xlane.f32.xlu1 %v821_v10  ;;  %837 = vadd.xlane.f32.xlu2 %v823_v11 }
  0x5a   : > { %798 = vadd.xlane.f32.xlu0 %v4308_v9 }
  0x61   : > { %835 = vadd.xlane.f32.xlu2 %v822_v13  ;;  %800 = vadd.xlane.f32.xlu1 %v4321_v14 }
  0x62   : > { %796 = vadd.xlane.f32.xlu0 %v4316_v12 }
  0x6a   : > { %839 = vadd.xlane.f32.xlu0 %v824_v15 }
  0xb4   : > { %v791_v22 = vpop.xlane.xlu2 %790  ;;  %v789_v23 = vpop.xlane.xlu1 %788 }
  0xb5   : > { %v787_v24 = vpop.xlane.xlu0 %786  ;;  %v4330_v26 = vmul.f32 %v4327_v25, %v791_v22  ;;  %v4333_v27 = vmul.f32 %v4327_v25, %v789_v23 }
  0xb6   : > { %v4336_v28 = vmul.f32 %v4327_v25, %v787_v24 }
  0xb7   : > { %v851_v29 = vmul.f32 %v4330_v26, %v4330_v26  ;;  %v850_v30 = vmul.f32 %v4333_v27, %v4333_v27 }
  0xb8   : > { %v849_v36 = vmul.f32 %v4336_v28, %v4336_v28 }
  0xbc   : > { %v830_v31 = vpop.xlane.xlu2 %829  ;;  %v828_v32 = vpop.xlane.xlu1 %827 }
  0xbd   : > { %v843_v33 = vmul.f32 %v830_v31, %v4327_v25  ;;  %v842_v34 = vmul.f32 %v828_v32, %v4327_v25  ;;  %v826_v35 = vpop.xlane.xlu0 %825  ;;  %v867_v31 = vsub.f32 %v4280_v0, %v4330_v26 }
  0xbe   : > { %v841_v37 = vmul.f32 %v826_v35, %v4327_v25  ;;  %v866_v35 = vsub.f32 %v4283_v1, %v4333_v27 }
  0xbf   : > { %v859_v38 = vsub.f32 %v843_v33, %v851_v29  ;;  %v858_v39 = vsub.f32 %v842_v34, %v850_v30 }
  0xc0   : > { %v857_v40 = vsub.f32 %v841_v37, %v849_v36 }
  0xc1   : > { %v875_v41 = vadd.f32 1e-06, %v859_v38  ;;  %v874_v42 = vadd.f32 1e-06, %v858_v39 }
  0xc2   : > { %v873_v43 = vadd.f32 1e-06, %v857_v40  ;;  %v4411_v40 = vld [vmem:[%s6321_s29] ss:$0 sm:$0xff]  ;;  %s4053_s29 = smov 64  }
  0xc3   : > { %3643 = vrsqrt.f32 %v875_v41  ;;  %vm907_vm1 = vweird.f32 %v875_v41  ;;  %vm897_vm6 = vweird.f32 %v874_v42 }
  0xc4   : > { %3645 = vrsqrt.f32 %v874_v42  ;;  %v832_v44 = vpop.xlane.xlu1 %831  ;;  %v795_v45 = vpop.xlane.xlu2 %794  ;;  %vm887_vm8 = vweird.f32 %v873_v43 }
  0xc5   : > { %3647 = vrsqrt.f32 %v873_v43  ;;  %v793_v46 = vpop.xlane.xlu0 %792  ;;  %v844_v47 = vmul.f32 %v832_v44, %v4327_v25  ;;  %v4352_v49 = vmul.f32 %v4327_v25, %v795_v45 }
  0xc6   : > { %v4349_v48 = vmul.f32 %v4327_v25, %v793_v46  ;;  %v4429_v46 = vld [vmem:[%s6322_s6] ss:$0 sm:$0xff] }
  0xc7   : > { %v853_v57 = vmul.f32 %v4352_v49, %v4352_v49 }
  0xc8   : > { %v852_v50 = vmul.f32 %v4349_v48, %v4349_v48 }
  0xc9   : > { %v4356_v51 = vpop.eup %3643 }
  0xca   : > { %v3646_v52 = vpop.eup %3645  ;;  %v902_v53 = vmul.f32 %v4356_v51, %v875_v41  ;;  %v860_v54 = vsub.f32 %v844_v47, %v852_v50  ;;  %vm908_vm2 = vweird.f32 %v4356_v51 }
  0xcb   : > { %v4359_v55 = vpop.eup %3647  ;;  %v892_v56 = vmul.f32 %v3646_v52, %v874_v42  ;;  %vm898_vm3 = vweird.f32 %v3646_v52  ;;  %vm4381_vm5 = vmor %vm907_vm1, %vm908_vm2 }
  0xcc   : > { %v903_v58 = vmul.f32 %v4356_v51, %v902_v53  ;;  %v882_v59 = vmul.f32 %v4359_v55, %v873_v43  ;;  %v4365_v60 = vadd.f32 1e-06, %v860_v54  ;;  %v834_v61 = vpop.xlane.xlu1 %833  ;;  %v838_v62 = vpop.xlane.xlu2 %837  ;;  %vm888_vm4 = vweird.f32 %v4359_v55  ;;  %vm4390_vm7 = vmor %vm897_vm6, %vm898_vm3 }
  0xcd   : > { %v893_v63 = vmul.f32 %v3646_v52, %v892_v56  ;;  %v845_v3 = vmul.f32 %v834_v61, %v4327_v25  ;;  %v799_v4 = vpop.xlane.xlu0 %798  ;;  %v847_v15 = vmul.f32 %v838_v62, %v4327_v25  ;;  %vm4400_vm9 = vmor %vm887_vm8, %vm888_vm4  ;;  %v865_v43 = vsub.f32 %v4286_v2, %v4336_v28 }
  0xce   : > { %v904_v5 = vmul.f32 0.5, %v903_v58  ;;  %v883_v7 = vmul.f32 %v4359_v55, %v882_v59  ;;  %3649 = vrsqrt.f32 %v4365_v60  ;;  %v4371_v13 = vmul.f32 %v4327_v25, %v799_v4 }
  0xcf   : > { %v894_v10 = vmul.f32 0.5, %v893_v63  ;;  %v861_v11 = vsub.f32 %v845_v3, %v853_v57  ;;  %vm917_vm10 = vweird.f32 %v4365_v60 }
  0xd0   : > { %v905_v16 = vsub.f32 1.5, %v904_v5  ;;  %v884_v17 = vmul.f32 0.5, %v883_v7  ;;  %v855_v20 = vmul.f32 %v4371_v13, %v4371_v13 }
  0xd1   : > { %v895_v18 = vsub.f32 1.5, %v894_v10  ;;  %v4375_v19 = vadd.f32 1e-06, %v861_v11 }
  0xd2   : > { %v906_v21 = vmul.f32 %v4356_v51, %v905_v16  ;;  %v885_v22 = vsub.f32 1.5, %v884_v17  ;;  %v863_v29 = vsub.f32 %v847_v15, %v855_v20 }
  0xd3   : > { %v896_v24 = vmul.f32 %v3646_v52, %v895_v18  ;;  %3651 = vrsqrt.f32 %v4375_v19  ;;  %vm927_vm13 = vweird.f32 %v4375_v19 }
  0xd4   : > { %v4386_v30 = vpop.eup %3649  ;;  %v886_v33 = vmul.f32 %v4359_v55, %v885_v22  ;;  %v836_v34 = vpop.xlane.xlu2 %835  ;;  %v910_v36 = vsel %vm4381_vm5, %v4356_v51, %v906_v21  ;;  %v4406_v26 = vadd.f32 1e-06, %v863_v29  ;;  %v868_v22 = vsub.f32 %v4298_v6, %v4349_v48 }
  0xd5   : > { %v912_v0 = vmul.f32 %v4386_v30, %v4365_v60  ;;  %v797_v38 = vpop.xlane.xlu0 %796  ;;  %v801_v39 = vpop.xlane.xlu1 %800  ;;  %v846_v27 = vmul.f32 %v836_v34, %v4327_v25  ;;  %v900_v41 = vsel %vm4390_vm7, %v3646_v52, %v896_v24  ;;  %v963_v53 = vmul.f32 %v910_v36, %v867_v31 }
  0xd6   : > { %v4414_v1 = vmul.f32 %v4327_v25, %v797_v38  ;;  %v890_v42 = vsel %vm4400_vm9, %v4359_v55, %v886_v33  ;;  %3653 = vrsqrt.f32 %v4406_v26  ;;  %v962_v45 = vmul.f32 %v900_v41, %v866_v35  ;;  %v1655_v35 = vld [vmem:[#allocation5 + $0xc0] sm:$0xff] }
  0xd7   : > { %v913_v44 = vmul.f32 %v4386_v30, %v912_v0  ;;  %v4434_v50 = vmul.f32 %v4327_v25, %v801_v39  ;;  %v961_v28 = vmul.f32 %v890_v42, %v865_v43  ;;  %v974_v59 = vmul.f32 %v4411_v40, %v963_v53  ;;  %v1645_v39 = vld [vmem:[#allocation5 + $0x70] sm:$0xff] }
  0xd8   : > { %v854_v47 = vmul.f32 %v4414_v1, %v4414_v1  ;;  %v973_v2 = vmul.f32 %v4411_v40, %v962_v45  ;;  %vm918_vm11 = vweird.f32 %v4386_v30  ;;  %vm947_vm15 = vweird.f32 %v4406_v26  ;;  %v1661_v43 = vld [vmem:[#allocation5 + $0xf0] sm:$0xff] }
  0xd9   : > { %v3652_v51 = vpop.eup %3651  ;;  %v914_v52 = vmul.f32 0.5, %v913_v44  ;;  %v972_v58 = vmul.f32 %v4411_v40, %v961_v28  ;;  %v856_v4 = vmul.f32 %v4434_v50, %v4434_v50  ;;  %vm4456_vm12 = vmor %vm917_vm10, %vm918_vm11  ;;  %v4466_v17 = vadd.f32 %v4429_v46, %v974_v59 }
  0xda   : > { %v922_v54 = vmul.f32 %v3652_v51, %v4375_v19  ;;  %v862_v55 = vsub.f32 %v846_v27, %v854_v47  ;;  %v4439_v57 = vadd.f32 %v4429_v46, %v973_v2  ;;  %vm928_vm14 = vweird.f32 %v3652_v51  ;;  %v1662_v27 = vld [vmem:[#allocation5 + $0xf8] sm:$0xff] }
  0xdb   : > { %v915_v56 = vsub.f32 1.5, %v914_v52  ;;  %v4452_v5 = vadd.f32 %v4429_v46, %v972_v58  ;;  %vm929_vm1 = vmor %vm927_vm13, %vm928_vm14  ;;  %v869_v34 = vsub.f32 %v4303_v8, %v4352_v49  ;;  %v1646_v49 = vld [vmem:[#allocation5 + $0x78] sm:$0xff]  ;;  %1722 = vmatpush.msra.mxu3 %v1662_v27  ;;  %v1205_v27 = vld [vmem:[#allocation2 + $0x70] sm:$0xff] }
  0xdc   : > { %v923_v61 = vmul.f32 %v3652_v51, %v922_v54  ;;  %v4445_v62 = vadd.f32 1e-06, %v862_v55  ;;  %v3654_v63 = vpop.eup %3653  ;;  %995 = vadd.xlane.f32.xlu0 %v4439_v57  ;;  %v1018_v19 = vmul.f32 %v4439_v57, %v4439_v57  ;;  %1699 = vmatpush.msra.mxu2 %v1646_v49  ;;  %v870_v54 = vsub.f32 %v4316_v12, %v4414_v1  ;;  %v1635_v49 = vld [vmem:[#allocation5 + $0x20] sm:$0xff] }
  0xdd   : > { %v916_v3 = vmul.f32 %v4386_v30, %v915_v56  ;;  %v840_v7 = vpop.xlane.xlu0 %839  ;;  %v942_v60 = vmul.f32 %v3654_v63, %v4406_v26  ;;  %993 = vadd.xlane.f32.xlu1 %v4452_v5  ;;  %v1017_v16 = vmul.f32 %v4452_v5, %v4452_v5  ;;  %vm948_vm0 = vweird.f32 %v3654_v63  ;;  %1723 = vmatpush.msra.mxu3 %v1661_v43  ;;  %v1203_v43 = vld [vmem:[#allocation2 + $0x60] sm:$0xff] }
  0xde   : > { %v924_v10 = vmul.f32 0.5, %v923_v61  ;;  %3655 = vrsqrt.f32 %v4445_v62  ;;  %v848_v15 = vmul.f32 %v840_v7, %v4327_v25  ;;  %vm4480_vm2 = vmor %vm947_vm15, %vm948_vm0  ;;  %v871_v26 = vsub.f32 %v4308_v9, %v4371_v13  ;;  %v1644_v13 = vld [vmem:[#allocation5 + $0x68] sm:$0xff]  ;;  %1700 = vmatpush.msra.mxu2 %v1645_v39 }
  0xdf   : > { %v920_v18 = vsel %vm4456_vm12, %v4386_v30, %v916_v3  ;;  %v943_v21 = vmul.f32 %v3654_v63, %v942_v60  ;;  %1025 = vadd.xlane.f32.xlu2 %v1017_v16  ;;  %v1019_v30 = vmul.f32 %v4466_v17, %v4466_v17  ;;  %vm937_vm3 = vweird.f32 %v4445_v62  ;;  %v1652_v39 = vld [vmem:[#allocation5 + $0xa8] sm:$0xff] }
  0xe0   : > { %v925_v20 = vsub.f32 1.5, %v924_v10  ;;  %v864_v23 = vsub.f32 %v848_v15, %v856_v4  ;;  %v964_v31 = vmul.f32 %v920_v18, %v868_v22  ;;  %1701 = vmatpush.msra.mxu2 %v1644_v13  ;;  %v872_v4 = vsub.f32 %v4321_v14, %v4434_v50  ;;  %v1643_v18 = vld [vmem:[#allocation5 + $0x60] sm:$0xff]  ;;  %v1642_v22 = vld [vmem:[#allocation5 + $0x58] sm:$0xff]  ;;  %v1201_v13 = vld [vmem:[#allocation2 + $0x50] sm:$0xff] }
  0xe1   : > { %v944_v29 = vmul.f32 0.5, %v943_v21  ;;  %v1221_v21 = vld [vmem:[#allocation2 + $0xf0] sm:$0xff] }
  0xe2   : > { %v926_v24 = vmul.f32 %v3652_v51, %v925_v20  ;;  %v880_v32 = vadd.f32 1e-06, %v864_v23  ;;  %v975_v8 = vmul.f32 %v4411_v40, %v964_v31  ;;  %v1660_v20 = vld [vmem:[#allocation5 + $0xe8] sm:$0xff]  ;;  %1702 = vmatpush.msra.mxu2 %v1643_v18  ;;  %1229 = vmatpush.msra.mxu0 %v1221_v21  ;;  %v1219_v23 = vld [vmem:[#allocation2 + $0xe0] sm:$0xff] }
  0xe3   : > { %v945_v6 = vsub.f32 1.5, %v944_v29  ;;  %1724 = vmatpush.msra.mxu3 %v1660_v20  ;;  %3508 = vmatpush.msra.mxu1 %v1221_v21  ;;  %v1217_v29 = vld [vmem:[#allocation2 + $0xd0] sm:$0xff]  ;;  %v1640_v31 = vld [vmem:[#allocation5 + $0x48] sm:$0xff]  ;;  %v1674_v20 = vld [vmem:[#allocation5 + $0x158] sm:$0xff] }
  0xe4   : > { %v3656_v33 = vpop.eup %3655  ;;  %v930_v48 = vsel %vm929_vm1, %v3652_v51, %v926_v24  ;;  %3657 = vrsqrt.f32 %v880_v32  ;;  %1029 = vadd.xlane.f32.xlu0 %v1019_v30  ;;  %v4499_v52 = vadd.f32 %v4429_v46, %v975_v8  ;;  %vm957_vm6 = vweird.f32 %v880_v32  ;;  %1703 = vmatpush.msra.mxu2 %v1642_v22  ;;  %v1658_v24 = vld [vmem:[#allocation5 + $0xd8] sm:$0xff]  ;;  %v1215_v30 = vld [vmem:[#allocation2 + $0xc0] sm:$0xff] }
  0xe5   : > { %v932_v36 = vmul.f32 %v3656_v33, %v4445_v62  ;;  %v946_v37 = vmul.f32 %v3654_v63, %v945_v6  ;;  %v965_v0 = vmul.f32 %v930_v48, %v869_v34  ;;  %1027 = vadd.xlane.f32.xlu1 %v1018_v19  ;;  %vm938_vm4 = vweird.f32 %v3656_v33  ;;  %1230 = vmatpush.msra.mxu0 %v1219_v23  ;;  %v1656_v34 = vld [vmem:[#allocation5 + $0xc8] sm:$0xff]  ;;  %v1213_v6 = vld [vmem:[#allocation2 + $0xb0] sm:$0xff]  ;;  %v1638_v48 = vld [vmem:[#allocation5 + $0x38] sm:$0xff] }
  0xe6   : > { %vm939_vm5 = vmor %vm937_vm3, %vm938_vm4  ;;  %v1020_v56 = vmul.f32 %v4499_v52, %v4499_v52  ;;  %3509 = vmatpush.msra.mxu1 %v1219_v23  ;;  %v1637_v19 = vld [vmem:[#allocation5 + $0x30] sm:$0xff]  ;;  %v1207_v8 = vld [vmem:[#allocation2 + $0x80] sm:$0xff] }
  0xe7   : > { %v933_v38 = vmul.f32 %v3656_v33, %v932_v36  ;;  %v976_v41 = vmul.f32 %v4411_v40, %v965_v0  ;;  %v950_v42 = vsel %vm4480_vm2, %v3654_v63, %v946_v37  ;;  %997 = vadd.xlane.f32.xlu2 %v4466_v17  ;;  %1231 = vmatpush.msra.mxu0 %v1217_v29  ;;  %v1211_v36 = vld [vmem:[#allocation2 + $0xa0] sm:$0xff]  ;;  %v1654_v37 = vld [vmem:[#allocation5 + $0xb8] sm:$0xff]  ;;  %v1209_v0 = vld [vmem:[#allocation2 + $0x90] sm:$0xff] }
  0xe8   : > { %v967_v9 = vmul.f32 %v950_v42, %v871_v26  ;;  %3510 = vmatpush.msra.mxu1 %v1217_v29  ;;  %v1636_v26 = vld [vmem:[#allocation5 + $0x28] sm:$0xff]  ;;  %v1651_v42 = vld [vmem:[#allocation5 + $0xa0] sm:$0xff]  ;;  %v1942_v22 = vld [vmem:[#allocation7 + $0x78] sm:$0xff] }
  0xe9   : > { %v934_v44 = vmul.f32 0.5, %v933_v38  ;;  %v4496_v45 = vadd.f32 %v4429_v46, %v976_v41  ;;  %1232 = vmatpush.msra.mxu0 %v1215_v30  ;;  %v1653_v38 = vld [vmem:[#allocation5 + $0xb0] sm:$0xff]  ;;  %v1634_v41 = vld [vmem:[#allocation5 + $0x18] sm:$0xff]  ;;  %v1691_v21 = vld [vmem:[#allocation5 + $0x1e0] sm:$0xff] }
  0xea   : > { %v3658_v47 = vpop.eup %3657  ;;  %v978_v2 = vmul.f32 %v4411_v40, %v967_v9  ;;  %3511 = vmatpush.msra.mxu1 %v1215_v30  ;;  %v1650_v9 = vld [vmem:[#allocation5 + $0x98] sm:$0xff]  ;;  %v1941_v29 = vld [vmem:[#allocation7 + $0x70] sm:$0xff]  ;;  %v1672_v30 = vld [vmem:[#allocation5 + $0x148] sm:$0xff] }
  0xeb   : > { %v935_v51 = vsub.f32 1.5, %v934_v44  ;;  %v952_v28 = vmul.f32 %v3658_v47, %v880_v32  ;;  %vm958_vm7 = vweird.f32 %v3658_v47  ;;  %v1021_v10 = vmul.f32 %v4496_v45, %v4496_v45  ;;  %v1657_v32 = vld [vmem:[#allocation5 + $0xd0] sm:$0xff]  ;;  %1233 = vmatpush.msra.mxu0 %v1213_v6 }
  0xec   : > { %1001 = vadd.xlane.f32.xlu0 %v4496_v45  ;;  %v4509_v58 = vadd.f32 %v4429_v46, %v978_v2  ;;  %vm959_vm8 = vmor %vm957_vm6, %vm958_vm7  ;;  %3512 = vmatpush.msra.mxu1 %v1213_v6  ;;  %v1633_v44 = vld [vmem:[#allocation5 + $0x10] sm:$0xff]  ;;  %v1199_v2 = vld [vmem:[#allocation2 + $0x40] sm:$0xff] }
  0xed   : > { %v936_v53 = vmul.f32 %v3656_v33, %v935_v51  ;;  %v953_v55 = vmul.f32 %v3658_v47, %v952_v28  ;;  %999 = vadd.xlane.f32.xlu1 %v4499_v52  ;;  %1234 = vmatpush.msra.mxu0 %v1211_v36  ;;  %v1649_v51 = vld [vmem:[#allocation5 + $0x90] sm:$0xff]  ;;  %v1631_v28 = vld [vmem:[#allocation5] sm:$0xff] }
  0xee   : > { %v1023_v12 = vmul.f32 %v4509_v58, %v4509_v58  ;;  %3513 = vmatpush.msra.mxu1 %v1211_v36  ;;  %v1671_v36 = vld [vmem:[#allocation5 + $0x140] sm:$0xff] }
  0xef   : > { %v940_v59 = vsel %vm939_vm5, %v3656_v33, %v936_v53  ;;  %v954_v61 = vmul.f32 0.5, %v953_v55  ;;  %1031 = vadd.xlane.f32.xlu2 %v1020_v56  ;;  %v1639_v33 = vld [vmem:[#allocation5 + $0x40] sm:$0xff]  ;;  %1235 = vmatpush.msra.mxu0 %v1209_v0  ;;  %v1648_v53 = vld [vmem:[#allocation5 + $0x88] sm:$0xff]  ;;  %v1678_v55 = vld [vmem:[#allocation5 + $0x178] sm:$0xff] }
  0xf0   : > { %v966_v62 = vmul.f32 %v940_v59, %v870_v54  ;;  %3514 = vmatpush.msra.mxu1 %v1209_v0  ;;  %v1197_v54 = vld [vmem:[#allocation2 + $0x30] sm:$0xff]  ;;  %v1647_v56 = vld [vmem:[#allocation5 + $0x80] sm:$0xff] }
  0xf1   : > { %v955_v63 = vsub.f32 1.5, %v954_v61  ;;  %1236 = vmatpush.msra.mxu0 %v1207_v8  ;;  %v1195_v59 = vld [vmem:[#allocation2 + $0x20] sm:$0xff]  ;;  %v1677_v61 = vld [vmem:[#allocation5 + $0x170] sm:$0xff] }
  0xf2   : > { %v977_v1 = vmul.f32 %v4411_v40, %v966_v62  ;;  %3515 = vmatpush.msra.mxu1 %v1207_v8  ;;  %v1694_v62 = vld [vmem:[#allocation5 + $0x1f8] sm:$0xff] }
  0xf3   : > { %v956_v3 = vmul.f32 %v3658_v47, %v955_v63  ;;  %1237 = vmatpush.msra.mxu0 %v1205_v27  ;;  %v1670_v8 = vld [vmem:[#allocation5 + $0x138] sm:$0xff] }
  0xf4   : > { %1037 = vadd.xlane.f32.xlu0 %v1023_v12  ;;  %v4520_v60 = vadd.f32 %v4429_v46, %v977_v1  ;;  %3516 = vmatpush.msra.mxu1 %v1205_v27  ;;  %v1193_v12 = vld [vmem:[#allocation2 + $0x10] sm:$0xff]  ;;  %v1676_v1 = vld [vmem:[#allocation5 + $0x168] sm:$0xff] }
  0xf5   : > { %v960_v7 = vsel %vm959_vm8, %v3658_v47, %v956_v3  ;;  %1005 = vadd.xlane.f32.xlu1 %v4509_v58  ;;  %1238 = vmatpush.msra.mxu0 %v1203_v43  ;;  %v1632_v47 = vld [vmem:[#allocation5 + $0x8] sm:$0xff]  ;;  %v1693_v3 = vld [vmem:[#allocation5 + $0x1f0] sm:$0xff] }
  0xf6   : > { %v968_v11 = vmul.f32 %v960_v7, %v872_v4  ;;  %v1022_v15 = vmul.f32 %v4520_v60, %v4520_v60  ;;  %3517 = vmatpush.msra.mxu1 %v1203_v43  ;;  %v1669_v43 = vld [vmem:[#allocation5 + $0x130] sm:$0xff] }
  0xf7   : > { %1033 = vadd.xlane.f32.xlu2 %v1021_v10  ;;  %1239 = vmatpush.msra.mxu0 %v1201_v13  ;;  %v1191_v10 = vld [vmem:[#allocation2] sm:$0xff] }
  0xf8   : > { %v979_v16 = vmul.f32 %v4411_v40, %v968_v11  ;;  %v1659_v40 = vld [vmem:[#allocation5 + $0xe0] sm:$0xff]  ;;  %3518 = vmatpush.msra.mxu1 %v1201_v13 }
  0xf9   : > { %1725 = vmatpush.msra.mxu3 %v1659_v40  ;;  %1240 = vmatpush.msra.mxu0 %v1199_v2  ;;  %v1675_v11 = vld [vmem:[#allocation5 + $0x160] sm:$0xff] }
  0xfa   : > { %v4527_v14 = vadd.f32 %v4429_v46, %v979_v16  ;;  %v1641_v46 = vld [vmem:[#allocation5 + $0x50] sm:$0xff]  ;;  %3519 = vmatpush.msra.mxu1 %v1199_v2  ;;  %v1668_v2 = vld [vmem:[#allocation5 + $0x128] sm:$0xff] }
  0xfb   : > { %1704 = vmatpush.msra.mxu2 %v1641_v46  ;;  %1726 = vmatpush.msra.mxu3 %v1658_v24  ;;  %v1673_v46 = vld [vmem:[#allocation5 + $0x150] sm:$0xff]  ;;  %v1690_v24 = vld [vmem:[#allocation5 + $0x1d8] sm:$0xff] }
  0xfc   : > { %1035 = vadd.xlane.f32.xlu0 %v1022_v15  ;;  %v1024_v50 = vmul.f32 %v4527_v14, %v4527_v14  ;;  %1241 = vmatpush.msra.mxu0 %v1197_v54  ;;  %v1692_v15 = vld [vmem:[#allocation5 + $0x1e8] sm:$0xff] }
  0xfd   : > { %1003 = vadd.xlane.f32.xlu1 %v4520_v60  ;;  %1705 = vmatpush.msra.mxu2 %v1640_v31 }
  0xfe   : > { %1727 = vmatpush.msra.mxu3 %v1657_v32  ;;  %3520 = vmatpush.msra.mxu1 %v1197_v54 }
  0xff   : > { %1007 = vadd.xlane.f32.xlu2 %v4527_v14  ;;  %1706 = vmatpush.msra.mxu2 %v1639_v33  ;;  %v1689_v33 = vld [vmem:[#allocation5 + $0x1d0] sm:$0xff] }
 0x100   : > { %1728 = vmatpush.msra.mxu3 %v1656_v34  ;;  %1242 = vmatpush.msra.mxu0 %v1195_v59  ;;  %v1940_v34 = vld [vmem:[#allocation7 + $0x68] sm:$0xff] }
 0x101   : > { %1707 = vmatpush.msra.mxu2 %v1638_v48  ;;  %3521 = vmatpush.msra.mxu1 %v1195_v59 }
 0x102   : > { %1729 = vmatpush.msra.mxu3 %v1655_v35  ;;  %1243 = vmatpush.msra.mxu0 %v1193_v12 }
 0x103   : > { %1708 = vmatpush.msra.mxu2 %v1637_v19  ;;  %3522 = vmatpush.msra.mxu1 %v1193_v12  ;;  %v1688_v19 = vld [vmem:[#allocation5 + $0x1c8] sm:$0xff] }
 0x104   : > { %1730 = vmatpush.msra.mxu3 %v1654_v37  ;;  %1244 = vmatpush.msra.mxu0 %v1191_v10  ;;  %v1939_v37 = vld [vmem:[#allocation7 + $0x60] sm:$0xff] }
 0x105   : > { %1039 = vadd.xlane.f32.xlu1 %v1024_v50  ;;  %1709 = vmatpush.msra.mxu2 %v1636_v26 }
 0x106   : > { %1731 = vmatpush.msra.mxu3 %v1653_v38  ;;  %3523 = vmatpush.msra.mxu1 %v1191_v10  ;;  %v1683_v10 = vld [vmem:[#allocation5 + $0x1a0] sm:$0xff] }
 0x107   : > { %1710 = vmatpush.msra.mxu2 %v1635_v49  ;;  %1947 = vmatpush.msrb.mxu0 %v1942_v22  ;;  %v1687_v49 = vld [vmem:[#allocation5 + $0x1c0] sm:$0xff] }
 0x108   : > { %1732 = vmatpush.msra.mxu3 %v1652_v39  ;;  %v1938_v39 = vld [vmem:[#allocation7 + $0x58] sm:$0xff] }
 0x109   : > { %1711 = vmatpush.msra.mxu2 %v1634_v41  ;;  %1948 = vmatpush.msrb.mxu0 %v1941_v29 }
 0x10a   : > { %1733 = vmatpush.msra.mxu3 %v1651_v42 }
 0x10b   : > { %1712 = vmatpush.msra.mxu2 %v1633_v44  ;;  %1949 = vmatpush.msrb.mxu0 %v1940_v34  ;;  %v1686_v44 = vld [vmem:[#allocation5 + $0x1b8] sm:$0xff] }
 0x10c   : > { %1734 = vmatpush.msra.mxu3 %v1650_v9  ;;  %v1937_v9 = vld [vmem:[#allocation7 + $0x50] sm:$0xff] }
 0x10d   : > { %1713 = vmatpush.msra.mxu2 %v1632_v47  ;;  %1950 = vmatpush.msrb.mxu0 %v1939_v37 }
 0x10e   : > { %1735 = vmatpush.msra.mxu3 %v1649_v51 }
 0x10f   : > { %1714 = vmatpush.msra.mxu2 %v1631_v28  ;;  %1951 = vmatpush.msrb.mxu0 %v1938_v39  ;;  %v1685_v28 = vld [vmem:[#allocation5 + $0x1b0] sm:$0xff] }
 0x110   : > { %1736 = vmatpush.msra.mxu3 %v1648_v53  ;;  %v1936_v53 = vld [vmem:[#allocation7 + $0x48] sm:$0xff] }
 0x111   : > { %1745 = vmatpush.msrb.mxu2 %v1678_v55  ;;  %1952 = vmatpush.msrb.mxu0 %v1937_v9  ;;  %v1222_v9 = vld [vmem:[#allocation2 + $0xf8] sm:$0xff] }
 0x112   : > { %1737 = vmatpush.msra.mxu3 %v1647_v56  ;;  %1270 = vmatpush.msrb.mxu1 %v1222_v9 }
 0x113   : > { %1746 = vmatpush.msrb.mxu2 %v1677_v61  ;;  %1953 = vmatpush.msrb.mxu0 %v1936_v53  ;;  %v1667_v61 = vld [vmem:[#allocation5 + $0x120] sm:$0xff] }
 0x114   : > { %1768 = vmatpush.msrb.mxu3 %v1694_v62  ;;  %v1684_v62 = vld [vmem:[#allocation5 + $0x1a8] sm:$0xff]  ;;  %v4618_v53 = vld [vmem:[%s6330_s1] ss:$0 sm:$0xff] }
 0x115   : > { %1747 = vmatpush.msrb.mxu2 %v1676_v1  ;;  %v1935_v1 = vld [vmem:[#allocation7 + $0x40] sm:$0xff] }
 0x116   : > { %1769 = vmatpush.msrb.mxu3 %v1693_v3  ;;  %1954 = vmatpush.msrb.mxu0 %v1935_v1 }
 0x117   : > { %1748 = vmatpush.msrb.mxu2 %v1675_v11  ;;  %v1934_v11 = vld [vmem:[#allocation7 + $0x38] sm:$0xff] }
 0x118   : > { %1770 = vmatpush.msrb.mxu3 %v1692_v15  ;;  %1955 = vmatpush.msrb.mxu0 %v1934_v11  ;;  %v1218_v11 = vld [vmem:[#allocation2 + $0xd8] sm:$0xff] }
 0x119   : > { %1749 = vmatpush.msrb.mxu2 %v1674_v20  ;;  %v1682_v20 = vld [vmem:[#allocation5 + $0x198] sm:$0xff] }
 0x11a   : > { %1771 = vmatpush.msrb.mxu3 %v1691_v21  ;;  %v1933_v21 = vld [vmem:[#allocation7 + $0x30] sm:$0xff] }
 0x11b   : > { %1750 = vmatpush.msrb.mxu2 %v1673_v46  ;;  %1956 = vmatpush.msrb.mxu0 %v1933_v21 }
 0x11c   : > { %1772 = vmatpush.msrb.mxu3 %v1690_v24 }
 0x11d   : > { %1751 = vmatpush.msrb.mxu2 %v1672_v30  ;;  %v1681_v30 = vld [vmem:[#allocation5 + $0x190] sm:$0xff] }
 0x11e   : > { %1773 = vmatpush.msrb.mxu3 %v1689_v33 }
 0x11f   : > { %1752 = vmatpush.msrb.mxu2 %v1671_v36  ;;  %v1932_v36 = vld [vmem:[#allocation7 + $0x28] sm:$0xff] }
 0x120   : > { %1774 = vmatpush.msrb.mxu3 %v1688_v19  ;;  %1957 = vmatpush.msrb.mxu0 %v1932_v36 }
 0x121   : > { %1753 = vmatpush.msrb.mxu2 %v1670_v8  ;;  %v1931_v8 = vld [vmem:[#allocation7 + $0x20] sm:$0xff] }
 0x122   : > { %1775 = vmatpush.msrb.mxu3 %v1687_v49  ;;  %1958 = vmatpush.msrb.mxu0 %v1931_v8 }
 0x123   : > { %1754 = vmatpush.msrb.mxu2 %v1669_v43 }
 0x124   : > { %1776 = vmatpush.msrb.mxu3 %v1686_v44 }
 0x125   : > { %1755 = vmatpush.msrb.mxu2 %v1668_v2 }
 0x126   : > { %1777 = vmatpush.msrb.mxu3 %v1685_v28 }
 0x127   : > { %1756 = vmatpush.msrb.mxu2 %v1667_v61  ;;  %v1220_v61 = vld [vmem:[#allocation2 + $0xe8] sm:$0xff] }
 0x128   : > { %1778 = vmatpush.msrb.mxu3 %v1684_v62  ;;  %v1929_v62 = vld [vmem:[#allocation7 + $0x10] sm:$0xff]  ;;  %1271 = vmatpush.msrb.mxu1 %v1220_v61  ;;  %v1206_v61 = vld [vmem:[#allocation2 + $0x78] sm:$0xff] }
 0x12a   : > { %1779 = vmatpush.msrb.mxu3 %v1683_v10  ;;  %1272 = vmatpush.msrb.mxu1 %v1218_v11 }
 0x12c   : > { %1780 = vmatpush.msrb.mxu3 %v1682_v20 }
 0x12e   : > { %1781 = vmatpush.msrb.mxu3 %v1681_v30 }
 0x14f   : > { %v996_v63 = vpop.xlane.xlu0 %995 }
 0x150   : > { %v994_v4 = vpop.xlane.xlu1 %993  ;;  %v4539_v40 = vmul.f32 %v996_v63, %v4327_v25 }
 0x151   : > { %v4533_v7 = vmul.f32 %v994_v4, %v4327_v25  ;;  %v1666_v4 = vld [vmem:[#allocation5 + $0x118] sm:$0xff] }
 0x152   : > { %v1026_v16 = vpop.xlane.xlu2 %1025  ;;  %v1050_v48 = vmul.f32 %v4539_v40, %v4539_v40  ;;  %1757 = vmatpush.msrb.mxu2 %v1666_v4  ;;  %v1066_v4 = vsub.f32 %v4439_v57, %v4539_v40 }
 0x153   : > { %v1049_v50 = vmul.f32 %v4533_v7, %v4533_v7  ;;  %v1041_v18 = vmul.f32 %v1026_v16, %v4327_v25  ;;  %v1065_v19 = vsub.f32 %v4452_v5, %v4533_v7 }
 0x155   : > { %v1057_v23 = vsub.f32 %v1041_v18, %v1049_v50  ;;  %v1665_v18 = vld [vmem:[#allocation5 + $0x110] sm:$0xff] }
 0x156   : > { %1758 = vmatpush.msrb.mxu2 %v1665_v18 }
 0x157   : > { %v1030_v31 = vpop.xlane.xlu0 %1029  ;;  %v4541_v32 = vadd.f32 1e-05, %v1057_v23 }
 0x158   : > { %v1028_v6 = vpop.xlane.xlu1 %1027  ;;  %v1043_v41 = vmul.f32 %v1030_v31, %v4327_v25  ;;  %v1664_v31 = vld [vmem:[#allocation5 + $0x108] sm:$0xff] }
 0x159   : > { %3659 = vrsqrt.f32 %v4541_v32  ;;  %v1042_v35 = vmul.f32 %v1028_v6, %v4327_v25  ;;  %vm1087_vm10 = vweird.f32 %v4541_v32  ;;  %1759 = vmatpush.msrb.mxu2 %v1664_v31 }
 0x15a   : > { %v998_v0 = vpop.xlane.xlu2 %997 }
 0x15b   : > { %v1058_v26 = vsub.f32 %v1042_v35, %v1050_v48  ;;  %v4548_v38 = vmul.f32 %v998_v0, %v4327_v25  ;;  %v1663_v0 = vld [vmem:[#allocation5 + $0x100] sm:$0xff] }
 0x15c   : > { %1760 = vmatpush.msrb.mxu2 %v1663_v0 }
 0x15d   : > { %v4550_v27 = vadd.f32 1e-05, %v1058_v26  ;;  %v1051_v42 = vmul.f32 %v4548_v38, %v4548_v38  ;;  %v1680_v26 = vld [vmem:[#allocation5 + $0x188] sm:$0xff]  ;;  %v1067_v34 = vsub.f32 %v4466_v17, %v4548_v38 }
 0x15e   : > { %1782 = vmatpush.msrb.mxu3 %v1680_v26  ;;  %v1212_v26 = vld [vmem:[#allocation2 + $0xa8] sm:$0xff] }
 0x15f   : > { %v1002_v13 = vpop.xlane.xlu0 %1001  ;;  %v4555_v47 = vpop.eup %3659  ;;  %3661 = vrsqrt.f32 %v4550_v27  ;;  %v1059_v51 = vsub.f32 %v1043_v41, %v1051_v42  ;;  %v4602_v41 = vld [vmem:[%s6329_s28] ss:$0 sm:$0xff]  ;;  %vm1097_vm13 = vweird.f32 %v4550_v27 }
 0x160   : > { %v1082_v54 = vmul.f32 %v4555_v47, %v4541_v32  ;;  %v1000_v55 = vpop.xlane.xlu1 %999  ;;  %vm1088_vm9 = vweird.f32 %v4555_v47  ;;  %v4576_v46 = vmul.f32 %v1002_v13, %v4327_v25  ;;  %v1679_v13 = vld [vmem:[#allocation5 + $0x180] sm:$0xff] }
 0x161   : > { %v4560_v56 = vadd.f32 1e-05, %v1059_v51  ;;  %v4563_v59 = vmul.f32 %v1000_v55, %v4327_v25  ;;  %vm4582_vm11 = vmor %vm1087_vm10, %vm1088_vm9  ;;  %1783 = vmatpush.msrb.mxu3 %v1679_v13 }
 0x162   : > { %v1083_v63 = vmul.f32 %v4555_v47, %v1082_v54  ;;  %v1032_v12 = vpop.xlane.xlu2 %1031  ;;  %v1053_v7 = vmul.f32 %v4576_v46, %v4576_v46  ;;  %v1930_v54 = vld [vmem:[#allocation7 + $0x18] sm:$0xff] }
 0x163   : > { %3663 = vrsqrt.f32 %v4560_v56  ;;  %v1052_v3 = vmul.f32 %v4563_v59, %v4563_v59  ;;  %v1044_v16 = vmul.f32 %v1032_v12, %v4327_v25  ;;  %1959 = vmatpush.msrb.mxu0 %v1930_v54  ;;  %vm1107_vm0 = vweird.f32 %v4560_v56 }
 0x164   : > { %v1084_v15 = vmul.f32 0.5, %v1083_v63 }
 0x165   : > { %v4570_v50 = vpop.eup %3661  ;;  %v1060_v24 = vsub.f32 %v1044_v16, %v1052_v3  ;;  %1960 = vmatpush.msrb.mxu0 %v1929_v62  ;;  %v1068_v62 = vsub.f32 %v4499_v52, %v4563_v59  ;;  %v1202_v59 = vld [vmem:[#allocation2 + $0x58] sm:$0xff] }
 0x166   : > { %v1085_v22 = vsub.f32 1.5, %v1084_v15  ;;  %v1092_v23 = vmul.f32 %v4570_v50, %v4550_v27  ;;  %vm1098_vm12 = vweird.f32 %v4570_v50  ;;  %v1928_v15 = vld [vmem:[#allocation7 + $0x8] sm:$0xff] }
 0x167   : > { %v1038_v29 = vpop.xlane.xlu0 %1037  ;;  %v4587_v48 = vadd.f32 1e-05, %v1060_v24  ;;  %vm4627_vm14 = vmor %vm1097_vm13, %vm1098_vm12  ;;  %1961 = vmatpush.msrb.mxu0 %v1928_v15 }
 0x168   : > { %v1086_v33 = vmul.f32 %v4555_v47, %v1085_v22  ;;  %v1093_v6 = vmul.f32 %v4570_v50, %v1092_v23  ;;  %v1006_v35 = vpop.xlane.xlu1 %1005  ;;  %v1047_v44 = vmul.f32 %v1038_v29, %v4327_v25  ;;  %v1216_v29 = vld [vmem:[#allocation2 + $0xc8] sm:$0xff] }
 0x169   : > { %v4589_v32 = vpop.eup %3663  ;;  %v4594_v37 = vmul.f32 %v1006_v35, %v4327_v25  ;;  %3665 = vrsqrt.f32 %v4587_v48  ;;  %1273 = vmatpush.msrb.mxu1 %v1216_v29  ;;  %v1214_v35 = vld [vmem:[#allocation2 + $0xb8] sm:$0xff]  ;;  %vm1117_vm3 = vweird.f32 %v4587_v48 }
 0x16a   : > { %v1090_v49 = vsel %vm4582_vm11, %v4555_v47, %v1086_v33  ;;  %v1094_v39 = vmul.f32 0.5, %v1093_v6  ;;  %v1102_v5 = vmul.f32 %v4589_v32, %v4560_v56  ;;  %v1034_v42 = vpop.xlane.xlu2 %1033  ;;  %vm1108_vm15 = vweird.f32 %v4589_v32 }
 0x16b   : > { %v1055_v43 = vmul.f32 %v4594_v37, %v4594_v37  ;;  %v1045_v2 = vmul.f32 %v1034_v42, %v4327_v25  ;;  %v1161_v28 = vmul.f32 %v1090_v49, %v1065_v19  ;;  %vm1109_vm1 = vmor %vm1107_vm0, %vm1108_vm15  ;;  %1274 = vmatpush.msrb.mxu1 %v1214_v35  ;;  %v1071_v29 = vsub.f32 %v4509_v58, %v4594_v37 }
 0x16c   : > { %v1095_v47 = vsub.f32 1.5, %v1094_v39  ;;  %v1103_v51 = vmul.f32 %v4589_v32, %v1102_v5  ;;  %v1210_v39 = vld [vmem:[#allocation2 + $0x98] sm:$0xff] }
 0x16d   : > { %v1063_v55 = vsub.f32 %v1047_v44, %v1055_v43  ;;  %v1061_v1 = vsub.f32 %v1045_v2, %v1053_v7  ;;  %v1172_v3 = vmul.f32 %v4602_v41, %v1161_v28  ;;  %1275 = vmatpush.msrb.mxu1 %v1212_v26 }
 0x16e   : > { %v1096_v63 = vmul.f32 %v4570_v50, %v1095_v47  ;;  %v1104_v12 = vmul.f32 0.5, %v1103_v51  ;;  %v1208_v47 = vld [vmem:[#allocation2 + $0x88] sm:$0xff] }
 0x16f   : > { %v4632_v27 = vadd.f32 1e-05, %v1063_v55  ;;  %v4637_v20 = vadd.f32 1e-05, %v1061_v1  ;;  %v1036_v40 = vpop.xlane.xlu0 %1035  ;;  %v4640_v21 = vadd.f32 %v4618_v53, %v1172_v3  ;;  %v4642_v22 = vpop.eup %3665  ;;  %1276 = vmatpush.msrb.mxu1 %v1210_v39 }
 0x170   : > { %v1100_v16 = vsel %vm4627_vm14, %v4570_v50, %v1096_v63  ;;  %v1105_v18 = vsub.f32 1.5, %v1104_v12  ;;  %v1004_v57 = vpop.xlane.xlu1 %1003  ;;  %v1927_v50 = vld [vmem:[#allocation7] sm:$0xff]  ;;  %v1112_v30 = vmul.f32 %v4642_v22, %v4587_v48  ;;  %v1046_v56 = vmul.f32 %v1036_v40, %v4327_v25 }
 0x171   : > { %3667 = vrsqrt.f32 %v4632_v27  ;;  %v4646_v23 = vmul.f32 %v1004_v57, %v4327_v25  ;;  %v1162_v24 = vmul.f32 %v1100_v16, %v1066_v4  ;;  %1245 = vmatmul.f32.vlgmr.msra.gmra.mxu0 %v4640_v21  ;;  %1715 = vmatmul.f32.vlgmr.msra.gmra.mxu2 %v4640_v21  ;;  %vm1118_vm2 = vweird.f32 %v4642_v22  ;;  %v1204_v4 = vld [vmem:[#allocation2 + $0x68] sm:$0xff] }
 0x172   : > { %v1106_v31 = vmul.f32 %v4589_v32, %v1105_v18  ;;  %3669 = vrsqrt.f32 %v4637_v20  ;;  %v1008_v33 = vpop.xlane.xlu2 %1007  ;;  %1962 = vmatpush.msrb.mxu0 %v1927_v50  ;;  %v1113_v19 = vmul.f32 %v4642_v22, %v1112_v30  ;;  %vm1119_vm4 = vmor %vm1117_vm3, %vm1118_vm2  ;;  %1277 = vmatpush.msrb.mxu1 %v1208_v47  ;;  %vm1147_vm7 = vweird.f32 %v4632_v27 }
 0x173   : > { %v1054_v6 = vmul.f32 %v4646_v23, %v4646_v23  ;;  %v1173_v0 = vmul.f32 %v4602_v41, %v1162_v24  ;;  %v4666_v38 = vmul.f32 %v1008_v33, %v4327_v25  ;;  %v1200_v24 = vld [vmem:[#allocation2 + $0x48] sm:$0xff]  ;;  %vm1127_vm9 = vweird.f32 %v4637_v20  ;;  %v1198_v33 = vld [vmem:[#allocation2 + $0x38] sm:$0xff] }
 0x174   : > { %v1110_v36 = vsel %vm1109_vm1, %v4589_v32, %v1106_v31  ;;  %v1114_v49 = vmul.f32 0.5, %v1113_v19  ;;  %1278 = vmatpush.msrb.mxu1 %v1206_v61  ;;  %v1069_v31 = vsub.f32 %v4496_v45, %v4576_v46 }
 0x175   : > { %v1163_v8 = vmul.f32 %v1110_v36, %v1067_v34  ;;  %v1062_v17 = vsub.f32 %v1046_v56, %v1054_v6  ;;  %v4677_v13 = vadd.f32 %v4618_v53, %v1173_v0  ;;  %v1056_v2 = vmul.f32 %v4666_v38, %v4666_v38  ;;  %v1194_v36 = vld [vmem:[#allocation2 + $0x18] sm:$0xff] }
 0x176   : > { %v1115_v43 = vsub.f32 1.5, %v1114_v49  ;;  %1279 = vmatpush.msrb.mxu1 %v1204_v4  ;;  %v1070_v49 = vsub.f32 %v4520_v60, %v4646_v23  ;;  %v1072_v23 = vsub.f32 %v4527_v14, %v4666_v38 }
 0x177   : > { %v4668_v5 = vpop.eup %3667  ;;  %v1174_v7 = vmul.f32 %v4602_v41, %v1163_v8  ;;  %v4671_v42 = vadd.f32 1e-05, %v1062_v17  ;;  %v1192_v17 = vld [vmem:[#allocation2 + $0x8] sm:$0xff] }
 0x178   : > { %v3670_v32 = vpop.eup %3669  ;;  %v1142_v44 = vmul.f32 %v4668_v5, %v4632_v27  ;;  %v1040_v9 = vpop.xlane.xlu1 %1039  ;;  %v1116_v28 = vmul.f32 %v4642_v22, %v1115_v43  ;;  %vm1148_vm5 = vweird.f32 %v4668_v5  ;;  %1280 = vmatpush.msrb.mxu1 %v1202_v59 }
 0x179   : > { %v1122_v51 = vmul.f32 %v3670_v32, %v4637_v20  ;;  %3671 = vrsqrt.f32 %v4671_v42  ;;  %v1048_v55 = vmul.f32 %v1040_v9, %v4327_v25  ;;  %1248 = vmatmul.f32.gmra.mxu0 %v4677_v13  ;;  %1718 = vmatmul.f32.gmra.mxu2 %v4677_v13  ;;  %v4694_v12 = vadd.f32 %v4618_v53, %v1174_v7  ;;  %vm1149_vm8 = vmor %vm1147_vm7, %vm1148_vm5  ;;  %v1196_v20 = vld [vmem:[#allocation2 + $0x28] sm:$0xff] }
 0x17a   : > { %v1143_v54 = vmul.f32 %v4668_v5, %v1142_v44  ;;  %v1120_v48 = vsel %vm1119_vm4, %v4642_v22, %v1116_v28  ;;  %vm1128_vm6 = vweird.f32 %v3670_v32  ;;  %1281 = vmatpush.msrb.mxu1 %v1200_v24  ;;  %vm1137_vm12 = vweird.f32 %v4671_v42 }
 0x17b   : > { %v1123_v63 = vmul.f32 %v3670_v32, %v1122_v51  ;;  %v1064_v3 = vsub.f32 %v1048_v55, %v1056_v2  ;;  %1738 = vmatmul.f32.vlgmr.msra.gmra.mxu3 %v4694_v12  ;;  %v1164_v11 = vmul.f32 %v1120_v48, %v1068_v62  ;;  %vm1129_vm10 = vmor %vm1127_vm9, %vm1128_vm6 }
 0x17c   : > { %v1144_v1 = vmul.f32 0.5, %v1143_v54  ;;  %1282 = vmatpush.msrb.mxu1 %v1198_v33 }
 0x17d   : > { %v1124_v10 = vmul.f32 0.5, %v1123_v63  ;;  %v4699_v52 = vadd.f32 1e-05, %v1064_v3  ;;  %v1175_v57 = vmul.f32 %v4602_v41, %v1164_v11 }
 0x17e   : > { %v1145_v15 = vsub.f32 1.5, %v1144_v1  ;;  %1283 = vmatpush.msrb.mxu1 %v1196_v20 }
 0x17f   : > { %v3672_v16 = vpop.eup %3671  ;;  %v1125_v18 = vsub.f32 1.5, %v1124_v10  ;;  %3673 = vrsqrt.f32 %v4699_v52  ;;  %v1186_v6 = vadd.f32 %v4618_v53, %v1175_v57  ;;  %vm1157_vm15 = vweird.f32 %v4699_v52 }
 0x180   : > { %v1146_v40 = vmul.f32 %v4668_v5, %v1145_v15  ;;  %v1132_v22 = vmul.f32 %v3672_v16, %v4671_v42  ;;  %vm1138_vm11 = vweird.f32 %v3672_v16  ;;  %1284 = vmatpush.msrb.mxu1 %v1194_v36 }
 0x181   : > { %v1126_v50 = vmul.f32 %v3670_v32, %v1125_v18  ;;  %1251 = vmatmul.f32.gmra.mxu0 %v4694_v12  ;;  %vm1139_vm13 = vmor %vm1137_vm12, %vm1138_vm11 }
 0x182   : > { %v1150_v30 = vsel %vm1149_vm8, %v4668_v5, %v1146_v40  ;;  %v1133_v27 = vmul.f32 %v3672_v16, %v1132_v22  ;;  %1285 = vmatpush.msrb.mxu1 %v1192_v17  ;;  %v4753_v40 = vld [vmem:[%s6262_s12] ss:$0 sm:$0xff] }
 0x183   : > { %v1130_v34 = vsel %vm1129_vm10, %v3670_v32, %v1126_v50  ;;  %v1167_v58 = vmul.f32 %v1150_v30, %v1071_v29  ;;  %1741 = vmatmul.f32.gmra.mxu3 %v1186_v6 }
 0x184   : > { %v1134_v37 = vmul.f32 0.5, %v1133_v27  ;;  %v1165_v56 = vmul.f32 %v1130_v34, %v1069_v31  ;;  %v1223_v31 = vld [vmem:[%s6333_s7] sm:$0x3] }
 0x185   : > { %v3674_v35 = vpop.eup %3673  ;;  %v1178_v0 = vmul.f32 %v4602_v41, %v1167_v58  ;;  %v1225_v27 = vperm.slane %v1223_v31, 0 }
 0x186   : > { %v1135_v45 = vsub.f32 1.5, %v1134_v37  ;;  %v1176_v46 = vmul.f32 %v4602_v41, %v1165_v56  ;;  %v1152_v19 = vmul.f32 %v3674_v35, %v4699_v52  ;;  %vm1158_vm14 = vweird.f32 %v3674_v35 }
 0x187   : > { %v1189_v32 = vadd.f32 %v4618_v53, %v1178_v0  ;;  %vm1159_vm0 = vmor %vm1157_vm15, %vm1158_vm14 }
 0x188   : > { %v1136_v26 = vmul.f32 %v3672_v16, %v1135_v45  ;;  %v1187_v8 = vadd.f32 %v4618_v53, %v1176_v46  ;;  %v1153_v39 = vmul.f32 %v3674_v35, %v1152_v19 }
 0x189   : > { %1254 = vmatmul.f32.gmra.mxu0 %v1186_v6 }
 0x18a   : > { %v1140_v5 = vsel %vm1139_vm13, %v3672_v16, %v1136_v26  ;;  %1257 = vmatmul.f32.vlgmr.msra.gmra.mxu1 %v1187_v8  ;;  %v1154_v7 = vmul.f32 0.5, %v1153_v39  ;;  %1761 = vmatmul.f32.vlgmr.msrb.gmra.mxu2 %v1187_v8 }
 0x18b   : > { %v1166_v43 = vmul.f32 %v1140_v5, %v1070_v49  ;;  %1784 = vmatmul.f32.vlgmr.msrb.gmra.mxu3 %v1189_v32 }
 0x18c   : > { %v1155_v44 = vsub.f32 1.5, %v1154_v7 }
 0x18d   : > { %v1177_v42 = vmul.f32 %v4602_v41, %v1166_v43 }
 0x18e   : > { %v1156_v9 = vmul.f32 %v3674_v35, %v1155_v44 }
 0x18f   : > { %v1188_v60 = vadd.f32 %v4618_v53, %v1177_v42 }
 0x190   : > { %v1160_v47 = vsel %vm1159_vm0, %v3674_v35, %v1156_v9 }
 0x191   : > { %1963 = vmatmul.f32.vlgmr.msrb.gmra.mxu0 %v4640_v21  ;;  %v1168_v51 = vmul.f32 %v1160_v47, %v1072_v23 }
 0x192   : > { %1260 = vmatmul.f32.gmra.mxu1 %v1188_v60  ;;  %1764 = vmatmul.f32.gmra.mxu2 %v1188_v60 }
 0x193   : > { %v1179_v2 = vmul.f32 %v4602_v41, %v1168_v51 }
 0x195   : > { %v1190_v28 = vadd.f32 %v4618_v53, %v1179_v2 }
 0x197   : > { %1787 = vmatmul.f32.gmra.mxu3 %v1190_v28 }
 0x199   : > { %1966 = vmatmul.f32.gmra.mxu0 %v4677_v13 }
 0x19a   : > { %1263 = vmatmul.f32.gmra.mxu1 %v1189_v32 }
 0x1a1   : > { %1969 = vmatmul.f32.gmra.mxu0 %v4694_v12 }
 0x1a2   : > { %1266 = vmatmul.f32.gmra.mxu1 %v1190_v28 }
 0x1a9   : > { %1972 = vmatmul.f32.gmra.mxu0 %v1186_v6 }
 0x1aa   : > { %1286 = vmatmul.f32.vlgmr.msrb.gmra.mxu1 %v4640_v21 }
 0x1b1   : > { %1975 = vmatmul.f32.gmra.mxu0 %v1187_v8 }
 0x1b2   : > { %1289 = vmatmul.f32.gmra.mxu1 %v4677_v13  ;;  %v3633_v13 = vld [vmem:[%s6258_s8] ss:$0 sm:$0xff] }
 0x1b9   : > { %1978 = vmatmul.f32.gmra.mxu0 %v1188_v60 }
 0x1ba   : > { %1292 = vmatmul.f32.gmra.mxu1 %v4694_v12 }
 0x1c1   : > { %1981 = vmatmul.f32.gmra.mxu0 %v1189_v32 }
 0x1c2   : > { %1295 = vmatmul.f32.gmra.mxu1 %v1186_v6 }
 0x1c9   : > { %1984 = vmatmul.f32.gmra.mxu0 %v1190_v28 }
 0x1ca   : > { %1298 = vmatmul.f32.gmra.mxu1 %v1187_v8 }
 0x1d2   : > { %1301 = vmatmul.f32.gmra.mxu1 %v1188_v60 }
 0x1da   : > { %1304 = vmatmul.f32.gmra.mxu1 %v1189_v32 }
 0x1e2   : > { %1307 = vmatmul.f32.gmra.mxu1 %v1190_v28 }
 0x1ee   : > { %v1246_v14 = vpop.f32.mrf.mxu0 }
 0x1ef   : > { %v4772_v37 = vadd.f32 %v1246_v14, %v1225_v27 }
 0x1f1   : > { %v1311_v35 = vsub.f32 0.0, %v4772_v37 }
 0x1f3   : > { %v1327_v0 = vmul.f32 1.442695, %v1311_v35 }
 0x1f4   : > { %v1716_v53 = vpop.f32.mrf.mxu2 }
 0x1f5   : > { %v1717_v62 = vadd.f32 %v3633_v13, %v1716_v53  ;;  %3675 = vpow2.f32 %v1327_v0 }
 0x1f6   : > { %v1249_v41 = vpop.f32.mrf.mxu0 }
 0x1f7   : > { %v4781_v46 = vadd.f32 %v1249_v41, %v1225_v27 }
 0x1f9   : > { %v1313_v8 = vsub.f32 0.0, %v4781_v46 }
 0x1fb   : > { %v1331_v7 = vmul.f32 1.442695, %v1313_v8  ;;  %v3676_v9 = vpop.eup %3675 }
 0x1fc   : > { %v1719_v21 = vpop.f32.mrf.mxu2  ;;  %v4803_v14 = vadd.f32 1.0, %v3676_v9 }
 0x1fd   : > { %v1720_v11 = vadd.f32 %v3633_v13, %v1719_v21 }
 0x1fe   : > { %v1252_v38 = vpop.f32.mrf.mxu0  ;;  %v1739_v54 = vpop.f32.mrf.mxu3  ;;  %vm1380_vm3 = vweird.f32 %v4803_v14 }
 0x1ff   : > { %v1740_v12 = vadd.f32 %v1739_v54, %v1717_v62  ;;  %v4775_v20 = vadd.f32 %v1252_v38, %v1225_v27 }
 0x201   : > { %v1315_v36 = vsub.f32 0.0, %v4775_v20 }
 0x203   : > { %v1335_v49 = vmul.f32 1.442695, %v1315_v36 }
 0x205   : > { %3677 = vpow2.f32 %v1335_v49 }
 0x206   : > { %v1255_v55 = vpop.f32.mrf.mxu0  ;;  %v1742_v61 = vpop.f32.mrf.mxu3  ;;  %3679 = vpow2.f32 %v1331_v7 }
 0x207   : > { %v1743_v59 = vadd.f32 %v1742_v61, %v1720_v11  ;;  %v1258_v29 = vpop.f32.mrf.mxu1  ;;  %v4798_v44 = vadd.f32 %v1255_v55, %v1225_v27 }
 0x208   : > { %v4794_v32 = vadd.f32 %v1258_v29, %v1225_v27 }
 0x209   : > { %v1317_v47 = vsub.f32 0.0, %v4798_v44 }
 0x20a   : > { %v1319_v60 = vsub.f32 0.0, %v4794_v32 }
 0x20b   : > { %v3678_v28 = vpop.eup %3677  ;;  %v1339_v54 = vmul.f32 1.442695, %v1317_v47 }
 0x20c   : > { %v1343_v53 = vmul.f32 1.442695, %v1319_v60  ;;  %v3680_v61 = vpop.eup %3679  ;;  %v4815_v13 = vadd.f32 1.0, %v3678_v28 }
 0x20d   : > { %v1762_v63 = vpop.f32.mrf.mxu2 }
 0x20e   : > { %v4739_v48 = vpop.f32.mrf.mxu0  ;;  %v1785_v1 = vpop.f32.mrf.mxu3  ;;  %v1763_v3 = vadd.f32 %v1762_v63, %v1740_v12  ;;  %v4819_v12 = vadd.f32 1.0, %v3680_v61  ;;  %v1446_v61 = vand.u32 2147483648, %v4815_v13  ;;  %vm1440_vm5 = vweird.f32 %v4815_v13 }
 0x20f   : > { %v1261_v6 = vpop.f32.mrf.mxu1 }
 0x210   : > { %v4741_v4 = vadd.f32 %v1785_v1, %v1763_v3  ;;  %v4788_v39 = vadd.f32 %v1261_v6, %v1225_v27  ;;  %vm1410_vm9 = vweird.f32 %v4819_v12 }
 0x212   : > { %1793 = vadd.xlane.f32.xlu2 %v4741_v4  ;;  %v1799_v10 = vmul.f32 %v4741_v4, %v4741_v4  ;;  %v1321_v42 = vsub.f32 0.0, %v4788_v39 }
 0x214   : > { %1801 = vadd.xlane.f32.xlu0 %v1799_v10  ;;  %v1347_v51 = vmul.f32 1.442695, %v1321_v42 }
 0x215   : > { %v1765_v15 = vpop.f32.mrf.mxu2 }
 0x216   : > { %v4746_v52 = vpop.f32.mrf.mxu0  ;;  %v1766_v16 = vadd.f32 %v1765_v15, %v1743_v59  ;;  %3681 = vpow2.f32 %v1347_v51  ;;  %v4831_v59 = vadd.f32 %v4753_v40, %v4739_v48 }
 0x217   : > { %v1264_v26 = vpop.f32.mrf.mxu1  ;;  %3683 = vrcp.f32 %v4803_v14  ;;  %v4845_v48 = vadd.f32 %v4753_v40, %v4746_v52 }
 0x218   : > { %v4810_v21 = vadd.f32 %v1264_v26, %v1225_v27  ;;  %3685 = vpow2.f32 %v1343_v53 }
 0x219   : > { %3687 = vpow2.f32 %v1339_v54  ;;  %v2015_v52 = vmul.f32 %v4845_v48, %v4845_v48 }
 0x21a   : > { %v1788_v18 = vpop.f32.mrf.mxu3  ;;  %v1323_v1 = vsub.f32 0.0, %v4810_v21  ;;  %3689 = vrcp.f32 %v4815_v13 }
 0x21b   : > { %v4748_v57 = vadd.f32 %v1788_v18, %v1766_v16  ;;  %3691 = vrcp.f32 %v4819_v12 }
 0x21c   : > { %v3682_v3 = vpop.eup %3681  ;;  %v1351_v16 = vmul.f32 1.442695, %v1323_v1  ;;  %v1444_v1 = vand.u32 2147483647, %v4815_v13 }
 0x21d   : > { %1795 = vadd.xlane.f32.xlu0 %v4748_v57  ;;  %v1800_v33 = vmul.f32 %v4748_v57, %v4748_v57  ;;  %v4826_v15 = vpop.eup %3683  ;;  %v4836_v29 = vadd.f32 1.0, %v3682_v3 }
 0x21e   : > { %v1970_v22 = vpop.f32.mrf.mxu0  ;;  %vm1381_vm1 = vweird.f32 %v4826_v15  ;;  %vm1445_vm11 = vcmp.eq.f32.partialorder %v1444_v1, 8.507059e+37 }
 0x21f   : > { %v4757_v24 = vadd.f32 %v4753_v40, %v1970_v22  ;;  %v1267_v2 = vpop.f32.mrf.mxu1  ;;  %v3686_v22 = vpop.eup %3685  ;;  %vm4894_vm4 = vmor %vm1380_vm3, %vm1381_vm1  ;;  %vm1530_vm14 = vweird.f32 %v4836_v29 }
 0x220   : > { %v4808_v38 = vadd.f32 %v1267_v2, %v1225_v27  ;;  %v1376_v27 = vmul.f32 %v4826_v15, %v4803_v14 }
 0x221   : > { %1994 = vadd.xlane.f32.xlu1 %v4757_v24  ;;  %v2016_v50 = vmul.f32 %v4757_v24, %v4757_v24 }
 0x222   : > { %v1325_v62 = vsub.f32 0.0, %v4808_v38  ;;  %v1377_v35 = vsub.f32 1.0, %v1376_v27 }
 0x223   : > { %2026 = vadd.xlane.f32.xlu2 %v2016_v50  ;;  %v3688_v50 = vpop.eup %3687 }
 0x224   : > { %v1355_v11 = vmul.f32 1.442695, %v1325_v62  ;;  %v4839_v31 = vpop.eup %3689 }
 0x225   : > { %v4852_v6 = vpop.eup %3691  ;;  %vm1441_vm2 = vweird.f32 %v4839_v31 }
 0x226   : > { %v1973_v30 = vpop.f32.mrf.mxu0  ;;  %3693 = vpow2.f32 %v1355_v11  ;;  %v1406_v36 = vmul.f32 %v4852_v6, %v4819_v12  ;;  %vm1411_vm6 = vweird.f32 %v4852_v6  ;;  %vm4906_vm7 = vmor %vm1440_vm5, %vm1441_vm2 }
 0x227   : > { %v4768_v34 = vadd.f32 %v4753_v40, %v1973_v30  ;;  %v4841_v30 = vadd.f32 1.0, %v3686_v22  ;;  %3695 = vpow2.f32 %v1351_v16  ;;  %vm1412_vm10 = vmor %vm1410_vm9, %vm1411_vm6 }
 0x228   : > { %3697 = vrcp.f32 %v4836_v29  ;;  %v1407_v49 = vsub.f32 1.0, %v1406_v36 }
 0x229   : > { %1803 = vadd.xlane.f32.xlu1 %v1800_v33  ;;  %v2017_v58 = vmul.f32 %v4768_v34, %v4768_v34  ;;  %v4849_v33 = vadd.f32 1.0, %v3688_v50  ;;  %3699 = vrcp.f32 %v4841_v30  ;;  %vm1500_vm2 = vweird.f32 %v4841_v30 }
 0x22a   : > { %v1408_v51 = vmul.f32 %v4852_v6, %v1407_v49 }
 0x22b   : > { %1996 = vadd.xlane.f32.xlu2 %v4768_v34  ;;  %2028 = vadd.xlane.f32.xlu0 %v2017_v58  ;;  %v1436_v58 = vmul.f32 %v4839_v31, %v4815_v13  ;;  %3701 = vrcp.f32 %v4849_v33  ;;  %vm1470_vm3 = vweird.f32 %v4849_v33  ;;  %v1474_v62 = vand.u32 2147483647, %v4849_v33 }
 0x22c   : > { %v1409_v11 = vadd.f32 %v4852_v6, %v1408_v51  ;;  %v1506_v51 = vand.u32 2147483648, %v4841_v30 }
 0x22d   : > { %v1437_v0 = vsub.f32 1.0, %v1436_v58  ;;  %v1414_v58 = vand.u32 2147483647, %v4819_v12 }
 0x22e   : > { %v1976_v56 = vpop.f32.mrf.mxu0 }
 0x22f   : > { %v4779_v45 = vadd.f32 %v4753_v40, %v1976_v56  ;;  %v2014_v56 = vmul.f32 %v4831_v59, %v4831_v59  ;;  %v1438_v42 = vmul.f32 %v4839_v31, %v1437_v0  ;;  %vm1415_vm13 = vcmp.eq.f32.partialorder %v1414_v58, 8.507059e+37 }
 0x231   : > { %1998 = vadd.xlane.f32.xlu1 %v4779_v45  ;;  %v2018_v19 = vmul.f32 %v4779_v45, %v4779_v45  ;;  %v1439_v28 = vadd.f32 %v4839_v31, %v1438_v42 }
 0x233   : > { %2030 = vadd.xlane.f32.xlu2 %v2018_v19  ;;  %v1443_v13 = vsel %vm4906_vm7, %v4839_v31, %v1439_v28 }
 0x236   : > { %v1979_v17 = vpop.f32.mrf.mxu0 }
 0x237   : > { %v4791_v5 = vadd.f32 %v4753_v40, %v1979_v17  ;;  %v1378_v17 = vmul.f32 %v4826_v15, %v1377_v35  ;;  %v1413_v35 = vsel %vm1412_vm10, %v4852_v6, %v1409_v11  ;;  %v1536_v6 = vand.u32 2147483648, %v4836_v29 }
 0x239   : > { %2000 = vadd.xlane.f32.xlu0 %v4791_v5  ;;  %v2019_v43 = vmul.f32 %v4791_v5, %v4791_v5  ;;  %v1379_v47 = vadd.f32 %v4826_v15, %v1378_v17 }
 0x23b   : > { %2032 = vadd.xlane.f32.xlu1 %v2019_v43  ;;  %v1383_v3 = vsel %vm4894_vm4, %v4826_v15, %v1379_v47 }
 0x23e   : > { %v1982_v23 = vpop.f32.mrf.mxu0 }
 0x23f   : > { %v4806_v41 = vadd.f32 %v4753_v40, %v1982_v23  ;;  %v1386_v23 = vand.u32 2147483648, %v4803_v14 }
 0x241   : > { %2002 = vadd.xlane.f32.xlu2 %v4806_v41  ;;  %v2020_v55 = vmul.f32 %v4806_v41, %v4806_v41  ;;  %v1387_v22 = vor.u32 1.1754944e-38, %v1386_v23  ;;  %v1534_v23 = vand.u32 2147483647, %v4836_v29 }
 0x243   : > { %2034 = vadd.xlane.f32.xlu0 %v2020_v55  ;;  %v1384_v55 = vand.u32 2147483647, %v4803_v14  ;;  %vm1535_vm5 = vcmp.eq.f32.partialorder %v1534_v23, 8.507059e+37 }
 0x245   : > { %vm1385_vm8 = vcmp.eq.f32.partialorder %v1384_v55, 8.507059e+37  ;;  %v1537_v55 = vor.u32 1.1754944e-38, %v1536_v6 }
 0x246   : > { %v1985_v63 = vpop.f32.mrf.mxu0 }
 0x247   : > { %v4824_v10 = vadd.f32 %v4753_v40, %v1985_v63  ;;  %v3694_v40 = vpop.eup %3693  ;;  %v1416_v63 = vand.u32 2147483648, %v4819_v12 }
 0x248   : > { %v3696_v19 = vpop.eup %3695  ;;  %v4867_v8 = vadd.f32 1.0, %v3694_v40 }
 0x249   : > { %2004 = vadd.xlane.f32.xlu1 %v4824_v10  ;;  %v2021_v18 = vmul.f32 %v4824_v10, %v4824_v10  ;;  %v4865_v26 = vpop.eup %3697  ;;  %v4870_v7 = vadd.f32 1.0, %v3696_v19  ;;  %v1417_v40 = vor.u32 1.1754944e-38, %v1416_v63 }
 0x24a   : > { %v4872_v43 = vpop.eup %3699  ;;  %v1526_v9 = vmul.f32 %v4865_v26, %v4836_v29  ;;  %3703 = vrcp.f32 %v4867_v8  ;;  %vm1531_vm12 = vweird.f32 %v4865_v26 }
 0x24b   : > { %2036 = vadd.xlane.f32.xlu2 %v2021_v18  ;;  %1990 = vadd.xlane.f32.xlu0 %v4831_v59  ;;  %v4877_v60 = vpop.eup %3701  ;;  %v1496_v2 = vmul.f32 %v4872_v43, %v4841_v30  ;;  %3705 = vrcp.f32 %v4870_v7  ;;  %v1418_v42 = vsel %vm1415_vm13, %v1417_v40, %v1413_v35  ;;  %vm1501_vm15 = vweird.f32 %v4872_v43  ;;  %vm4941_vm0 = vmor %vm1530_vm14, %vm1531_vm12 }
 0x24c   : > { %v1466_v53 = vmul.f32 %v4877_v60, %v4849_v33  ;;  %v1527_v54 = vsub.f32 1.0, %v1526_v9  ;;  %vm1471_vm1 = vweird.f32 %v4877_v60  ;;  %vm1502_vm4 = vmor %vm1500_vm2, %vm1501_vm15  ;;  %vm1560_vm12 = vweird.f32 %v4870_v7 }
 0x24d   : > { %v1497_v16 = vsub.f32 1.0, %v1496_v2  ;;  %vm1472_vm6 = vmor %vm1470_vm3, %vm1471_vm1  ;;  %v1564_v58 = vand.u32 2147483647, %v4870_v7 }
 0x24e   : > { %v1467_v50 = vsub.f32 1.0, %v1466_v53  ;;  %v1528_v27 = vmul.f32 %v4865_v26, %v1527_v54  ;;  %v1476_v53 = vand.u32 2147483648, %v4849_v33  ;;  %v1504_v54 = vand.u32 2147483647, %v4841_v30 }
 0x24f   : > { %v1498_v31 = vmul.f32 %v4872_v43, %v1497_v16  ;;  %v1507_v30 = vor.u32 1.1754944e-38, %v1506_v51 }
 0x250   : > { %v4910_v18 = vpop.eup %3703  ;;  %v1468_v0 = vmul.f32 %v4877_v60, %v1467_v50  ;;  %v1529_v17 = vadd.f32 %v4865_v26, %v1528_v27  ;;  %v1477_v33 = vor.u32 1.1754944e-38, %v1476_v53  ;;  %vm1505_vm7 = vcmp.eq.f32.partialorder %v1504_v54, 8.507059e+37 }
 0x251   : > { %2022 = vadd.xlane.f32.xlu1 %v2014_v56  ;;  %v4916_v15 = vpop.eup %3705  ;;  %v1447_v56 = vor.u32 1.1754944e-38, %v1446_v61  ;;  %v1586_v19 = vmul.f32 %v4910_v18, %v4867_v8  ;;  %v1499_v47 = vadd.f32 %v4872_v43, %v1498_v31  ;;  %v4956_v61 = vmul.f32 %v1418_v42, %v4781_v46 }
 0x252   : > { %v1556_v12 = vmul.f32 %v4916_v15, %v4870_v7  ;;  %v1469_v28 = vadd.f32 %v4877_v60, %v1468_v0  ;;  %vm1591_vm9 = vweird.f32 %v4910_v18  ;;  %vm1561_vm10 = vweird.f32 %v4916_v15 }
 0x253   : > { %1992 = vadd.xlane.f32.xlu2 %v4845_v48  ;;  %2024 = vadd.xlane.f32.xlu0 %v2015_v52  ;;  %v1388_v52 = vsel %vm1385_vm8, %v1387_v22, %v1383_v3  ;;  %v1448_v36 = vsel %vm1445_vm11, %v1447_v56, %v1443_v13  ;;  %v1587_v2 = vsub.f32 1.0, %v1586_v19  ;;  %vm1475_vm8 = vcmp.eq.f32.partialorder %v1474_v62, 8.507059e+37  ;;  %vm1562_vm14 = vmor %vm1560_vm12, %vm1561_vm10 }
 0x254   : > { %v4930_v49 = vmul.f32 %v1388_v52, %v4772_v37  ;;  %v4934_v9 = vmul.f32 %v1448_v36, %v4775_v20  ;;  %v1533_v20 = vsel %vm4941_vm0, %v4865_v26, %v1529_v17  ;;  %v1557_v29 = vsub.f32 1.0, %v1556_v12 }
 0x255   : > { %v1503_v26 = vsel %vm1502_vm4, %v4872_v43, %v1499_v47  ;;  %v1538_v63 = vsel %vm1535_vm5, %v1537_v55, %v1533_v20  ;;  %v1588_v1 = vmul.f32 %v4910_v18, %v1587_v2  ;;  %v1473_v46 = vsel %vm1472_vm6, %v4877_v60, %v1469_v28 }
 0x256   : > { %v1558_v3 = vmul.f32 %v4916_v15, %v1557_v29  ;;  %v1508_v11 = vsel %vm1505_vm7, %v1507_v30, %v1503_v26  ;;  %v4971_v43 = vmul.f32 %v1538_v63, %v4788_v39  ;;  %v1478_v14 = vsel %vm1475_vm8, %v1477_v33, %v1473_v46  ;;  %v2523_v26 = vld [vmem:[%s6265_s15 + $0x78] sm:$0xff] }
 0x257   : > { %v1589_v16 = vadd.f32 %v4910_v18, %v1588_v1  ;;  %v1596_v22 = vand.u32 2147483648, %v4867_v8  ;;  %v4981_v13 = vmul.f32 %v1508_v11, %v4794_v32  ;;  %v1566_v39 = vand.u32 2147483648, %v4870_v7  ;;  %2528 = vmatpush.msra.mxu1 %v2523_v26  ;;  %3524 = vmatpush.msra.mxu2 %v2523_v26  ;;  %v2522_v11 = vld [vmem:[%s6265_s15 + $0x70] sm:$0xff] }
 0x258   : > { %v1559_v60 = vadd.f32 %v4916_v15, %v1558_v3  ;;  %vm1590_vm11 = vweird.f32 %v4867_v8  ;;  %v1594_v50 = vand.u32 2147483647, %v4867_v8  ;;  %v4987_v27 = vmul.f32 %v1478_v14, %v4798_v44  ;;  %v5037_v14 = vld [vmem:[%s6259_s9] ss:$0 sm:$0xff]  ;;  %2605 = vmatpush.msra.mxu0 %v2523_v26 }
 0x259   : > { %vm1592_vm13 = vmor %vm1590_vm11, %vm1591_vm9  ;;  %v1597_v52 = vor.u32 1.1754944e-38, %v1596_v22  ;;  %v1567_v8 = vor.u32 1.1754944e-38, %v1566_v39  ;;  %vm1565_vm0 = vcmp.eq.f32.partialorder %v1564_v58, 8.507059e+37  ;;  %2529 = vmatpush.msra.mxu1 %v2522_v11  ;;  %3525 = vmatpush.msra.mxu2 %v2522_v11  ;;  %v5050_v58 = vld [vmem:[%s6260_s10] ss:$0 sm:$0xff] }
 0x25a   : > { %v1593_v56 = vsel %vm1592_vm13, %v4910_v18, %v1589_v16  ;;  %v1563_v32 = vsel %vm1562_vm14, %v4916_v15, %v1559_v60  ;;  %vm1595_vm15 = vcmp.eq.f32.partialorder %v1594_v50, 8.507059e+37  ;;  %v2521_v50 = vld [vmem:[%s6265_s15 + $0x68] sm:$0xff]  ;;  %2606 = vmatpush.msra.mxu0 %v2522_v11 }
 0x25b   : > { %v1598_v44 = vsel %vm1595_vm15, %v1597_v52, %v1593_v56  ;;  %v1568_v40 = vsel %vm1565_vm0, %v1567_v8, %v1563_v32  ;;  %2530 = vmatpush.msra.mxu1 %v2521_v50  ;;  %3526 = vmatpush.msra.mxu2 %v2521_v50  ;;  %v2520_v52 = vld [vmem:[%s6265_s15 + $0x60] sm:$0xff] }
 0x25c   : > { %v4998_v7 = vmul.f32 %v1598_v44, %v4808_v38  ;;  %v5001_v35 = vmul.f32 %v1568_v40, %v4810_v21  ;;  %2607 = vmatpush.msra.mxu0 %v2521_v50 }
 0x25d   : > { %2531 = vmatpush.msra.mxu1 %v2520_v52  ;;  %3527 = vmatpush.msra.mxu2 %v2520_v52 }
 0x25e   : > { %2608 = vmatpush.msra.mxu0 %v2520_v52  ;;  %v5128_v52 = vld [vmem:[%s6264_s14] ss:$0 sm:$0xff] }
 0x267   : > { %3010 = vrot.lane.b32.xlu0 %v4934_v9, %s4053_s29 }
 0x26a   : > { %3006 = vrot.lane.b32.xlu1 %v4930_v49, %s4053_s29 }
 0x26b   : > { %3008 = vrot.lane.b32.xlu2 %v4956_v61, %s4053_s29 }
 0x26f   : > { %3016 = vrot.lane.b32.xlu0 %v4971_v43, %s4053_s29 }
 0x272   : > { %3014 = vrot.lane.b32.xlu1 %v4981_v13, %s4053_s29 }
 0x273   : > { %3012 = vrot.lane.b32.xlu2 %v4987_v27, %s4053_s29 }
 0x27a   : > { %3020 = vrot.lane.b32.xlu1 %v4998_v7, %s4053_s29 }
 0x27b   : > { %3018 = vrot.lane.b32.xlu2 %v5001_v35, %s4053_s29 }
 0x285   : > { %v1794_v18 = vpop.xlane.xlu2 %1793 }
 0x286   : > { %v1797_v15 = vmul.f32 %v1794_v18, %v4327_v25 }
 0x287   : > { %v1802_v36 = vpop.xlane.xlu0 %1801 }
 0x288   : > { %v1807_v31 = vmul.f32 %v1797_v15, %v1797_v15  ;;  %v1805_v19 = vmul.f32 %v1802_v36, %v4327_v25  ;;  %v1811_v46 = vsub.f32 %v4741_v4, %v1797_v15  ;;  %v2519_v15 = vld [vmem:[%s6265_s15 + $0x58] sm:$0xff] }
 0x289   : > { %2532 = vmatpush.msra.mxu1 %v2519_v15  ;;  %3528 = vmatpush.msra.mxu2 %v2519_v15 }
 0x28a   : > { %v1809_v0 = vsub.f32 %v1805_v19, %v1807_v31  ;;  %2609 = vmatpush.msra.mxu0 %v2519_v15 }
 0x28c   : > { %v1813_v17 = vadd.f32 1e-05, %v1809_v0 }
 0x28e   : > { %3707 = vrsqrt.f32 %v1813_v17  ;;  %vm1821_vm2 = vweird.f32 %v1813_v17 }
 0x290   : > { %v1796_v42 = vpop.xlane.xlu0 %1795 }
 0x291   : > { %v5016_v2 = vmul.f32 %v1796_v42, %v4327_v25 }
 0x293   : > { %v1808_v55 = vmul.f32 %v5016_v2, %v5016_v2 }
 0x294   : > { %v1995_v38 = vpop.xlane.xlu1 %1994  ;;  %v3708_v12 = vpop.eup %3707 }
 0x295   : > { %v5010_v21 = vmul.f32 %v1995_v38, %v4327_v25  ;;  %v1816_v6 = vmul.f32 %v3708_v12, %v1813_v17  ;;  %vm1822_vm1 = vweird.f32 %v3708_v12  ;;  %v2518_v17 = vld [vmem:[%s6265_s15 + $0x50] sm:$0xff] }
 0x296   : > { %v2027_v23 = vpop.xlane.xlu2 %2026  ;;  %vm1823_vm3 = vmor %vm1821_vm2, %vm1822_vm1  ;;  %2533 = vmatpush.msra.mxu1 %v2518_v17  ;;  %3529 = vmatpush.msra.mxu2 %v2518_v17 }
 0x297   : > { %v2048_v47 = vmul.f32 %v5010_v21, %v5010_v21  ;;  %v2040_v51 = vmul.f32 %v2027_v23, %v4327_v25  ;;  %v1817_v37 = vmul.f32 %v3708_v12, %v1816_v6  ;;  %2610 = vmatpush.msra.mxu0 %v2518_v17  ;;  %v2511_v17 = vld [vmem:[%s6265_s15 + $0x18] sm:$0xff] }
 0x299   : > { %v2056_v28 = vsub.f32 %v2040_v51, %v2048_v47  ;;  %v1818_v20 = vmul.f32 0.5, %v1817_v37  ;;  %v2517_v47 = vld [vmem:[%s6265_s15 + $0x48] sm:$0xff] }
 0x29a   : > { %2534 = vmatpush.msra.mxu1 %v2517_v47  ;;  %3530 = vmatpush.msra.mxu2 %v2517_v47 }
 0x29b   : > { %v5018_v29 = vadd.f32 1e-05, %v2056_v28  ;;  %v1819_v53 = vsub.f32 1.5, %v1818_v20  ;;  %2611 = vmatpush.msra.mxu0 %v2517_v47 }
 0x29c   : > { %v1804_v54 = vpop.xlane.xlu1 %1803 }
 0x29d   : > { %3709 = vrsqrt.f32 %v5018_v29  ;;  %v1806_v62 = vmul.f32 %v1804_v54, %v4327_v25  ;;  %v1820_v63 = vmul.f32 %v3708_v12, %v1819_v53  ;;  %v2516_v54 = vld [vmem:[%s6265_s15 + $0x40] sm:$0xff]  ;;  %vm2104_vm5 = vweird.f32 %v5018_v29 }
 0x29e   : > { %v1997_v1 = vpop.xlane.xlu2 %1996  ;;  %v2029_v33 = vpop.xlane.xlu0 %2028  ;;  %2535 = vmatpush.msra.mxu1 %v2516_v54  ;;  %3531 = vmatpush.msra.mxu2 %v2516_v54 }
 0x29f   : > { %v1810_v30 = vsub.f32 %v1806_v62, %v1808_v55  ;;  %v5029_v3 = vmul.f32 %v1997_v1, %v4327_v25  ;;  %v1824_v16 = vsel %vm1823_vm3, %v3708_v12, %v1820_v63  ;;  %v2041_v39 = vmul.f32 %v2029_v33, %v4327_v25  ;;  %2612 = vmatpush.msra.mxu0 %v2516_v54 }
 0x2a0   : > { %v1835_v4 = vmul.f32 %v1824_v16, %v1811_v46  ;;  %v2064_v1 = vsub.f32 %v4757_v24, %v5010_v21  ;;  %v2515_v46 = vld [vmem:[%s6265_s15 + $0x38] sm:$0xff]  ;;  %v2514_v24 = vld [vmem:[%s6265_s15 + $0x30] sm:$0xff]  ;;  %v5114_v21 = vld [vmem:[%s6263_s13] ss:$0 sm:$0xff] }
 0x2a1   : > { %v5039_v60 = vadd.f32 1e-05, %v1810_v30  ;;  %v2049_v22 = vmul.f32 %v5029_v3, %v5029_v3  ;;  %2536 = vmatpush.msra.mxu1 %v2515_v46  ;;  %3532 = vmatpush.msra.mxu2 %v2515_v46 }
 0x2a2   : > { %v1840_v8 = vmul.f32 %v5037_v14, %v1835_v4  ;;  %2613 = vmatpush.msra.mxu0 %v2515_v46  ;;  %v2509_v46 = vld [vmem:[%s6265_s15 + $0x8] sm:$0xff] }
 0x2a3   : > { %v3710_v56 = vpop.eup %3709  ;;  %3711 = vrsqrt.f32 %v5039_v60  ;;  %v2057_v32 = vsub.f32 %v2041_v39, %v2049_v22  ;;  %2537 = vmatpush.msra.mxu1 %v2514_v24  ;;  %3533 = vmatpush.msra.mxu2 %v2514_v24  ;;  %vm1831_vm8 = vweird.f32 %v5039_v60 }
 0x2a4   : > { %v2099_v44 = vmul.f32 %v3710_v56, %v5018_v29  ;;  %v1999_v18 = vpop.xlane.xlu1 %1998  ;;  %v5064_v36 = vadd.f32 %v5050_v58, %v1840_v8  ;;  %vm2105_vm4 = vweird.f32 %v3710_v56  ;;  %2614 = vmatpush.msra.mxu0 %v2514_v24 }
 0x2a5   : > { %v5058_v40 = vadd.f32 1e-05, %v2057_v32  ;;  %v5067_v19 = vmul.f32 %v1999_v18, %v4327_v25  ;;  %vm2106_vm6 = vmor %vm2104_vm5, %vm2105_vm4  ;;  %v2513_v32 = vld [vmem:[%s6265_s15 + $0x28] sm:$0xff] }
 0x2a6   : > { %v2100_v31 = vmul.f32 %v3710_v56, %v2099_v44  ;;  %v2031_v0 = vpop.xlane.xlu2 %2030  ;;  %v5073_v38 = vmul.f32 0.70710677, %v5064_v36  ;;  %2538 = vmatpush.msra.mxu1 %v2513_v32  ;;  %3534 = vmatpush.msra.mxu2 %v2513_v32  ;;  %v2512_v44 = vld [vmem:[%s6265_s15 + $0x20] sm:$0xff] }
 0x2a7   : > { %v2050_v6 = vmul.f32 %v5067_v19, %v5067_v19  ;;  %v2042_v42 = vmul.f32 %v2031_v0, %v4327_v25  ;;  %3713 = vrsqrt.f32 %v5058_v40  ;;  %2615 = vmatpush.msra.mxu0 %v2513_v32  ;;  %vm2114_vm0 = vweird.f32 %v5058_v40 }
 0x2a8   : > { %v2101_v12 = vmul.f32 0.5, %v2100_v31  ;;  %v5085_v51 = vand.u32 2147483647, %v5073_v38  ;;  %2539 = vmatpush.msra.mxu1 %v2512_v44  ;;  %3535 = vmatpush.msra.mxu2 %v2512_v44  ;;  %vm1851_vm12 = vcmp.ge.f32.partialorder %v5073_v38, 0.0 }
 0x2a9   : > { %v5078_v23 = vpop.eup %3711  ;;  %v2058_v20 = vsub.f32 %v2042_v42, %v2050_v6  ;;  %2616 = vmatpush.msra.mxu0 %v2512_v44 }
 0x2aa   : > { %v2102_v37 = vsub.f32 1.5, %v2101_v12  ;;  %v1826_v28 = vmul.f32 %v5078_v23, %v5039_v60  ;;  %v1857_v55 = vmul.f32 0.3275911, %v5085_v51  ;;  %vm1832_vm7 = vweird.f32 %v5078_v23  ;;  %2540 = vmatpush.msra.mxu1 %v2511_v17  ;;  %3536 = vmatpush.msra.mxu2 %v2511_v17 }
 0x2ab   : > { %v5116_v39 = vadd.f32 1e-05, %v2058_v20  ;;  %vm5149_vm9 = vmor %vm1831_vm8, %vm1832_vm7  ;;  %v2510_v20 = vld [vmem:[%s6265_s15 + $0x10] sm:$0xff]  ;;  %2617 = vmatpush.msra.mxu0 %v2511_v17 }
 0x2ac   : > { %v2001_v53 = vpop.xlane.xlu0 %2000  ;;  %v2103_v62 = vmul.f32 %v3710_v56, %v2102_v37  ;;  %v1827_v26 = vmul.f32 %v5078_v23, %v1826_v28  ;;  %v5104_v30 = vadd.f32 1.0, %v1857_v55  ;;  %2541 = vmatpush.msra.mxu1 %v2510_v20  ;;  %3537 = vmatpush.msra.mxu2 %v2510_v20 }
 0x2ad   : > { %v5096_v63 = vmul.f32 %v2001_v53, %v4327_v25  ;;  %v5106_v16 = vpop.eup %3713  ;;  %2618 = vmatpush.msra.mxu0 %v2510_v20  ;;  %vm2124_vm3 = vweird.f32 %v5116_v39 }
 0x2ae   : > { %v2107_v29 = vsel %vm2106_vm6, %v3710_v56, %v2103_v62  ;;  %v1828_v33 = vmul.f32 0.5, %v1827_v26  ;;  %v2033_v11 = vpop.xlane.xlu1 %2032  ;;  %3715 = vrcp.f32 %v5104_v30  ;;  %v2109_v8 = vmul.f32 %v5106_v16, %v5058_v40  ;;  %2542 = vmatpush.msra.mxu1 %v2509_v46  ;;  %3538 = vmatpush.msra.mxu2 %v2509_v46 }
 0x2af   : > { %v2160_v4 = vmul.f32 %v2107_v29, %v2064_v1  ;;  %v2051_v50 = vmul.f32 %v5096_v63, %v5096_v63  ;;  %v2043_v56 = vmul.f32 %v2033_v11, %v4327_v25  ;;  %3717 = vrsqrt.f32 %v5116_v39  ;;  %2619 = vmatpush.msra.mxu0 %v2509_v46 }
 0x2b0   : > { %v1829_v22 = vsub.f32 1.5, %v1828_v33  ;;  %v2110_v6 = vmul.f32 %v5106_v16, %v2109_v8  ;;  %v1812_v26 = vsub.f32 %v4748_v57, %v5016_v2  ;;  %v2508_v57 = vld [vmem:[%s6265_s15] sm:$0xff]  ;;  %v1909_v2 = vsub.f32 0.0, %v5085_v51 }
 0x2b1   : > { %v2171_v18 = vmul.f32 %v5114_v21, %v2160_v4  ;;  %v2059_v31 = vsub.f32 %v2043_v56, %v2051_v50  ;;  %2543 = vmatpush.msra.mxu1 %v2508_v57  ;;  %v1872_v56 = vand.u32 2147483648, %v5104_v30  ;;  %3539 = vmatpush.msra.mxu2 %v2508_v57  ;;  %v1870_v44 = vand.u32 2147483647, %v5104_v30 }
 0x2b2   : > { %v1830_v15 = vmul.f32 %v5078_v23, %v1829_v22  ;;  %v2111_v11 = vmul.f32 0.5, %v2110_v6  ;;  %2620 = vmatpush.msra.mxu0 %v2508_v57  ;;  %vm1866_vm11 = vweird.f32 %v5104_v30  ;;  %v1911_v47 = vmul.f32 %v1909_v2, %v5085_v51 }
 0x2b3   : > { %v5143_v12 = vadd.f32 %v5128_v52, %v2171_v18  ;;  %v5162_v53 = vadd.f32 1e-05, %v2059_v31  ;;  %vm1871_vm14 = vcmp.eq.f32.partialorder %v1870_v44, 8.507059e+37  ;;  %vm2115_vm15 = vweird.f32 %v5106_v16 }
 0x2b4   : > { %v2003_v0 = vpop.xlane.xlu2 %2002  ;;  %v5147_v42 = vpop.eup %3715  ;;  %v1834_v62 = vsel %vm5149_vm9, %v5078_v23, %v1830_v15  ;;  %v2112_v15 = vsub.f32 1.5, %v2111_v11  ;;  %v1913_v11 = vmul.f32 1.442695, %v1911_v47  ;;  %v5229_v57 = vmul.f32 0.5, %v5064_v36  ;;  %vm5231_vm1 = vmor %vm2114_vm0, %vm2115_vm15 }
 0x2b5   : > { %v5154_v37 = vmul.f32 %v2003_v0, %v4327_v25  ;;  %v5160_v60 = vmul.f32 0.70710677, %v5143_v12  ;;  %v1862_v55 = vmul.f32 %v5147_v42, %v5104_v30  ;;  %v5180_v33 = vpop.eup %3717  ;;  %v1836_v22 = vmul.f32 %v1834_v62, %v1812_v26 }
 0x2b6   : > { %v2035_v28 = vpop.xlane.xlu0 %2034  ;;  %3719 = vrsqrt.f32 %v5162_v53  ;;  %v2119_v32 = vmul.f32 %v5180_v33, %v5116_v39  ;;  %vm1867_vm10 = vweird.f32 %v5147_v42  ;;  %v6286_v40 = vmov -1.0  }
 0x2b7   : > { %v2044_v54 = vmul.f32 %v2035_v28, %v4327_v25  ;;  %v2052_v1 = vmul.f32 %v5154_v37, %v5154_v37  ;;  %v5178_v29 = vand.u32 2147483647, %v5160_v60  ;;  %v1863_v4 = vsub.f32 1.0, %v1862_v55  ;;  %vm1868_vm13 = vmor %vm1866_vm11, %vm1867_vm10 }
 0x2b8   : > { %v1841_v28 = vmul.f32 %v5037_v14, %v1836_v22  ;;  %v1873_v55 = vor.u32 1.1754944e-38, %v1872_v56  ;;  %v2120_v62 = vmul.f32 %v5180_v33, %v2119_v32  ;;  %v2113_v14 = vmul.f32 %v5106_v16, %v2112_v15 }
 0x2b9   : > { %v2060_v23 = vsub.f32 %v2044_v54, %v2052_v1  ;;  %v2230_v24 = vmul.f32 0.3275911, %v5178_v29  ;;  %v1864_v50 = vmul.f32 %v5147_v42, %v1863_v4  ;;  %v5246_v36 = vsel %vm1851_vm12, 1.0, %v6286_v40 }
 0x2ba   : > { %v5223_v4 = vadd.f32 %v5050_v58, %v1841_v28  ;;  %v2121_v22 = vmul.f32 0.5, %v2120_v62  ;;  %v2117_v56 = vsel %vm5231_vm1, %v5106_v16, %v2113_v14  ;;  %vm2125_vm2 = vweird.f32 %v5180_v33 }
 0x2bb   : > { %v5194_v18 = vadd.f32 1.0, %v2230_v24  ;;  %v1865_v0 = vadd.f32 %v5147_v42, %v1864_v50  ;;  %v5200_v17 = vadd.f32 1e-05, %v2060_v23  ;;  %v2438_v47 = vsub.f32 0.0, %v5178_v29  ;;  %vm5299_vm9 = vmor %vm2124_vm3, %vm2125_vm2 }
 0x2bc   : > { %v2005_v8 = vpop.xlane.xlu1 %2004  ;;  %v5214_v51 = vpop.eup %3719  ;;  %v5254_v15 = vmul.f32 0.70710677, %v5223_v4  ;;  %vm2206_vm5 = vcmp.ge.f32.partialorder %v5160_v60, 0.0  ;;  %vm2134_vm10 = vweird.f32 %v5162_v53 }
 0x2bd   : > { %v5197_v31 = vmul.f32 %v2005_v8, %v4327_v25  ;;  %v1869_v26 = vsel %vm1868_vm13, %v5147_v42, %v1865_v0  ;;  %3721 = vrcp.f32 %v5194_v18  ;;  %v2065_v42 = vsub.f32 %v4768_v34, %v5029_v3 }
 0x2be   : > { %v2037_v6 = vpop.xlane.xlu2 %2036  ;;  %v5218_v1 = vsel %vm1871_vm14, %v1873_v55, %v1869_v26  ;;  %3723 = vrsqrt.f32 %v5200_v17  ;;  %v1991_v23 = vpop.xlane.xlu0 %1990  ;;  %v2129_v58 = vmul.f32 %v5214_v51, %v5162_v53  ;;  %vm2279_vm6 = vweird.f32 %v5194_v18 }
 0x2bf   : > { %v2053_v20 = vmul.f32 %v5197_v31, %v5197_v31  ;;  %v2045_v54 = vmul.f32 %v2037_v6, %v4327_v25  ;;  %v1891_v46 = vmul.f32 1.0614054, %v5218_v1  ;;  %3725 = vpow2.f32 %v1913_v11 }
 0x2c0   : > { %v5258_v38 = vmul.f32 %v1991_v23, %v4327_v25  ;;  %v5261_v6 = vmul.f32 0.5, %v5143_v12  ;;  %v2161_v62 = vmul.f32 %v2117_v56, %v2065_v42  ;;  %v2285_v11 = vand.u32 2147483648, %v5194_v18 }
 0x2c1   : > { %v2061_v30 = vsub.f32 %v2045_v54, %v2053_v20  ;;  %v1893_v50 = vadd.f32 -1.4531521, %v1891_v46  ;;  %v2122_v20 = vsub.f32 1.5, %v2121_v22  ;;  %v2130_v54 = vmul.f32 %v5214_v51, %v2129_v58 }
 0x2c2   : > { %v5277_v23 = vand.u32 2147483647, %v5254_v15  ;;  %v2046_v2 = vmul.f32 %v5258_v38, %v5258_v38  ;;  %v2446_v56 = vmul.f32 %v2438_v47, %v5178_v29  ;;  %v2286_v24 = vor.u32 1.1754944e-38, %v2285_v11 }
 0x2c3   : > { %v5241_v3 = vadd.f32 1e-05, %v2061_v30  ;;  %v3722_v32 = vpop.eup %3721  ;;  %v1895_v44 = vmul.f32 %v1893_v50, %v5218_v1  ;;  %v2283_v30 = vand.u32 2147483647, %v5194_v18  ;;  %v2123_v50 = vmul.f32 %v5180_v33, %v2122_v20 }
 0x2c4   : > { %v2023_v8 = vpop.xlane.xlu1 %2022  ;;  %v2275_v16 = vmul.f32 %v3722_v32, %v5194_v18  ;;  %v5265_v28 = vpop.eup %3723  ;;  %vm2280_vm4 = vweird.f32 %v3722_v32  ;;  %v2131_v34 = vmul.f32 0.5, %v2130_v54  ;;  %v1858_v20 = vmul.f32 0.3275911, %v5277_v23 }
 0x2c5   : > { %v1897_v55 = vadd.f32 1.4214138, %v1895_v44  ;;  %3727 = vrsqrt.f32 %v5241_v3  ;;  %v2038_v26 = vmul.f32 %v2023_v8, %v4327_v25  ;;  %v2139_v42 = vmul.f32 %v5265_v28, %v5200_v17  ;;  %v3726_v58 = vpop.eup %3725  ;;  %vm2281_vm7 = vmor %vm2279_vm6, %vm2280_vm4 }
 0x2c6   : > { %v1993_v0 = vpop.xlane.xlu2 %1992  ;;  %v2276_v14 = vsub.f32 1.0, %v2275_v16  ;;  %v2172_v8 = vmul.f32 %v5114_v21, %v2161_v62  ;;  %vm2284_vm8 = vcmp.eq.f32.partialorder %v2283_v30, 8.507059e+37  ;;  %v2127_v39 = vsel %vm5299_vm9, %v5180_v33, %v2123_v50 }
 0x2c7   : > { %v5272_v12 = vmul.f32 %v1993_v0, %v4327_v25  ;;  %v1899_v46 = vmul.f32 %v1897_v55, %v5218_v1  ;;  %v2054_v44 = vsub.f32 %v2038_v26, %v2046_v2  ;;  %v2025_v0 = vpop.xlane.xlu0 %2024  ;;  %v2140_v29 = vmul.f32 %v5265_v28, %v2139_v42 }
 0x2c8   : > { %v2277_v22 = vmul.f32 %v3722_v32, %v2276_v14  ;;  %v2039_v54 = vmul.f32 %v2025_v0, %v4327_v25  ;;  %v5309_v11 = vadd.f32 %v5128_v52, %v2172_v8  ;;  %v2068_v25 = vsub.f32 %v4806_v41, %v5154_v37 }
 0x2c9   : > { %v1901_v16 = vadd.f32 -0.28449672, %v1899_v46  ;;  %v2047_v14 = vmul.f32 %v5272_v12, %v5272_v12  ;;  %v5306_v46 = vadd.f32 1.0, %v1858_v20  ;;  %v5311_v42 = vadd.f32 1e-05, %v2054_v44 }
 0x2ca   : > { %v2278_v55 = vadd.f32 %v3722_v32, %v2277_v22  ;;  %v2132_v22 = vsub.f32 1.5, %v2131_v34  ;;  %v6346_v44 = vmov -1.0   ;;  %vm2135_vm11 = vweird.f32 %v5214_v51 }
 0x2cb   : > { %v5291_v40 = vpop.eup %3727  ;;  %v1903_v47 = vmul.f32 %v1901_v16, %v5218_v1  ;;  %v2055_v2 = vsub.f32 %v2039_v54, %v2047_v14  ;;  %3729 = vrcp.f32 %v5306_v46  ;;  %v5327_v0 = vsel %vm2206_vm5, 1.0, %v6346_v44  ;;  %vm5367_vm14 = vmor %vm2134_vm10, %vm2135_vm11 }
 0x2cc   : > { %v2282_v62 = vsel %vm2281_vm7, %v3722_v32, %v2278_v55  ;;  %v2456_v50 = vmul.f32 1.442695, %v2446_v56  ;;  %v5331_v16 = vmul.f32 0.70710677, %v5309_v11  ;;  %v6347_v55 = vsub.f32 %v4779_v45, %v5067_v19 }
 0x2cd   : > { %v5304_v26 = vsel %vm2284_vm8, %v2286_v24, %v2282_v62  ;;  %v1905_v32 = vadd.f32 0.2548296, %v1903_v47  ;;  %v2149_v24 = vmul.f32 %v5291_v40, %v5241_v3  ;;  %v2141_v20 = vmul.f32 0.5, %v2140_v29 }
 0x2ce   : > { %v2366_v30 = vmul.f32 1.0614054, %v5304_v26  ;;  %v2162_v14 = vmul.f32 %v2127_v39, %v6347_v55  ;;  %3731 = vrsqrt.f32 %v5311_v42  ;;  %v2069_v60 = vsub.f32 %v4824_v10, %v5197_v31 }
 0x2cf   : > { %v1907_v8 = vmul.f32 %v1905_v32, %v5218_v1  ;;  %v2150_v47 = vmul.f32 %v5291_v40, %v2149_v24  ;;  %v2062_v56 = vsub.f32 %v4831_v59, %v5258_v38  ;;  %v5343_v62 = vadd.f32 1e-05, %v2055_v2 }
 0x2d0   : > { %v2374_v33 = vadd.f32 -1.4531521, %v2366_v30  ;;  %v2133_v18 = vmul.f32 %v5214_v51, %v2132_v22  ;;  %v5347_v29 = vmul.f32 0.5, %v5223_v4  ;;  %3733 = vpow2.f32 %v2456_v50 }
 0x2d1   : > { %v1917_v1 = vmul.f32 %v3726_v58, %v1907_v8  ;;  %v3730_v58 = vpop.eup %3729  ;;  %vm1852_vm12 = vcmp.ge.f32.partialorder %v5254_v15, 0.0  ;;  %v5351_v54 = vand.u32 2147483647, %v5331_v16  ;;  %v2173_v32 = vmul.f32 %v5114_v21, %v2162_v14 }
 0x2d2   : > { %v2382_v34 = vmul.f32 %v2374_v33, %v5304_v26  ;;  %v2142_v30 = vsub.f32 1.5, %v2141_v20  ;;  %vm2145_vm13 = vweird.f32 %v5265_v28  ;;  %v1877_v2 = vmul.f32 %v3730_v58, %v5306_v46 }
 0x2d3   : > { %v1919_v45 = vsub.f32 1.0, %v1917_v1  ;;  %v2151_v4 = vmul.f32 0.5, %v2150_v47  ;;  %3735 = vrsqrt.f32 %v5343_v62  ;;  %v1910_v22 = vsub.f32 0.0, %v5277_v23 }
 0x2d4   : > { %v2390_v19 = vadd.f32 1.4214138, %v2382_v34  ;;  %v2231_v8 = vmul.f32 0.3275911, %v5351_v54  ;;  %v5361_v33 = vpop.eup %3731  ;;  %vm2144_vm15 = vweird.f32 %v5200_v17  ;;  %v1878_v14 = vsub.f32 1.0, %v1877_v2 }
 0x2d5   : > { %v1921_v39 = vmul.f32 %v1919_v45, %v5246_v36  ;;  %v1885_v20 = vand.u32 2147483647, %v5306_v46  ;;  %v1887_v1 = vand.u32 2147483648, %v5306_v46  ;;  %v5377_v47 = vadd.f32 %v5128_v52, %v2173_v32  ;;  %vm5420_vm6 = vmor %vm2144_vm15, %vm2145_vm13 }
 0x2d6   : > { %v2398_v24 = vmul.f32 %v2390_v19, %v5304_v26  ;;  %v5374_v34 = vadd.f32 1.0, %v2231_v8  ;;  %v2137_v53 = vsel %vm5367_vm14, %v5214_v51, %v2133_v18  ;;  %vm1882_vm0 = vweird.f32 %v3730_v58 }
 0x2d7   : > { %v1923_v36 = vadd.f32 1.0, %v1921_v39  ;;  %v1879_v39 = vmul.f32 %v3730_v58, %v1878_v14  ;;  %v2079_v2 = vmul.f32 %v5361_v33, %v5311_v42  ;;  %v5391_v32 = vsel %vm1852_vm12, 1.0, %v6346_v44 }
 0x2d8   : > { %v2406_v55 = vadd.f32 -0.28449672, %v2398_v24  ;;  %v3734_v24 = vpop.eup %3733  ;;  %3737 = vrcp.f32 %v5374_v34  ;;  %vm1881_vm1 = vweird.f32 %v5306_v46  ;;  %v1912_v18 = vmul.f32 %v1910_v22, %v5277_v23 }
 0x2d9   : > { %v1925_v45 = vmul.f32 %v1923_v36, %v5229_v57  ;;  %v1880_v57 = vadd.f32 %v3730_v58, %v1879_v39  ;;  %v5396_v50 = vpop.eup %3735  ;;  %v2152_v36 = vsub.f32 1.5, %v2151_v4  ;;  %vm1883_vm2 = vmor %vm1881_vm1, %vm1882_vm0  ;;  %v5399_v14 = vmul.f32 0.70710677, %v5377_v47 }
 0x2da   : > { %v2414_v19 = vmul.f32 %v2406_v55, %v5304_v26  ;;  %v1888_v55 = vor.u32 1.1754944e-38, %v1887_v1  ;;  %v6350_v15 = vsub.f32 %v4791_v5, %v5096_v63  ;;  %vm2154_vm3 = vweird.f32 %v5241_v3 }
 0x2db   : > { %2544 = vmatmul.f32.vlgmr.msra.gmra.mxu1 %v1925_v45  ;;  %v2143_v45 = vmul.f32 %v5265_v28, %v2142_v30  ;;  %vm1886_vm4 = vcmp.eq.f32.partialorder %v1885_v20, 8.507059e+37  ;;  %vm2155_vm5 = vweird.f32 %v5291_v40  ;;  %v2080_v23 = vmul.f32 %v5361_v33, %v2079_v2 }
 0x2dc   : > { %v2422_v51 = vadd.f32 0.2548296, %v2414_v19  ;;  %v2163_v8 = vmul.f32 %v2137_v53, %v6350_v15  ;;  %v1884_v19 = vsel %vm1883_vm2, %v3730_v58, %v1880_v57  ;;  %v5412_v22 = vand.u32 2147483647, %v5399_v14  ;;  %vm5454_vm10 = vmor %vm2154_vm3, %vm2155_vm5 }
 0x2dd   : > { %v5409_v4 = vsel %vm1886_vm4, %v1888_v55, %v1884_v19  ;;  %v1915_v63 = vmul.f32 1.442695, %v1912_v18  ;;  %v2153_v58 = vmul.f32 %v5291_v40, %v2152_v36  ;;  %v5426_v20 = vmul.f32 0.5, %v5309_v11 }
 0x2de   : > { %v2430_v46 = vmul.f32 %v2422_v51, %v5304_v26  ;;  %v1892_v5 = vmul.f32 1.0614054, %v5409_v4  ;;  %v2174_v30 = vmul.f32 %v5114_v21, %v2163_v8  ;;  %v3738_v53 = vpop.eup %3737  ;;  %vm2207_vm7 = vcmp.ge.f32.partialorder %v5331_v16, 0.0 }
 0x2df   : > { %v2232_v39 = vmul.f32 0.3275911, %v5412_v22  ;;  %v2290_v8 = vmul.f32 %v3738_v53, %v5374_v34  ;;  %v2147_v17 = vsel %vm5420_vm6, %v5265_v28, %v2143_v45  ;;  %v2081_v51 = vmul.f32 0.5, %v2080_v23 }
 0x2e0   : > { %v2470_v1 = vmul.f32 %v3734_v24, %v2430_v46  ;;  %v1894_v2 = vadd.f32 -1.4531521, %v1892_v5  ;;  %v2089_v57 = vmul.f32 %v5396_v50, %v5343_v62  ;;  %v5439_v11 = vadd.f32 %v5128_v52, %v2174_v30 }
 0x2e1   : > { %v5436_v18 = vadd.f32 1.0, %v2232_v39  ;;  %3739 = vpow2.f32 %v1915_v63  ;;  %v2291_v15 = vsub.f32 1.0, %v2290_v8  ;;  %vm2085_vm8 = vweird.f32 %v5361_v33 }
 0x2e2   : > { %v2478_v24 = vsub.f32 1.0, %v2470_v1  ;;  %v1896_v55 = vmul.f32 %v1894_v2, %v5409_v4  ;;  %v2298_v46 = vand.u32 2147483647, %v5374_v34  ;;  %v2300_v28 = vand.u32 2147483648, %v5374_v34 }
 0x2e3   : > { %3741 = vrcp.f32 %v5436_v18  ;;  %v2164_v45 = vmul.f32 %v2147_v17, %v2068_v25  ;;  %v2292_v1 = vmul.f32 %v3738_v53, %v2291_v15  ;;  %vm2295_vm9 = vweird.f32 %v3738_v53 }
 0x2e4   : > { %v2486_v36 = vmul.f32 %v2478_v24, %v5327_v0  ;;  %v1898_v23 = vadd.f32 1.4214138, %v1896_v55  ;;  %v2082_v5 = vsub.f32 1.5, %v2081_v51  ;;  %vm2084_vm11 = vweird.f32 %v5311_v42 }
 0x2e5   : > { %v2090_v63 = vmul.f32 %v5396_v50, %v2089_v57  ;;  %vm2294_vm12 = vweird.f32 %v5374_v34  ;;  %v5462_v41 = vmul.f32 0.70710677, %v5439_v11  ;;  %v2293_v30 = vadd.f32 %v3738_v53, %v2292_v1  ;;  %vm5509_vm15 = vmor %vm2084_vm11, %vm2085_vm8 }
 0x2e6   : > { %v2494_v19 = vadd.f32 1.0, %v2486_v36  ;;  %v1900_v25 = vmul.f32 %v1898_v23, %v5409_v4  ;;  %v2157_v3 = vsel %vm5454_vm10, %v5291_v40, %v2153_v58  ;;  %vm2296_vm13 = vmor %vm2294_vm12, %vm2295_vm9  ;;  %v2301_v26 = vor.u32 1.1754944e-38, %v2300_v28 }
 0x2e7   : > { %v2439_v39 = vsub.f32 0.0, %v5351_v54  ;;  %v5471_v24 = vand.u32 2147483647, %v5462_v41  ;;  %v2175_v34 = vmul.f32 %v5114_v21, %v2164_v45  ;;  %v3740_v2 = vpop.eup %3739  ;;  %v2297_v17 = vsel %vm2296_vm13, %v3738_v53, %v2293_v30 }
 0x2e8   : > { %v2502_v37 = vmul.f32 %v2494_v19, %v5261_v6  ;;  %v1902_v8 = vadd.f32 -0.28449672, %v1900_v25  ;;  %v5477_v6 = vsel %vm2207_vm7, 1.0, %v6346_v44  ;;  %vm2299_vm14 = vcmp.eq.f32.partialorder %v2298_v46, 8.507059e+37 }
 0x2e9   : > { %v3742_v40 = vpop.eup %3741  ;;  %v5479_v58 = vsel %vm2299_vm14, %v2301_v26, %v2297_v17  ;;  %v2233_v51 = vmul.f32 0.3275911, %v5471_v24  ;;  %v5483_v57 = vadd.f32 %v5128_v52, %v2175_v34  ;;  %v2165_v36 = vmul.f32 %v2157_v3, %v2069_v60 }
 0x2ea   : > { %2627 = vmatmul.f32.vlgmr.msra.gmra.mxu2 %v2502_v37  ;;  %v5488_v55 = vmul.f32 0.5, %v2090_v63  ;;  %v1904_v16 = vmul.f32 %v1902_v8, %v5409_v4  ;;  %v2367_v15 = vmul.f32 1.0614054, %v5479_v58  ;;  %v2305_v53 = vmul.f32 %v3742_v40, %v5436_v18 }
 0x2eb   : > { %v2083_v46 = vmul.f32 %v5361_v33, %v2082_v5  ;;  %v2447_v28 = vmul.f32 %v2439_v39, %v5351_v54  ;;  %v5495_v45 = vadd.f32 1.0, %v2233_v51  ;;  %v5498_v19 = vmul.f32 0.70710677, %v5483_v57 }
 0x2ec   : > { %v1906_v23 = vadd.f32 0.2548296, %v1904_v16  ;;  %v2375_v10 = vadd.f32 -1.4531521, %v2367_v15  ;;  %v2306_v31 = vsub.f32 1.0, %v2305_v53  ;;  %v2440_v60 = vsub.f32 0.0, %v5412_v22 }
 0x2ed   : > { %v2313_v1 = vand.u32 2147483647, %v5436_v18  ;;  %v2315_v0 = vand.u32 2147483648, %v5436_v18  ;;  %3743 = vrcp.f32 %v5495_v45  ;;  %v2176_v5 = vmul.f32 %v5114_v21, %v2165_v36 }
 0x2ee   : > { %v1908_v63 = vmul.f32 %v1906_v23, %v5409_v4  ;;  %v2383_v37 = vmul.f32 %v2375_v10, %v5479_v58  ;;  %v2307_v25 = vmul.f32 %v3742_v40, %v2306_v31  ;;  %vm2310_vm0 = vweird.f32 %v3742_v40 }
 0x2ef   : > { %v2087_v30 = vsel %vm5509_vm15, %v5361_v33, %v2083_v46  ;;  %v2092_v3 = vsub.f32 1.5, %v5488_v55  ;;  %v2458_v26 = vmul.f32 1.442695, %v2447_v28  ;;  %v5520_v39 = vand.u32 2147483647, %v5498_v19 }
 0x2f0   : > { %v1918_v42 = vmul.f32 %v3740_v2, %v1908_v63  ;;  %v2391_v34 = vadd.f32 1.4214138, %v2383_v37  ;;  %v2308_v8 = vadd.f32 %v3742_v40, %v2307_v25  ;;  %vm2309_vm1 = vweird.f32 %v5436_v18 }
 0x2f1   : > { %vm2311_vm2 = vmor %vm2309_vm1, %vm2310_vm0  ;;  %v2316_v4 = vor.u32 1.1754944e-38, %v2315_v0  ;;  %v2448_v17 = vmul.f32 %v2440_v60, %v5412_v22  ;;  %v2234_v51 = vmul.f32 0.3275911, %v5520_v39  ;;  %v5526_v36 = vadd.f32 %v5128_v52, %v2176_v5 }
 0x2f2   : > { %v1920_v33 = vsub.f32 1.0, %v1918_v42  ;;  %v2399_v55 = vmul.f32 %v2391_v34, %v5479_v58  ;;  %v2312_v16 = vsel %vm2311_vm2, %v3742_v40, %v2308_v8  ;;  %vm2314_vm3 = vcmp.eq.f32.partialorder %v2313_v1, 8.507059e+37 }
 0x2f3   : > { %v3744_v15 = vpop.eup %3743  ;;  %v2158_v2 = vmul.f32 %v2087_v30, %v2062_v56  ;;  %vm2095_vm4 = vweird.f32 %v5396_v50  ;;  %3745 = vpow2.f32 %v2458_v26  ;;  %v5533_v18 = vsel %vm2314_vm3, %v2316_v4, %v2312_v16 }
 0x2f4   : > { %v5535_v22 = vadd.f32 1.0, %v2234_v51  ;;  %v1922_v53 = vmul.f32 %v1920_v33, %v5391_v32  ;;  %v2407_v46 = vadd.f32 -0.28449672, %v2399_v55  ;;  %v2368_v28 = vmul.f32 1.0614054, %v5533_v18 }
 0x2f5   : > { %v2320_v40 = vmul.f32 %v3744_v15, %v5495_v45  ;;  %vm2094_vm5 = vweird.f32 %v5343_v62  ;;  %v2460_v23 = vmul.f32 1.442695, %v2448_v17  ;;  %v2441_v59 = vsub.f32 0.0, %v5471_v24 }
 0x2f6   : > { %3747 = vrcp.f32 %v5535_v22  ;;  %v5544_v38 = vmul.f32 0.70710677, %v5526_v36  ;;  %v1924_v56 = vadd.f32 1.0, %v1922_v53  ;;  %v2415_v10 = vmul.f32 %v2407_v46, %v5479_v58  ;;  %vm5576_vm10 = vmor %vm2094_vm5, %vm2095_vm4 }
 0x2f7   : > { %v2376_v31 = vadd.f32 -1.4531521, %v2368_v28  ;;  %v2321_v32 = vsub.f32 1.0, %v2320_v40  ;;  %vm2325_vm6 = vweird.f32 %v3744_v15  ;;  %v2328_v60 = vand.u32 2147483647, %v5495_v45 }
 0x2f8   : > { %v2330_v1 = vand.u32 2147483648, %v5495_v45  ;;  %v2169_v0 = vmul.f32 %v5114_v21, %v2158_v2  ;;  %v1926_v5 = vmul.f32 %v1924_v56, %v5347_v29  ;;  %v2423_v54 = vadd.f32 0.2548296, %v2415_v10 }
 0x2f9   : > { %v2384_v63 = vmul.f32 %v2376_v31, %v5533_v18  ;;  %v2322_v37 = vmul.f32 %v3744_v15, %v2321_v32  ;;  %v3746_v25 = vpop.eup %3745  ;;  %v2093_v30 = vmul.f32 %v5396_v50, %v2092_v3  ;;  %3749 = vpow2.f32 %v2460_v23 }
 0x2fa   : > { %v2449_v26 = vmul.f32 %v2441_v59, %v5471_v24  ;;  %v5555_v42 = vand.u32 2147483647, %v5544_v38  ;;  %2547 = vmatmul.f32.gmra.mxu1 %v1926_v5  ;;  %v2431_v34 = vmul.f32 %v2423_v54, %v5479_v58  ;;  %vm2324_vm7 = vweird.f32 %v5495_v45 }
 0x2fb   : > { %v2392_v8 = vadd.f32 1.4214138, %v2384_v63  ;;  %v2323_v4 = vadd.f32 %v3744_v15, %v2322_v37  ;;  %vm2326_vm8 = vmor %vm2324_vm7, %vm2325_vm6  ;;  %vm2329_vm9 = vcmp.eq.f32.partialorder %v2328_v60, 8.507059e+37  ;;  %v2331_v17 = vor.u32 1.1754944e-38, %v2330_v1 }
 0x2fc   : > { %v3748_v29 = vpop.eup %3747  ;;  %v2235_v3 = vmul.f32 0.3275911, %v5555_v42  ;;  %v5562_v51 = vadd.f32 %v5128_v52, %v2169_v0  ;;  %v2471_v24 = vmul.f32 %v3746_v25, %v2431_v34  ;;  %v2343_v45 = vand.u32 2147483647, %v5535_v22 }
 0x2fd   : > { %v2400_v33 = vmul.f32 %v2392_v8, %v5533_v18  ;;  %v2327_v55 = vsel %vm2326_vm8, %v3744_v15, %v2323_v4  ;;  %v2335_v58 = vmul.f32 %v3748_v29, %v5535_v22  ;;  %v2345_v2 = vand.u32 2147483648, %v5535_v22 }
 0x2fe   : > { %v5566_v16 = vsel %vm2329_vm9, %v2331_v17, %v2327_v55  ;;  %v5570_v53 = vadd.f32 1.0, %v2235_v3  ;;  %v2479_v28 = vsub.f32 1.0, %v2471_v24  ;;  %vm2340_vm11 = vweird.f32 %v3748_v29 }
 0x2ff   : > { %v2408_v15 = vadd.f32 -0.28449672, %v2400_v33  ;;  %v2369_v40 = vmul.f32 1.0614054, %v5566_v16  ;;  %v2336_v23 = vsub.f32 1.0, %v2335_v58  ;;  %v3750_v59 = vpop.eup %3749  ;;  %v2097_v62 = vsel %vm5576_vm10, %v5396_v50, %v2093_v30 }
 0x300   : > { %3751 = vrcp.f32 %v5570_v53  ;;  %v5583_v56 = vmul.f32 0.70710677, %v5562_v51  ;;  %v2487_v10 = vmul.f32 %v2479_v28, %v5477_v6  ;;  %vm2208_vm12 = vcmp.ge.f32.partialorder %v5399_v14, 0.0 }
 0x301   : > { %v2416_v31 = vmul.f32 %v2408_v15, %v5533_v18  ;;  %v2377_v32 = vadd.f32 -1.4531521, %v2369_v40  ;;  %v2337_v60 = vmul.f32 %v3748_v29, %v2336_v23  ;;  %v2462_v1 = vmul.f32 1.442695, %v2449_v26 }
 0x302   : > { %vm2339_vm13 = vweird.f32 %v5535_v22  ;;  %v2442_v0 = vsub.f32 0.0, %v5520_v39  ;;  %v2495_v5 = vadd.f32 1.0, %v2487_v10  ;;  %vm2344_vm15 = vcmp.eq.f32.partialorder %v2343_v45, 8.507059e+37  ;;  %v5627_v10 = vpop.f32.mrf.mxu1 }
 0x303   : > { %v2424_v54 = vadd.f32 0.2548296, %v2416_v31  ;;  %v2385_v63 = vmul.f32 %v2377_v32, %v5566_v16  ;;  %v2338_v37 = vadd.f32 %v3748_v29, %v2337_v60  ;;  %vm2341_vm14 = vmor %vm2339_vm13, %vm2340_vm11  ;;  %v2346_v50 = vor.u32 1.1754944e-38, %v2345_v2 }
 0x304   : > { %v5596_v6 = vand.u32 2147483647, %v5583_v56  ;;  %v6359_v25 = vsub.f32 %v4845_v48, %v5272_v12  ;;  %v2503_v22 = vmul.f32 %v2495_v5, %v5426_v20  ;;  %v2216_v17 = vsel %vm2208_vm12, 1.0, %v6346_v44 }
 0x305   : > { %v2432_v26 = vmul.f32 %v2424_v54, %v5533_v18  ;;  %v2393_v34 = vadd.f32 1.4214138, %v2385_v63  ;;  %v2342_v8 = vsel %vm2341_vm14, %v3748_v29, %v2338_v37  ;;  %3753 = vpow2.f32 %v2462_v1 }
 0x306   : > { %v2159_v30 = vmul.f32 %v2097_v62, %v6359_v25  ;;  %v3752_v4 = vpop.eup %3751  ;;  %v5606_v3 = vsel %vm2344_vm15, %v2346_v50, %v2342_v8  ;;  %v2228_v24 = vmul.f32 0.3275911, %v5596_v6  ;;  %2630 = vmatmul.f32.gmra.mxu2 %v2503_v22  ;;  %v2450_v29 = vmul.f32 %v2442_v0, %v5520_v39 }
 0x307   : > { %v2472_v48 = vmul.f32 %v3750_v59, %v2432_v26  ;;  %v2401_v12 = vmul.f32 %v2393_v34, %v5566_v16  ;;  %v2370_v20 = vmul.f32 1.0614054, %v5606_v3  ;;  %v2350_v18 = vmul.f32 %v3752_v4, %v5570_v53 }
 0x308   : > { %v2170_v33 = vmul.f32 %v5114_v21, %v2159_v30  ;;  %v2358_v14 = vand.u32 2147483647, %v5570_v53  ;;  %v5615_v55 = vadd.f32 1.0, %v2228_v24  ;;  %vm2355_vm0 = vweird.f32 %v3752_v4 }
 0x309   : > { %v2480_v58 = vsub.f32 1.0, %v2472_v48  ;;  %v2409_v45 = vadd.f32 -0.28449672, %v2401_v12  ;;  %v2378_v2 = vadd.f32 -1.4531521, %v2370_v20  ;;  %v2351_v46 = vsub.f32 1.0, %v2350_v18 }
 0x30a   : > { %v2360_v21 = vand.u32 2147483648, %v5570_v53  ;;  %3755 = vrcp.f32 %v5615_v55  ;;  %v5620_v28 = vadd.f32 %v5128_v52, %v2170_v33  ;;  %v2192_v59 = vmul.f32 0.5, %v5377_v47 }
 0x30b   : > { %v2488_v15 = vmul.f32 %v2480_v58, %v2216_v17  ;;  %v2417_v40 = vmul.f32 %v2409_v45, %v5566_v16  ;;  %v2386_v39 = vmul.f32 %v2378_v2, %v5606_v3  ;;  %v2352_v23 = vmul.f32 %v3752_v4, %v2351_v46  ;;  %v3754_v1 = vpop.eup %3753  ;;  %v5657_v2 = vpop.f32.mrf.mxu1 }
 0x30c   : > { %vm2209_vm1 = vcmp.ge.f32.partialorder %v5462_v41, 0.0  ;;  %v2464_v62 = vmul.f32 1.442695, %v2450_v29  ;;  %vm2354_vm2 = vweird.f32 %v5570_v53  ;;  %vm2359_vm4 = vcmp.eq.f32.partialorder %v2358_v14, 8.507059e+37 }
 0x30d   : > { %v2496_v31 = vadd.f32 1.0, %v2488_v15  ;;  %v2425_v32 = vadd.f32 0.2548296, %v2417_v40  ;;  %v2394_v60 = vadd.f32 1.4214138, %v2386_v39  ;;  %v2353_v52 = vadd.f32 %v3752_v4, %v2352_v23  ;;  %vm2356_vm3 = vmor %vm2354_vm2, %vm2355_vm0 }
 0x30e   : > { %v2361_v0 = vor.u32 1.1754944e-38, %v2360_v21  ;;  %v2443_v5 = vsub.f32 0.0, %v5555_v42  ;;  %v5632_v47 = vmul.f32 0.70710677, %v5620_v28  ;;  %3757 = vpow2.f32 %v2464_v62 }
 0x30f   : > { %v2504_v54 = vmul.f32 %v2496_v31, %v2192_v59  ;;  %v2433_v63 = vmul.f32 %v2425_v32, %v5566_v16  ;;  %v2402_v53 = vmul.f32 %v2394_v60, %v5606_v3  ;;  %v2357_v37 = vsel %vm2356_vm3, %v3752_v4, %v2353_v52 }
 0x310   : > { %v3756_v50 = vpop.eup %3755  ;;  %v5636_v25 = vsel %vm2359_vm4, %v2361_v0, %v2357_v37  ;;  %v5639_v30 = vand.u32 2147483647, %v5632_v47  ;;  %v2217_v16 = vsel %vm2209_vm1, 1.0, %v6346_v44  ;;  %v2451_v4 = vmul.f32 %v2443_v5, %v5555_v42 }
 0x311   : > { %2633 = vmatmul.f32.gmra.mxu2 %v2504_v54  ;;  %v2473_v22 = vmul.f32 %v3754_v1, %v2433_v63  ;;  %v2410_v26 = vadd.f32 -0.28449672, %v2402_v53  ;;  %v2371_v34 = vmul.f32 1.0614054, %v5636_v25  ;;  %v2245_v8 = vmul.f32 %v3756_v50, %v5615_v55 }
 0x312   : > { %v2229_v17 = vmul.f32 0.3275911, %v5639_v30  ;;  %vm2250_vm5 = vweird.f32 %v3756_v50  ;;  %v2253_v20 = vand.u32 2147483647, %v5615_v55  ;;  %v2255_v18 = vand.u32 2147483648, %v5615_v55 }
 0x313   : > { %v2481_v24 = vsub.f32 1.0, %v2473_v22  ;;  %v2418_v33 = vmul.f32 %v2410_v26, %v5606_v3  ;;  %v2379_v48 = vadd.f32 -1.4531521, %v2371_v34  ;;  %v2246_v12 = vsub.f32 1.0, %v2245_v8 }
 0x314   : > { %v5651_v29 = vadd.f32 1.0, %v2229_v17  ;;  %v2193_v42 = vmul.f32 0.5, %v5439_v11  ;;  %vm2249_vm6 = vweird.f32 %v5615_v55  ;;  %v3758_v39 = vpop.eup %3757  ;;  %vm2210_vm7 = vcmp.ge.f32.partialorder %v5498_v19, 0.0  ;;  %v5673_v17 = vpop.f32.mrf.mxu1 }
 0x315   : > { %v2489_v14 = vmul.f32 %v2481_v24, %v2217_v16  ;;  %v2426_v41 = vadd.f32 0.2548296, %v2418_v33  ;;  %v2387_v58 = vmul.f32 %v2379_v48, %v5636_v25  ;;  %v2247_v45 = vmul.f32 %v3756_v50, %v2246_v12  ;;  %vm2251_vm8 = vmor %vm2249_vm6, %vm2250_vm5 }
 0x316   : > { %3759 = vrcp.f32 %v5651_v29  ;;  %v2466_v23 = vmul.f32 1.442695, %v2451_v4  ;;  %vm2254_vm9 = vcmp.eq.f32.partialorder %v2253_v20, 8.507059e+37  ;;  %v2256_v59 = vor.u32 1.1754944e-38, %v2255_v18 }
 0x317   : > { %v2497_v46 = vadd.f32 1.0, %v2489_v14  ;;  %v2434_v21 = vmul.f32 %v2426_v41, %v5606_v3  ;;  %v2395_v15 = vadd.f32 1.4214138, %v2387_v58  ;;  %v2248_v40 = vadd.f32 %v3756_v50, %v2247_v45 }
 0x318   : > { %v2436_v60 = vsub.f32 0.0, %v5596_v6  ;;  %v2218_v5 = vsel %vm2210_vm7, 1.0, %v6346_v44  ;;  %3761 = vpow2.f32 %v2466_v23  ;;  %v2268_v4 = vand.u32 2147483647, %v5651_v29 }
 0x319   : > { %v2505_v11 = vmul.f32 %v2497_v46, %v2193_v42  ;;  %v2474_v62 = vmul.f32 %v3758_v39, %v2434_v21  ;;  %v2403_v55 = vmul.f32 %v2395_v15, %v5636_v25  ;;  %v2252_v31 = vsel %vm2251_vm8, %v3756_v50, %v2248_v40 }
 0x31a   : > { %v2257_v32 = vsel %vm2254_vm9, %v2256_v59, %v2252_v31  ;;  %v2194_v50 = vmul.f32 0.5, %v5483_v57  ;;  %v2444_v22 = vmul.f32 %v2436_v60, %v5596_v6  ;;  %v2270_v19 = vand.u32 2147483648, %v5651_v29 }
 0x31b   : > { %2636 = vmatmul.f32.gmra.mxu2 %v2505_v11  ;;  %v2482_v3 = vsub.f32 1.0, %v2474_v62  ;;  %v2411_v52 = vadd.f32 -0.28449672, %v2403_v55  ;;  %v2364_v1 = vmul.f32 1.0614054, %v2257_v32  ;;  %vm2211_vm11 = vcmp.ge.f32.partialorder %v5544_v38, 0.0 }
 0x31c   : > { %v3760_v0 = vpop.eup %3759  ;;  %v2452_v57 = vmul.f32 1.442695, %v2444_v22  ;;  %vm2264_vm12 = vweird.f32 %v5651_v29  ;;  %v2271_v41 = vor.u32 1.1754944e-38, %v2270_v19  ;;  %vm2269_vm14 = vcmp.eq.f32.partialorder %v2268_v4, 8.507059e+37  ;;  %v5683_v62 = vpop.f32.mrf.mxu1 }
 0x31d   : > { %v2490_v54 = vmul.f32 %v2482_v3, %v2218_v5  ;;  %v2419_v63 = vmul.f32 %v2411_v52, %v5636_v25  ;;  %v2372_v53 = vadd.f32 -1.4531521, %v2364_v1  ;;  %v2260_v37 = vmul.f32 %v3760_v0, %v5651_v29 }
 0x31e   : > { %vm2265_vm10 = vweird.f32 %v3760_v0  ;;  %v3762_v20 = vpop.eup %3761  ;;  %3763 = vpow2.f32 %v2452_v57  ;;  %v2437_v38 = vsub.f32 0.0, %v5639_v30  ;;  %v2195_v39 = vmul.f32 0.5, %v5526_v36 }
 0x31f   : > { %v2498_v26 = vadd.f32 1.0, %v2490_v54  ;;  %v2427_v34 = vadd.f32 0.2548296, %v2419_v63  ;;  %v2380_v8 = vmul.f32 %v2372_v53, %v2257_v32  ;;  %v2261_v16 = vsub.f32 1.0, %v2260_v37  ;;  %vm2266_vm13 = vmor %vm2264_vm12, %vm2265_vm10 }
 0x320   : > { %v2445_v11 = vmul.f32 %v2437_v38, %v5639_v30  ;;  %vm2204_vm15 = vcmp.ge.f32.partialorder %v5583_v56, 0.0  ;;  %v2188_v30 = vmul.f32 0.5, %v5562_v51  ;;  %vm2205_vm0 = vcmp.ge.f32.partialorder %v5632_v47, 0.0  ;;  %v5702_v47 = vld [vmem:[%s6266_s16] ss:$0 sm:$0xff] }
 0x321   : > { %v2506_v24 = vmul.f32 %v2498_v26, %v2194_v50  ;;  %v2435_v33 = vmul.f32 %v2427_v34, %v5636_v25  ;;  %v2388_v48 = vadd.f32 1.4214138, %v2380_v8  ;;  %v2262_v12 = vmul.f32 %v3760_v0, %v2261_v16 }
 0x322   : > { %v2219_v25 = vsel %vm2211_vm11, 1.0, %v6346_v44  ;;  %v2212_v36 = vsel %vm2204_vm15, 1.0, %v6346_v44  ;;  %v2213_v4 = vsel %vm2205_vm0, 1.0, %v6346_v44  ;;  %v2189_v51 = vmul.f32 0.5, %v5620_v28 }
 0x323   : > { %2639 = vmatmul.f32.gmra.mxu2 %v2506_v24  ;;  %v2475_v6 = vmul.f32 %v3762_v20, %v2435_v33  ;;  %v2396_v18 = vmul.f32 %v2388_v48, %v2257_v32  ;;  %v2263_v14 = vadd.f32 %v3760_v0, %v2262_v12  ;;  %vm2844_vm9 = vcmask 523264  }
 0x324   : > { %v3764_v3 = vpop.eup %3763 }
 0x325   : > { %v2483_v58 = vsub.f32 1.0, %v2475_v6  ;;  %v2404_v45 = vadd.f32 -0.28449672, %v2396_v18  ;;  %v2267_v42 = vsel %vm2266_vm13, %v3760_v0, %v2263_v14  ;;  %v2454_v0 = vmul.f32 1.442695, %v2445_v11 }
 0x326   : > { %v2272_v46 = vsel %vm2269_vm14, %v2271_v41, %v2267_v42 }
 0x327   : > { %v2491_v21 = vmul.f32 %v2483_v58, %v2219_v25  ;;  %v2412_v15 = vmul.f32 %v2404_v45, %v2257_v32  ;;  %v2365_v40 = vmul.f32 1.0614054, %v2272_v46  ;;  %3765 = vpow2.f32 %v2454_v0 }
 0x329   : > { %v2499_v23 = vadd.f32 1.0, %v2491_v21  ;;  %v2420_v29 = vadd.f32 0.2548296, %v2412_v15  ;;  %v2373_v59 = vadd.f32 -1.4531521, %v2365_v40 }
 0x32b   : > { %v2507_v55 = vmul.f32 %v2499_v23, %v2195_v39  ;;  %v2428_v31 = vmul.f32 %v2420_v29, %v2257_v32  ;;  %v2381_v60 = vmul.f32 %v2373_v59, %v2272_v46  ;;  %v5688_v32 = vpop.f32.mrf.mxu1 }
 0x32d   : > { %2642 = vmatmul.f32.gmra.mxu2 %v2507_v55  ;;  %v2468_v52 = vmul.f32 %v3764_v3, %v2428_v31  ;;  %v2389_v1 = vadd.f32 1.4214138, %v2381_v60  ;;  %v3766_v34 = vpop.eup %3765 }
 0x32f   : > { %v2476_v5 = vsub.f32 1.0, %v2468_v52  ;;  %v2397_v54 = vmul.f32 %v2389_v1, %v2272_v46 }
 0x331   : > { %v2484_v63 = vmul.f32 %v2476_v5, %v2212_v36  ;;  %v2405_v53 = vadd.f32 -0.28449672, %v2397_v54  ;;  %v2591_v54 = vld [vmem:[%s6267_s17] sm:$0x3] }
 0x333   : > { %v2492_v37 = vadd.f32 1.0, %v2484_v63  ;;  %v2413_v50 = vmul.f32 %v2405_v53, %v2272_v46  ;;  %v5692_v24 = vpop.f32.mrf.mxu1 }
 0x335   : > { %v2500_v22 = vmul.f32 %v2492_v37, %v2188_v30  ;;  %v2421_v26 = vadd.f32 0.2548296, %v2413_v50  ;;  %v2599_v50 = vperm.slane %v2591_v54, 1 }
 0x337   : > { %2621 = vmatmul.f32.vlgmr.msra.gmra.mxu0 %v2500_v22  ;;  %v2429_v56 = vmul.f32 %v2421_v26, %v2272_v46  ;;  %v2592_v26 = vld [vmem:[%s6268_s18] sm:$0x3] }
 0x339   : > { %v2469_v8 = vmul.f32 %v3766_v34, %v2429_v56 }
 0x33b   : > { %v2477_v16 = vsub.f32 1.0, %v2469_v8  ;;  %v5695_v12 = vpop.f32.mrf.mxu1 }
 0x33d   : > { %v2485_v19 = vmul.f32 %v2477_v16, %v2213_v4  ;;  %v2593_v16 = vperm.slane %v2591_v54, 0 }
 0x33f   : > { %v2493_v33 = vadd.f32 1.0, %v2485_v19  ;;  %v2596_v19 = vperm.slane %v2592_v26, 0 }
 0x341   : > { %v2501_v48 = vmul.f32 %v2493_v33, %v2189_v51 }
 0x343   : > { %2624 = vmatmul.f32.gmra.mxu0 %v2501_v48  ;;  %v5697_v20 = vpop.f32.mrf.mxu1 }
 0x358   : > { %v2545_v57 = vpop.f32.mrf.mxu1 }
 0x359   : > { %v2546_v44 = vadd.f32 %v5702_v47, %v2545_v57  ;;  %v2602_v57 = vperm.slane %v2592_v26, 1 }
 0x35b   : > { %v2551_v6 = vsub.f32 0.0, %v2546_v44 }
 0x35d   : > { %v2553_v18 = vmul.f32 1.442695, %v2551_v6 }
 0x35f   : > { %3767 = vpow2.f32 %v2553_v18 }
 0x365   : > { %v3768_v14 = vpop.eup %3767 }
 0x366   : > { %v2557_v28 = vadd.f32 1.0, %v3768_v14 }
 0x368   : > { %3769 = vrcp.f32 %v2557_v28  ;;  %v2570_v59 = vand.u32 2147483648, %v2557_v28  ;;  %vm2564_vm2 = vweird.f32 %v2557_v28  ;;  %v2568_v55 = vand.u32 2147483647, %v2557_v28 }
 0x36a   : > { %v2571_v3 = vor.u32 1.1754944e-38, %v2570_v59  ;;  %vm2569_vm4 = vcmp.eq.f32.partialorder %v2568_v55, 8.507059e+37 }
 0x36d   : > { %v2628_v38 = vpop.f32.mrf.mxu2 }
 0x36e   : > { %v3770_v42 = vpop.eup %3769  ;;  %v5707_v0 = vadd.f32 %v5702_v47, %v2628_v38 }
 0x36f   : > { %v2560_v46 = vmul.f32 %v3770_v42, %v2557_v28  ;;  %vm2565_vm1 = vweird.f32 %v3770_v42 }
 0x370   : > { %vm2566_vm3 = vmor %vm2564_vm2, %vm2565_vm1  ;;  %v2648_v34 = vsub.f32 0.0, %v5707_v0 }
 0x371   : > { %v2561_v21 = vsub.f32 1.0, %v2560_v46 }
 0x373   : > { %v2562_v39 = vmul.f32 %v3770_v42, %v2561_v21 }
 0x375   : > { %v2563_v29 = vadd.f32 %v3770_v42, %v2562_v39 }
 0x377   : > { %v2548_v41 = vpop.f32.mrf.mxu1  ;;  %v2567_v60 = vsel %vm2566_vm3, %v3770_v42, %v2563_v29 }
 0x378   : > { %v2549_v58 = vadd.f32 %v5702_v47, %v2548_v41  ;;  %v2572_v5 = vsel %vm2569_vm4, %v2571_v3, %v2567_v60 }
 0x379   : > { %v2589_v37 = vmul.f32 %v2572_v5, %v2546_v44  ;;  %v2658_v44 = vmul.f32 1.442695, %v2648_v34 }
 0x37a   : > { %v2552_v45 = vsub.f32 0.0, %v2549_v58 }
 0x37b   : > { %v2600_v51 = vmul.f32 %v2599_v50, %v2589_v37  ;;  %v2594_v18 = vmul.f32 %v2593_v16, %v2589_v37 }
 0x37c   : > { %v2555_v25 = vmul.f32 1.442695, %v2552_v45 }
 0x37d   : > { %v2603_v42 = vadd.f32 %v2602_v57, %v2600_v51  ;;  %v2597_v46 = vadd.f32 %v2596_v19, %v2594_v18  ;;  %v5787_v18 = vld [vmem:[%s6360_s26] sm:$0x3]  ;;  %s6380_s26 = sld [smem:[#allocation34_spill]] }
 0x37e   : > { %3771 = vpow2.f32 %v2555_v25 }
 0x383   : > { %s3337_s4 = scalar_lea.hbm %s6380_s26, %s3507_s3 }
 0x384   : > { %v3772_v15 = vpop.eup %3771  ;;  %s3340_s2 = sshll.u32 %s3337_s4, 4  ;;  %s3341_s2 = int_to_ptr.hbm [resolvable:$true] %s3340_s2 }
 0x385   : > { %v2558_v40 = vadd.f32 1.0, %v3772_v15  ;;  %s3982_s5 = sshra.s32 %s3341_s2, 4  ;;  %s3983_s5 = int_to_ptr.hbm [resolvable:$true] %s3982_s5 }
 0x386   : > { %s3984_s19 = scalar_lea.hbm %s3983_s5, 64  ;;  %p3989_p3 = scmp.lt.s32.totalorder %s3983_s5, %s6380_s26 }
 0x387   : > { %3773 = vrcp.f32 %v2558_v40  ;;  %v2585_v1 = vand.u32 2147483648, %v2558_v40  ;;  %v2583_v63 = vand.u32 2147483647, %v2558_v40  ;;  %vm2579_vm6 = vweird.f32 %v2558_v40  ;;  %p3985_p0 = scmp.ne.s32.totalorder %s3983_s5, %s3984_s19 }
 0x388   : > { %3775 = vpow2.f32 %v2658_v44 }
 0x389   : > { %v2631_v23 = vpop.f32.mrf.mxu2  ;;  %v2586_v22 = vor.u32 1.1754944e-38, %v2585_v1  ;;  %vm2584_vm8 = vcmp.eq.f32.partialorder %v2583_v63, 8.507059e+37  ;;  %p3986_p1 = pnand %p3985_p0, %p4215_p5 }
 0x38a   : > { %v5720_v41 = vadd.f32 %v5702_v47, %v2631_v23 }
 0x38b   : > { %p3987_p2 = pneg %p3986_p1 }
 0x38c   : > { %v2649_v21 = vsub.f32 0.0, %v5720_v41 }
 0x38d   : > { %v3774_v11 = vpop.eup %3773 }
 0x38e   : > { %v2575_v31 = vmul.f32 %v3774_v11, %v2558_v40  ;;  %vm2580_vm5 = vweird.f32 %v3774_v11  ;;  %v3776_v39 = vpop.eup %3775  ;;  %v2660_v23 = vmul.f32 1.442695, %v2649_v21 }
 0x38f   : > { %vm2581_vm7 = vmor %vm2579_vm6, %vm2580_vm5 }
 0x390   : > { %v2576_v52 = vsub.f32 1.0, %v2575_v31 }
 0x392   : > { %v2577_v36 = vmul.f32 %v3774_v11, %v2576_v52 }
 0x394   : > { %v2634_v53 = vpop.f32.mrf.mxu2  ;;  %v2578_v30 = vadd.f32 %v3774_v11, %v2577_v36 }
 0x395   : > { %v5717_v6 = vadd.f32 %v5702_v47, %v2634_v53 }
 0x396   : > { %v2582_v56 = vsel %vm2581_vm7, %v3774_v11, %v2578_v30  ;;  %v5735_v11 = vadd.f32 1.0, %v3776_v39  ;;  %v5805_v39 = vperm.slane %v5787_v18, 0 }
 0x397   : > { %v2587_v8 = vsel %vm2584_vm8, %v2586_v22, %v2582_v56  ;;  %v2650_v25 = vsub.f32 0.0, %v5717_v6 }
 0x398   : > { %v2590_v4 = vmul.f32 %v2587_v8, %v2549_v58  ;;  %vm2713_vm11 = vweird.f32 %v5735_v11 }
 0x399   : > { %v2662_v40 = vmul.f32 1.442695, %v2650_v25  ;;  %v2719_v25 = vand.u32 2147483648, %v5735_v11 }
 0x39a   : > { %v2595_v33 = vmul.f32 %v2593_v16, %v2590_v4  ;;  %v2601_v48 = vmul.f32 %v2599_v50, %v2590_v4 }
 0x39c   : > { %v2598_v14 = vadd.f32 %v2596_v19, %v2595_v33  ;;  %v2604_v28 = vadd.f32 %v2602_v57, %v2601_v48 }
 0x39e   : > { %v2637_v45 = vpop.f32.mrf.mxu2  ;;  %3459 = vmatpush.xpose.msk.msra.mxu3 %vm2844_vm9, %v2598_v14  ;;  %2979 = vmatpush.msrb.mxu1 %v2604_v28 }
 0x39f   : > { %v5723_v58 = vadd.f32 %v5702_v47, %v2637_v45 }
 0x3a0   : > { %2980 = vmatpush.msrb.mxu1 %v2603_v42 }
 0x3a1   : > { %v2651_v38 = vsub.f32 0.0, %v5723_v58 }
 0x3a2   : > { %3460 = vmatpush.xpose.msk.msra.mxu3 %vm2844_vm9, %v2597_v46 }
 0x3a3   : > { %v2664_v15 = vmul.f32 1.442695, %v2651_v38 }
 0x3a5   : > { %3461 = vmatmul.msk.f32.vlgmr.msra.gmra.mxu3 %vm2844_vm9, %v4930_v49  ;;  %3777 = vpow2.f32 %v2664_v15 }
 0x3a6   : > { %v2640_v29 = vpop.f32.mrf.mxu2  ;;  %3779 = vpow2.f32 %v2662_v40 }
 0x3a7   : > { %v5733_v59 = vadd.f32 %v5702_v47, %v2640_v29  ;;  %3781 = vpow2.f32 %v2660_v23 }
 0x3a8   : > { %3783 = vrcp.f32 %v5735_v11 }
 0x3a9   : > { %v2652_v55 = vsub.f32 0.0, %v5733_v59 }
 0x3ab   : > { %v2666_v31 = vmul.f32 1.442695, %v2652_v55  ;;  %v3778_v60 = vpop.eup %3777 }
 0x3ac   : > { %v3780_v3 = vpop.eup %3779  ;;  %v5741_v52 = vadd.f32 1.0, %v3778_v60  ;;  %v5818_v60 = vor.u32 1.1754944e-38, %v2719_v25 }
 0x3ad   : > { %3785 = vpow2.f32 %v2666_v31  ;;  %3462 = vmatmul.msk.f32.gmra.mxu3 %vm2844_vm9, %v4956_v61  ;;  %v3782_v49 = vpop.eup %3781  ;;  %v5743_v5 = vadd.f32 1.0, %v3780_v3 }
 0x3ae   : > { %v5748_v36 = vpop.eup %3783  ;;  %v5750_v53 = vadd.f32 1.0, %v3782_v49  ;;  %3787 = vrcp.f32 %v5741_v52  ;;  %vm2758_vm5 = vweird.f32 %v5741_v52 }
 0x3af   : > { %3789 = vrcp.f32 %v5743_v5  ;;  %v2709_v22 = vmul.f32 %v5748_v36, %v5735_v11  ;;  %vm2714_vm10 = vweird.f32 %v5748_v36  ;;  %vm2743_vm15 = vweird.f32 %v5743_v5 }
 0x3b0   : > { %v2643_v1 = vpop.f32.mrf.mxu2  ;;  %v2734_v21 = vand.u32 2147483648, %v5750_v53  ;;  %vm5813_vm12 = vmor %vm2713_vm11, %vm2714_vm10  ;;  %vm2728_vm14 = vweird.f32 %v5750_v53 }
 0x3b1   : > { %v5746_v54 = vadd.f32 %v5702_v47, %v2643_v1  ;;  %v2710_v16 = vsub.f32 1.0, %v2709_v22  ;;  %v2747_v22 = vand.u32 2147483647, %v5743_v5 }
 0x3b3   : > { %v3786_v63 = vpop.eup %3785  ;;  %v2653_v61 = vsub.f32 0.0, %v5746_v54  ;;  %v2711_v48 = vmul.f32 %v5748_v36, %v2710_v16 }
 0x3b4   : > { %v5753_v30 = vadd.f32 1.0, %v3786_v63  ;;  %v2622_v37 = vpop.f32.mrf.mxu0  ;;  %v5767_v8 = vpop.eup %3787  ;;  %v2732_v63 = vand.u32 2147483647, %v5750_v53 }
 0x3b5   : > { %v5758_v50 = vadd.f32 %v5702_v47, %v2622_v37  ;;  %3463 = vmatmul.msk.f32.gmra.mxu3 %vm2844_vm9, %v4934_v9  ;;  %v2668_v56 = vmul.f32 1.442695, %v2653_v61  ;;  %v5769_v4 = vpop.eup %3789  ;;  %v2754_v9 = vmul.f32 %v5767_v8, %v5741_v52  ;;  %v5796_v38 = vadd.f32 %v5748_v36, %v2711_v48 }
 0x3b6   : > { %3791 = vrcp.f32 %v5753_v30  ;;  %v2739_v57 = vmul.f32 %v5769_v4, %v5743_v5  ;;  %v5828_v37 = vor.u32 1.1754944e-38, %v2734_v21  ;;  %vm2759_vm1 = vweird.f32 %v5767_v8 }
 0x3b7   : > { %3793 = vrcp.f32 %v5750_v53  ;;  %v2646_v26 = vsub.f32 0.0, %v5758_v50  ;;  %v2716_v1 = vsel %vm5813_vm12, %v5748_v36, %v5796_v38  ;;  %vm2744_vm2 = vweird.f32 %v5769_v4  ;;  %vm5868_vm7 = vmor %vm2758_vm5, %vm2759_vm1 }
 0x3b8   : > { %3795 = vpow2.f32 %v2668_v56  ;;  %v2740_v23 = vsub.f32 1.0, %v2739_v57  ;;  %vm2773_vm3 = vweird.f32 %v5753_v30  ;;  %v2777_v57 = vand.u32 2147483647, %v5753_v30  ;;  %vm5883_vm8 = vmor %vm2743_vm15, %vm2744_vm2 }
 0x3b9   : > { %v2654_v34 = vmul.f32 1.442695, %v2646_v26  ;;  %vm5849_vm4 = vcmp.eq.f32.partialorder %v2732_v63, 8.507059e+37  ;;  %vm2748_vm2 = vcmp.eq.f32.partialorder %v2747_v22, 8.507059e+37 }
 0x3ba   : > { %v2741_v61 = vmul.f32 %v5769_v4, %v2740_v23  ;;  %vm2778_vm10 = vcmp.eq.f32.partialorder %v2777_v57, 8.507059e+37 }
 0x3bb   : > { %3797 = vpow2.f32 %v2654_v34  ;;  %v2764_v34 = vand.u32 2147483648, %v5741_v52 }
 0x3bc   : > { %v5771_v19 = vpop.eup %3791 }
 0x3bd   : > { %v5773_v51 = vpop.eup %3793  ;;  %v2769_v33 = vmul.f32 %v5771_v19, %v5753_v30  ;;  %3464 = vmatmul.msk.f32.gmra.mxu3 %vm2844_vm9, %v4987_v27  ;;  %v2755_v27 = vsub.f32 1.0, %v2754_v9  ;;  %vm2774_vm0 = vweird.f32 %v5771_v19 }
 0x3be   : > { %v3796_v44 = vpop.eup %3795  ;;  %v2724_v14 = vmul.f32 %v5773_v51, %v5750_v53  ;;  %vm2729_vm13 = vweird.f32 %v5773_v51  ;;  %vm5858_vm6 = vmor %vm2773_vm3, %vm2774_vm0  ;;  %v2807_v53 = vld [vmem:[%s6373_s27] sm:$0x3] }
 0x3bf   : > { %v2770_v28 = vsub.f32 1.0, %v2769_v33  ;;  %v5793_v46 = vadd.f32 1.0, %v3796_v44  ;;  %v2756_v3 = vmul.f32 %v5767_v8, %v2755_v27  ;;  %v2779_v33 = vand.u32 2147483648, %v5753_v30  ;;  %vm5897_vm15 = vmor %vm2728_vm14, %vm2729_vm13 }
 0x3c0   : > { %v2625_v45 = vpop.f32.mrf.mxu0  ;;  %v2725_v29 = vsub.f32 1.0, %v2724_v14  ;;  %v2749_v27 = vand.u32 2147483648, %v5743_v5 }
 0x3c1   : > { %v3798_v42 = vpop.eup %3797  ;;  %v5802_v40 = vadd.f32 %v5702_v47, %v2625_v45  ;;  %3799 = vrcp.f32 %v5793_v46  ;;  %v2771_v55 = vmul.f32 %v5771_v19, %v2770_v28  ;;  %v2717_v47 = vand.u32 2147483647, %v5735_v11 }
 0x3c2   : > { %v5799_v15 = vadd.f32 1.0, %v3798_v42  ;;  %v2726_v56 = vmul.f32 %v5773_v51, %v2725_v29  ;;  %v2742_v28 = vadd.f32 %v5769_v4, %v2741_v61  ;;  %v2762_v45 = vand.u32 2147483647, %v5741_v52 }
 0x3c3   : > { %v2647_v49 = vsub.f32 0.0, %v5802_v40  ;;  %v2772_v16 = vadd.f32 %v5771_v19, %v2771_v55  ;;  %v2765_v55 = vor.u32 1.1754944e-38, %v2764_v34  ;;  %vm2788_vm1 = vweird.f32 %v5793_v46 }
 0x3c4   : > { %3801 = vrcp.f32 %v5799_v15  ;;  %v2727_v25 = vadd.f32 %v5773_v51, %v2726_v56  ;;  %vm2763_vm0 = vcmp.eq.f32.partialorder %v2762_v45, 8.507059e+37  ;;  %vm2718_vm14 = vcmp.eq.f32.partialorder %v2717_v47, 8.507059e+37 }
 0x3c5   : > { %3465 = vmatmul.msk.f32.gmra.mxu3 %vm2844_vm9, %v4981_v13  ;;  %v2656_v26 = vmul.f32 1.442695, %v2647_v49  ;;  %v2757_v13 = vadd.f32 %v5767_v8, %v2756_v3  ;;  %v2776_v52 = vsel %vm5858_vm6, %v5771_v19, %v2772_v16  ;;  %v2780_v3 = vor.u32 1.1754944e-38, %v2779_v33 }
 0x3c6   : > { %v2794_v49 = vand.u32 2147483648, %v5793_v46  ;;  %v2792_v19 = vand.u32 2147483647, %v5793_v46  ;;  %v2750_v33 = vor.u32 1.1754944e-38, %v2749_v27  ;;  %v5918_v42 = vperm.slane %v5787_v18, 1 }
 0x3c7   : > { %v3800_v9 = vpop.eup %3799  ;;  %3803 = vpow2.f32 %v2656_v26  ;;  %v2761_v29 = vsel %vm5868_vm7, %v5767_v8, %v2757_v13  ;;  %v2746_v26 = vsel %vm5883_vm8, %v5769_v4, %v2742_v28  ;;  %v2781_v56 = vsel %vm2778_vm10, %v2780_v3, %v2776_v52 }
 0x3c8   : > { %v2784_v44 = vmul.f32 %v3800_v9, %v5793_v46  ;;  %vm2789_vm11 = vweird.f32 %v3800_v9  ;;  %v2766_v16 = vsel %vm2763_vm0, %v2765_v55, %v2761_v29  ;;  %v2731_v4 = vsel %vm5897_vm15, %v5773_v51, %v2727_v25 }
 0x3c9   : > { %vm2790_vm3 = vmor %vm2788_vm1, %vm2789_vm11  ;;  %v2795_v57 = vor.u32 1.1754944e-38, %v2794_v49  ;;  %vm2793_vm13 = vcmp.eq.f32.partialorder %v2792_v19, 8.507059e+37  ;;  %v2751_v46 = vsel %vm2748_vm2, %v2750_v33, %v2746_v26  ;;  %v2803_v45 = vmul.f32 %v2766_v16, %v5723_v58 }
 0x3ca   : > { %v5843_v48 = vpop.eup %3801  ;;  %v2785_v23 = vsub.f32 1.0, %v2784_v44  ;;  %v2804_v44 = vmul.f32 %v2781_v56, %v5733_v59  ;;  %v2736_v59 = vsel %vm5849_vm4, %v5828_v37, %v2731_v4  ;;  %v2721_v58 = vsel %vm2718_vm14, %v5818_v60, %v2716_v1 }
 0x3cb   : > { %v2679_v30 = vmul.f32 %v5843_v48, %v5799_v15  ;;  %v5932_v11 = vperm.slane %v2807_v53, 1  ;;  %v2802_v18 = vmul.f32 %v2751_v46, %v5717_v6  ;;  %v2832_v36 = vmul.f32 %v5918_v42, %v2803_v45 }
 0x3cc   : > { %v2786_v61 = vmul.f32 %v3800_v9, %v2785_v23  ;;  %v2833_v47 = vmul.f32 %v5918_v42, %v2804_v44  ;;  %vm2684_vm12 = vweird.f32 %v5843_v48  ;;  %v2815_v6 = vmul.f32 %v5805_v39, %v2804_v44 }
 0x3cd   : > { %3466 = vmatmul.msk.f32.gmra.mxu3 %vm2844_vm9, %v4971_v43  ;;  %v3804_v8 = vpop.eup %3803  ;;  %v2680_v5 = vsub.f32 1.0, %v2679_v30  ;;  %v5930_v30 = vperm.slane %v2807_v53, 0  ;;  %v2689_v60 = vand.u32 2147483648, %v5799_v15  ;;  %vm2683_vm4 = vweird.f32 %v5799_v15 }
 0x3ce   : > { %v2787_v13 = vadd.f32 %v3800_v9, %v2786_v61  ;;  %v5902_v43 = vadd.f32 1.0, %v3804_v8  ;;  %v2800_v27 = vmul.f32 %v2721_v58, %v5707_v0  ;;  %v2831_v21 = vmul.f32 %v5918_v42, %v2802_v18  ;;  %vm5953_vm5 = vmor %vm2683_vm4, %vm2684_vm12 }
 0x3cf   : > { %v2681_v51 = vmul.f32 %v5843_v48, %v2680_v5  ;;  %v2842_v23 = vadd.f32 %v5932_v11, %v2833_v47  ;;  %v2814_v55 = vmul.f32 %v5805_v39, %v2803_v45  ;;  %v2824_v3 = vadd.f32 %v5930_v30, %v2815_v6  ;;  %v3009_v47 = vpop.permute.xlu2 %3008 }
 0x3d0   : > { %v2791_v28 = vsel %vm2790_vm3, %v3800_v9, %v2787_v13  ;;  %3805 = vrcp.f32 %v5902_v43  ;;  %v2690_v49 = vor.u32 1.1754944e-38, %v2689_v60  ;;  %v2704_v63 = vand.u32 2147483648, %v5902_v43 }
 0x3d1   : > { %v2796_v22 = vsel %vm2793_vm13, %v2795_v57, %v2791_v28  ;;  %v2682_v38 = vadd.f32 %v5843_v48, %v2681_v51  ;;  %v2841_v61 = vadd.f32 %v5932_v11, %v2832_v36  ;;  %v2702_v8 = vand.u32 2147483647, %v5902_v43 }
 0x3d2   : > { %v2805_v9 = vmul.f32 %v2796_v22, %v5746_v54  ;;  %v2801_v54 = vmul.f32 %v2736_v59, %v5720_v41  ;;  %v2829_v26 = vmul.f32 %v5918_v42, %v2800_v27  ;;  %vm2698_vm8 = vweird.f32 %v5902_v43 }
 0x3d3   : > { %v2813_v34 = vmul.f32 %v5805_v39, %v2802_v18  ;;  %v2823_v16 = vadd.f32 %v5930_v30, %v2814_v55  ;;  %v2705_v13 = vor.u32 1.1754944e-38, %v2704_v63  ;;  %vm2703_vm11 = vcmp.eq.f32.partialorder %v2702_v8, 8.507059e+37 }
 0x3d4   : > { %v2816_v14 = vmul.f32 %v5805_v39, %v2805_v9  ;;  %v2834_v37 = vmul.f32 %v5918_v42, %v2805_v9  ;;  %v2830_v29 = vmul.f32 %v5918_v42, %v2801_v54  ;;  %v2812_v44 = vmul.f32 %v5805_v39, %v2801_v54 }
 0x3d5   : > { %3467 = vmatmul.msk.f32.gmra.mxu3 %vm2844_vm9, %v5001_v35  ;;  %v2687_v35 = vand.u32 2147483647, %v5799_v15  ;;  %v2686_v15 = vsel %vm5953_vm5, %v5843_v48, %v2682_v38  ;;  %v2840_v48 = vadd.f32 %v5932_v11, %v2831_v21  ;;  %v2822_v28 = vadd.f32 %v5930_v30, %v2813_v34 }
 0x3d6   : > { %v3806_v31 = vpop.eup %3805  ;;  %v2825_v1 = vadd.f32 %v5930_v30, %v2816_v14  ;;  %v2843_v25 = vadd.f32 %v5932_v11, %v2834_v37  ;;  %v2839_v4 = vadd.f32 %v5932_v11, %v2830_v29  ;;  %v2811_v51 = vmul.f32 %v5805_v39, %v2800_v27  ;;  %v3011_v14 = vpop.permute.xlu0 %3010 }
 0x3d7   : > { %v2694_v41 = vmul.f32 %v3806_v31, %v5902_v43  ;;  %vm2688_vm6 = vcmp.eq.f32.partialorder %v2687_v35, 8.507059e+37  ;;  %vm2699_vm7 = vweird.f32 %v3806_v31  ;;  %v2838_v43 = vadd.f32 %v5932_v11, %v2829_v26  ;;  %v3013_v37 = vpop.permute.xlu2 %3012 }
 0x3d8   : > { %3477 = vmatpush.xpose.msk.msrb.mxu3 %vm2844_vm9, %v2825_v1  ;;  %3159 = vmatpush.msrb.mxu0 %v2843_v25  ;;  %v2691_v56 = vsel %vm2688_vm6, %v2690_v49, %v2686_v15  ;;  %vm2700_vm10 = vmor %vm2698_vm8, %vm2699_vm7  ;;  %v2821_v22 = vadd.f32 %v5930_v30, %v2812_v44  ;;  %v2820_v59 = vadd.f32 %v5930_v30, %v2811_v51  ;;  %vm2940_vm0 = vcmask 130048  }
 0x3d9   : > { %v2695_v0 = vsub.f32 1.0, %v2694_v41  ;;  %v2798_v33 = vmul.f32 %v2691_v56, %v5758_v50 }
 0x3da   : > { %3160 = vmatpush.msrb.mxu0 %v2842_v23 }
 0x3db   : > { %v2696_v19 = vmul.f32 %v3806_v31, %v2695_v0  ;;  %v2827_v46 = vmul.f32 %v5918_v42, %v2798_v33 }
 0x3dc   : > { %3478 = vmatpush.xpose.msk.msrb.mxu3 %vm2844_vm9, %v2824_v3  ;;  %3161 = vmatpush.msrb.mxu0 %v2841_v61 }
 0x3dd   : > { %v2697_v5 = vadd.f32 %v3806_v31, %v2696_v19  ;;  %3468 = vmatmul.msk.f32.gmra.mxu3 %vm2844_vm9, %v4998_v7 }
 0x3de   : > { %3162 = vmatpush.msrb.mxu0 %v2840_v48  ;;  %v3017_v54 = vpop.permute.xlu0 %3016 }
 0x3df   : > { %v2701_v57 = vsel %vm2700_vm10, %v3806_v31, %v2697_v5 }
 0x3e0   : > { %v2706_v53 = vsel %vm2703_vm11, %v2705_v13, %v2701_v57  ;;  %3479 = vmatpush.xpose.msk.msrb.mxu3 %vm2844_vm9, %v2823_v16  ;;  %3163 = vmatpush.msrb.mxu0 %v2839_v4 }
 0x3e1   : > { %v2799_v7 = vmul.f32 %v2706_v53, %v5802_v40  ;;  %v2836_v40 = vadd.f32 %v5932_v11, %v2827_v46 }
 0x3e2   : > { %3164 = vmatpush.msrb.mxu0 %v2838_v43 }
 0x3e3   : > { %v2828_v45 = vmul.f32 %v5918_v42, %v2799_v7  ;;  %v2810_v9 = vmul.f32 %v5805_v39, %v2799_v7  ;;  %v2809_v42 = vmul.f32 %v5805_v39, %v2798_v33 }
 0x3e4   : > { %3480 = vmatpush.xpose.msk.msrb.mxu3 %vm2844_vm9, %v2822_v28 }
 0x3e5   : > { %v2837_v50 = vadd.f32 %v5932_v11, %v2828_v45  ;;  %v2819_v58 = vadd.f32 %v5930_v30, %v2810_v9  ;;  %v2818_v18 = vadd.f32 %v5930_v30, %v2809_v42  ;;  %v3007_v11 = vpop.permute.xlu1 %3006  ;;  %v3019_v30 = vpop.permute.xlu2 %3018 }
 0x3e7   : > { %3165 = vmatpush.msrb.mxu0 %v2837_v50 }
 0x3e8   : > { %3481 = vmatpush.xpose.msk.msrb.mxu3 %vm2844_vm9, %v2821_v22 }
 0x3e9   : > { %3166 = vmatpush.msrb.mxu0 %v2836_v40 }
 0x3ec   : > { %3482 = vmatpush.xpose.msk.msrb.mxu3 %vm2844_vm9, %v2820_v59 }
 0x3ed   : > { %v3015_v39 = vpop.permute.xlu1 %3014 }
 0x3f0   : > { %3483 = vmatpush.xpose.msk.msrb.mxu3 %vm2844_vm9, %v2819_v58 }
 0x3f4   : > { %3484 = vmatpush.xpose.msk.msrb.mxu3 %vm2844_vm9, %v2818_v18 }
 0x3f5   : > { %v3021_v60 = vpop.permute.xlu1 %3020 }
 0x3f7   : > { %3485 = vmatmul.msk.f32.vlgmr.msrb.gmra.mxu3 %vm2844_vm9, %v3007_v11 }
 0x3ff   : > { %3486 = vmatmul.msk.f32.gmra.mxu3 %vm2844_vm9, %v3009_v47 }
 0x407   : > { %3487 = vmatmul.msk.f32.gmra.mxu3 %vm2844_vm9, %v3011_v14 }
 0x40f   : > { %3488 = vmatmul.msk.f32.gmra.mxu3 %vm2844_vm9, %v3013_v37 }
 0x417   : > { %3489 = vmatmul.msk.f32.gmra.mxu3 %vm2844_vm9, %v3015_v39 }
 0x41f   : > { %3490 = vmatmul.msk.f32.gmra.mxu3 %vm2844_vm9, %v3017_v54 }
 0x427   : > { %3491 = vmatmul.msk.f32.gmra.mxu3 %vm2844_vm9, %v3019_v30 }
 0x428   : > { %v2892_v36 = vpop.f32.mrf.mxu3 }
 0x429   : > { %v2916_v38 = vmul.f32 0.015625, %v2892_v36 }
 0x42b   : > { %v2924_v31 = vmax.f32 %v2916_v38, 0.0 }
 0x42d   : > { %v2932_v6 = vmul.f32 %v2924_v31, %v2924_v31 }
 0x42f   : > { %3469 = vmatmul.msk.f32.vlgmr.msrb.gmra.mxu1 %vm2940_vm0, %v2932_v6  ;;  %3492 = vmatmul.msk.f32.gmra.mxu3 %vm2844_vm9, %v3021_v60 }
 0x430   : > { %v2895_v1 = vpop.f32.mrf.mxu3 }
 0x431   : > { %v2917_v25 = vmul.f32 0.015625, %v2895_v1 }
 0x433   : > { %v2925_v35 = vmax.f32 %v2917_v25, 0.0 }
 0x435   : > { %v2933_v41 = vmul.f32 %v2925_v35, %v2925_v35 }
 0x437   : > { %3470 = vmatmul.msk.f32.gmra.mxu1 %vm2940_vm0, %v2933_v41 }
 0x438   : > { %v2898_v27 = vpop.f32.mrf.mxu3 }
 0x439   : > { %v2918_v21 = vmul.f32 0.015625, %v2898_v27 }
 0x43b   : > { %v2926_v52 = vmax.f32 %v2918_v21, 0.0 }
 0x43d   : > { %v2934_v23 = vmul.f32 %v2926_v52, %v2926_v52 }
 0x43f   : > { %3471 = vmatmul.msk.f32.gmra.mxu1 %vm2940_vm0, %v2934_v23 }
 0x440   : > { %v2901_v29 = vpop.f32.mrf.mxu3 }
 0x441   : > { %v2919_v55 = vmul.f32 0.015625, %v2901_v29  ;;  %v3255_v29 = vld [vmem:[#allocation8 + $0x78] sm:$0xff] }
 0x442   : > { %3260 = vmatpush.msrb.mxu2 %v3255_v29 }
 0x443   : > { %v2927_v15 = vmax.f32 %v2919_v55, 0.0  ;;  %v3254_v55 = vld [vmem:[#allocation8 + $0x70] sm:$0xff] }
 0x444   : > { %3261 = vmatpush.msrb.mxu2 %v3254_v55 }
 0x445   : > { %v2935_v0 = vmul.f32 %v2927_v15, %v2927_v15  ;;  %v3253_v15 = vld [vmem:[#allocation8 + $0x68] sm:$0xff] }
 0x446   : > { %3262 = vmatpush.msrb.mxu2 %v3253_v15 }
 0x447   : > { %3472 = vmatmul.msk.f32.gmra.mxu1 %vm2940_vm0, %v2935_v0  ;;  %v3252_v0 = vld [vmem:[#allocation8 + $0x60] sm:$0xff] }
 0x448   : > { %v2904_v3 = vpop.f32.mrf.mxu3  ;;  %3263 = vmatpush.msrb.mxu2 %v3252_v0 }
 0x449   : > { %v2920_v49 = vmul.f32 0.015625, %v2904_v3  ;;  %v3251_v3 = vld [vmem:[#allocation8 + $0x58] sm:$0xff] }
 0x44a   : > { %3264 = vmatpush.msrb.mxu2 %v3251_v3 }
 0x44b   : > { %v2928_v63 = vmax.f32 %v2920_v49, 0.0 }
 0x44d   : > { %v2936_v61 = vmul.f32 %v2928_v63, %v2928_v63  ;;  %v3250_v63 = vld [vmem:[#allocation8 + $0x50] sm:$0xff] }
 0x44e   : > { %3265 = vmatpush.msrb.mxu2 %v3250_v63 }
 0x44f   : > { %3473 = vmatmul.msk.f32.gmra.mxu1 %vm2940_vm0, %v2936_v61 }
 0x450   : > { %v2907_v19 = vpop.f32.mrf.mxu3 }
 0x451   : > { %v2921_v8 = vmul.f32 0.015625, %v2907_v19 }
 0x453   : > { %v2929_v26 = vmax.f32 %v2921_v8, 0.0  ;;  %v3839_v8 = vld [vmem:[%s6333_s7] sm:$0x3] }
 0x455   : > { %v2937_v56 = vmul.f32 %v2929_v26, %v2929_v26  ;;  %v6033_v26 = vperm.slane %v3839_v8, 1 }
 0x457   : > { %3474 = vmatmul.msk.f32.gmra.mxu1 %vm2940_vm0, %v2937_v56 }
 0x458   : > { %v2910_v48 = vpop.f32.mrf.mxu3 }
 0x459   : > { %v2922_v5 = vmul.f32 0.015625, %v2910_v48  ;;  %v6038_v48 = vadd.f32 %v5627_v10, %v6033_v26 }
 0x45b   : > { %v2930_v34 = vmax.f32 %v2922_v5, 0.0  ;;  %v1312_v5 = vsub.f32 0.0, %v6038_v48 }
 0x45d   : > { %v2938_v16 = vmul.f32 %v2930_v34, %v2930_v34  ;;  %v1329_v34 = vmul.f32 1.442695, %v1312_v5 }
 0x45f   : > { %3475 = vmatmul.msk.f32.gmra.mxu1 %vm2940_vm0, %v2938_v16  ;;  %v6043_v16 = vadd.f32 %v5657_v2, %v6033_v26  ;;  %3807 = vpow2.f32 %v1329_v34 }
 0x460   : > { %v2913_v13 = vpop.f32.mrf.mxu3 }
 0x461   : > { %v2923_v4 = vmul.f32 0.015625, %v2913_v13  ;;  %v3249_v13 = vld [vmem:[#allocation8 + $0x48] sm:$0xff] }
 0x462   : > { %3266 = vmatpush.msrb.mxu2 %v3249_v13 }
 0x463   : > { %v2931_v33 = vmax.f32 %v2923_v4, 0.0  ;;  %v3248_v4 = vld [vmem:[#allocation8 + $0x40] sm:$0xff] }
 0x464   : > { %3267 = vmatpush.msrb.mxu2 %v3248_v4  ;;  %v6095_v4 = vadd.f32 %v5697_v20, %v6033_v26 }
 0x465   : > { %v2939_v57 = vmul.f32 %v2931_v33, %v2931_v33  ;;  %v3247_v33 = vld [vmem:[#allocation8 + $0x38] sm:$0xff]  ;;  %v3808_v2 = vpop.eup %3807 }
 0x466   : > { %3268 = vmatpush.msrb.mxu2 %v3247_v33 }
 0x467   : > { %3476 = vmatmul.msk.f32.gmra.mxu1 %vm2940_vm0, %v2939_v57  ;;  %v1314_v57 = vsub.f32 0.0, %v6043_v16 }
 0x469   : > { %v1333_v10 = vmul.f32 1.442695, %v1314_v57 }
 0x46b   : > { %3809 = vpow2.f32 %v1333_v10 }
 0x47a   : > { %v3079_v53 = vpop.f32.mrf.mxu3 }
 0x47b   : > { %v3103_v43 = vmul.f32 0.015625, %v3079_v53  ;;  %v3246_v53 = vld [vmem:[#allocation8 + $0x30] sm:$0xff] }
 0x47c   : > { %3269 = vmatpush.msrb.mxu2 %v3246_v53 }
 0x47d   : > { %v3111_v7 = vmax.f32 %v3103_v43, 0.0  ;;  %v3245_v43 = vld [vmem:[#allocation8 + $0x28] sm:$0xff] }
 0x47e   : > { %3270 = vmatpush.msrb.mxu2 %v3245_v43 }
 0x47f   : > { %v3119_v44 = vmul.f32 %v3111_v7, %v3111_v7  ;;  %v6048_v7 = vadd.f32 %v5673_v17, %v6033_v26  ;;  %v3810_v17 = vpop.eup %3809 }
 0x481   : > { %3493 = vmatmul.msk.f32.vlgmr.msrb.gmra.mxu0 %vm2844_vm9, %v3119_v44  ;;  %v3244_v44 = vld [vmem:[#allocation8 + $0x20] sm:$0xff] }
 0x482   : > { %v3082_v28 = vpop.f32.mrf.mxu3  ;;  %3271 = vmatpush.msrb.mxu2 %v3244_v44 }
 0x483   : > { %v3104_v46 = vmul.f32 0.015625, %v3082_v28  ;;  %v3243_v28 = vld [vmem:[#allocation8 + $0x18] sm:$0xff] }
 0x484   : > { %3272 = vmatpush.msrb.mxu2 %v3243_v28 }
 0x485   : > { %v3112_v45 = vmax.f32 %v3104_v46, 0.0  ;;  %v1316_v46 = vsub.f32 0.0, %v6048_v7 }
 0x487   : > { %v3120_v50 = vmul.f32 %v3112_v45, %v3112_v45  ;;  %v1360_v45 = vadd.f32 1.0, %v3808_v2  ;;  %v1326_v2 = vsub.f32 0.0, %v6095_v4 }
 0x489   : > { %3494 = vmatmul.msk.f32.gmra.mxu0 %vm2844_vm9, %v3120_v50  ;;  %v3242_v50 = vld [vmem:[#allocation8 + $0x10] sm:$0xff]  ;;  %3811 = vrcp.f32 %v1360_v45  ;;  %vm1395_vm1 = vweird.f32 %v1360_v45 }
 0x48a   : > { %v3085_v51 = vpop.f32.mrf.mxu3  ;;  %3273 = vmatpush.msrb.mxu2 %v3242_v50 }
 0x48b   : > { %v3105_v22 = vmul.f32 0.015625, %v3085_v51  ;;  %v1337_v51 = vmul.f32 1.442695, %v1316_v46 }
 0x48d   : > { %v3113_v40 = vmax.f32 %v3105_v22, 0.0  ;;  %v6053_v22 = vadd.f32 %v5683_v62, %v6033_v26  ;;  %3813 = vpow2.f32 %v1337_v51 }
 0x48f   : > { %v3121_v59 = vmul.f32 %v3113_v40, %v3113_v40  ;;  %v3241_v40 = vld [vmem:[#allocation8 + $0x8] sm:$0xff] }
 0x490   : > { %3274 = vmatpush.msrb.mxu2 %v3241_v40 }
 0x491   : > { %3495 = vmatmul.msk.f32.gmra.mxu0 %vm2844_vm9, %v3121_v59  ;;  %v3240_v59 = vld [vmem:[#allocation8] sm:$0xff] }
 0x492   : > { %v3088_v9 = vpop.f32.mrf.mxu3  ;;  %3275 = vmatpush.msrb.mxu2 %v3240_v59 }
 0x493   : > { %v3106_v42 = vmul.f32 0.015625, %v3088_v9  ;;  %v1318_v9 = vsub.f32 0.0, %v6053_v22 }
 0x495   : > { %v3114_v58 = vmax.f32 %v3106_v42, 0.0  ;;  %v6056_v42 = vadd.f32 1.0, %v3810_v17 }
 0x497   : > { %v3122_v18 = vmul.f32 %v3114_v58, %v3114_v58  ;;  %v3812_v58 = vpop.eup %3811  ;;  %3815 = vrcp.f32 %v6056_v42  ;;  %vm1425_vm14 = vweird.f32 %v6056_v42  ;;  %v1429_v34 = vand.u32 2147483647, %v6056_v42 }
 0x498   : > { %v3814_v62 = vpop.eup %3813  ;;  %vm1396_vm15 = vweird.f32 %v3812_v58 }
 0x499   : > { %3496 = vmatmul.msk.f32.gmra.mxu0 %vm2844_vm9, %v3122_v18  ;;  %v1341_v18 = vmul.f32 1.442695, %v1318_v9  ;;  %vm1397_vm2 = vmor %vm1395_vm1, %vm1396_vm15  ;;  %vm1430_vm4 = vcmp.eq.f32.partialorder %v1429_v34, 8.507059e+37 }
 0x49a   : > { %v3091_v11 = vpop.f32.mrf.mxu3 }
 0x49b   : > { %v3107_v47 = vmul.f32 0.015625, %v3091_v11  ;;  %v6060_v11 = vadd.f32 %v5688_v32, %v6033_v26  ;;  %3817 = vpow2.f32 %v1341_v18  ;;  %v1357_v18 = vmul.f32 1.442695, %v1326_v2 }
 0x49d   : > { %v3115_v14 = vmax.f32 %v3107_v47, 0.0  ;;  %v1391_v47 = vmul.f32 %v3812_v58, %v1360_v45 }
 0x49f   : > { %v3123_v37 = vmul.f32 %v3115_v14, %v3115_v14  ;;  %v1320_v14 = vsub.f32 0.0, %v6060_v11 }
 0x4a1   : > { %3497 = vmatmul.msk.f32.gmra.mxu0 %vm2844_vm9, %v3123_v37  ;;  %v6064_v37 = vadd.f32 1.0, %v3814_v62 }
 0x4a2   : > { %v3094_v39 = vpop.f32.mrf.mxu3 }
 0x4a3   : > { %v3108_v54 = vmul.f32 0.015625, %v3094_v39  ;;  %v1392_v39 = vsub.f32 1.0, %v1391_v47  ;;  %3819 = vrcp.f32 %v6064_v37  ;;  %v1461_v59 = vand.u32 2147483648, %v6064_v37 }
 0x4a4   : > { %vm1455_vm6 = vweird.f32 %v6064_v37 }
 0x4a5   : > { %v3116_v30 = vmax.f32 %v3108_v54, 0.0  ;;  %v3816_v54 = vpop.eup %3815 }
 0x4a6   : > { %v3818_v32 = vpop.eup %3817  ;;  %vm1426_vm13 = vweird.f32 %v3816_v54 }
 0x4a7   : > { %v3124_v36 = vmul.f32 %v3116_v30, %v3116_v30  ;;  %v1345_v30 = vmul.f32 1.442695, %v1320_v14  ;;  %vm6097_vm12 = vmor %vm1425_vm14, %vm1426_vm13 }
 0x4a9   : > { %3498 = vmatmul.msk.f32.gmra.mxu0 %vm2844_vm9, %v3124_v36  ;;  %v6068_v36 = vadd.f32 %v5692_v24, %v6033_v26  ;;  %3821 = vpow2.f32 %v1345_v30  ;;  %v1399_v24 = vand.u32 2147483647, %v1360_v45  ;;  %v1462_v30 = vor.u32 1.1754944e-38, %v1461_v59 }
 0x4aa   : > { %v3097_v38 = vpop.f32.mrf.mxu3 }
 0x4ab   : > { %v3109_v31 = vmul.f32 0.015625, %v3097_v38  ;;  %vm1400_vm3 = vcmp.eq.f32.partialorder %v1399_v24, 8.507059e+37 }
 0x4ac   : > { %v2982_v38 = vpop.f32.mrf.mxu1 }
 0x4ad   : > { %v3117_v6 = vmax.f32 %v3109_v31, 0.0  ;;  %v1393_v31 = vmul.f32 %v3812_v58, %v1392_v39 }
 0x4af   : > { %v3125_v60 = vmul.f32 %v3117_v6, %v3117_v6  ;;  %v1421_v6 = vmul.f32 %v3816_v54, %v6056_v42 }
 0x4b1   : > { %3499 = vmatmul.msk.f32.gmra.mxu0 %vm2844_vm9, %v3125_v60  ;;  %v1322_v60 = vsub.f32 0.0, %v6068_v36 }
 0x4b2   : > { %v3100_v1 = vpop.f32.mrf.mxu3 }
 0x4b3   : > { %v3110_v25 = vmul.f32 0.015625, %v3100_v1  ;;  %v6073_v1 = vadd.f32 1.0, %v3818_v32 }
 0x4b4   : > { %v2985_v0 = vpop.f32.mrf.mxu1 }
 0x4b5   : > { %v3118_v35 = vmax.f32 %v3110_v25, 0.0  ;;  %v1394_v25 = vadd.f32 %v3812_v58, %v1393_v31  ;;  %3823 = vrcp.f32 %v6073_v1  ;;  %vm1485_vm11 = vweird.f32 %v6073_v1 }
 0x4b7   : > { %v3126_v41 = vmul.f32 %v3118_v35, %v3118_v35  ;;  %v1422_v35 = vsub.f32 1.0, %v1421_v6  ;;  %v1398_v29 = vsel %vm1397_vm2, %v3812_v58, %v1394_v25  ;;  %v1459_v58 = vand.u32 2147483647, %v6064_v37 }
 0x4b9   : > { %3500 = vmatmul.msk.f32.gmra.mxu0 %vm2844_vm9, %v3126_v41  ;;  %v6075_v41 = vpop.eup %3819  ;;  %v1423_v55 = vmul.f32 %v3816_v54, %v1422_v35  ;;  %vm1460_vm8 = vcmp.eq.f32.partialorder %v1459_v58, 8.507059e+37  ;;  %v1489_v35 = vand.u32 2147483647, %v6073_v1 }
 0x4ba   : > { %v1451_v15 = vmul.f32 %v6075_v41, %v6064_v37  ;;  %vm1456_vm5 = vweird.f32 %v6075_v41 }
 0x4bb   : > { %vm1457_vm7 = vmor %vm1455_vm6, %vm1456_vm5  ;;  %vm1490_vm15 = vcmp.eq.f32.partialorder %v1489_v35, 8.507059e+37 }
 0x4bc   : > { %v2988_v28 = vpop.f32.mrf.mxu1 }
 0x4c4   : > { %v2991_v31 = vpop.f32.mrf.mxu1 }
 0x4fe   : > { %v3168_v27 = vpop.f32.mrf.mxu0 }
 0x4ff   : > { %3200 = vrot.lane.b32.xlu0 %v3168_v27, %s4053_s29  ;;  %v1401_v27 = vand.u32 2147483648, %v1360_v45 }
 0x501   : > { %v1402_v3 = vor.u32 1.1754944e-38, %v1401_v27 }
 0x503   : > { %v1403_v63 = vsel %vm1400_vm3, %v1402_v3, %v1398_v29 }
 0x504   : > { %v1616_v5 = vmul.f32 %v1403_v63, %v6038_v48 }
 0x506   : > { %v3171_v21 = vpop.f32.mrf.mxu0 }
 0x507   : > { %3202 = vrot.lane.b32.xlu2 %v3171_v21, %s4053_s29  ;;  %v1349_v21 = vmul.f32 1.442695, %v1322_v60  ;;  %v1491_v60 = vand.u32 2147483648, %v6073_v1 }
 0x509   : > { %3825 = vpow2.f32 %v1349_v21 }
 0x50e   : > { %v3174_v52 = vpop.f32.mrf.mxu0 }
 0x50f   : > { %3204 = vrot.lane.b32.xlu1 %v3174_v52, %s4053_s29  ;;  %v6079_v52 = vadd.f32 %v5695_v12, %v6033_v26  ;;  %v1424_v12 = vadd.f32 %v3816_v54, %v1423_v55  ;;  %v1492_v55 = vor.u32 1.1754944e-38, %v1491_v60 }
 0x511   : > { %v1428_v48 = vsel %vm6097_vm12, %v3816_v54, %v1424_v12 }
 0x516   : > { %v3177_v23 = vpop.f32.mrf.mxu0 }
 0x517   : > { %3206 = vrot.lane.b32.xlu0 %v3177_v23, %s4053_s29  ;;  %v3822_v23 = vpop.eup %3821 }
 0x518   : > { %v6087_v8 = vpop.eup %3823 }
 0x519   : > { %v3826_v43 = vpop.eup %3825  ;;  %v1481_v20 = vmul.f32 %v6087_v8, %v6073_v1  ;;  %vm1486_vm10 = vweird.f32 %v6087_v8 }
 0x51a   : > { %v6112_v50 = vadd.f32 1.0, %v3826_v43  ;;  %vm1487_vm0 = vmor %vm1485_vm11, %vm1486_vm10 }
 0x51b   : > { %v1482_v17 = vsub.f32 1.0, %v1481_v20 }
 0x51c   : > { %vm1545_vm12 = vweird.f32 %v6112_v50 }
 0x51d   : > { %v1483_v14 = vmul.f32 %v6087_v8, %v1482_v17 }
 0x51e   : > { %v3180_v49 = vpop.f32.mrf.mxu0 }
 0x51f   : > { %3208 = vrot.lane.b32.xlu2 %v3180_v49, %s4053_s29  ;;  %v1324_v49 = vsub.f32 0.0, %v6079_v52 }
 0x521   : > { %v1353_v13 = vmul.f32 1.442695, %v1324_v49 }
 0x526   : > { %v3183_v61 = vpop.f32.mrf.mxu0 }
 0x527   : > { %3210 = vrot.lane.b32.xlu1 %v3183_v61, %s4053_s29  ;;  %v6085_v61 = vadd.f32 1.0, %v3822_v23 }
 0x529   : > { %3827 = vrcp.f32 %v6085_v61  ;;  %v1521_v63 = vand.u32 2147483648, %v6085_v61  ;;  %vm1515_vm2 = vweird.f32 %v6085_v61 }
 0x52a   : > { %3829 = vpow2.f32 %v1353_v13 }
 0x52b   : > { %3831 = vrcp.f32 %v6112_v50 }
 0x52c   : > { %3833 = vpow2.f32 %v1357_v18 }
 0x52e   : > { %v3186_v19 = vpop.f32.mrf.mxu0 }
 0x52f   : > { %3212 = vrot.lane.b32.xlu0 %v3186_v19, %s4053_s29  ;;  %v1452_v19 = vsub.f32 1.0, %v1451_v15  ;;  %v6116_v40 = vpop.eup %3827 }
 0x530   : > { %v3830_v62 = vpop.eup %3829  ;;  %v1511_v39 = vmul.f32 %v6116_v40, %v6085_v61  ;;  %vm1516_vm1 = vweird.f32 %v6116_v40 }
 0x531   : > { %v1453_v10 = vmul.f32 %v6075_v41, %v1452_v19  ;;  %v6131_v37 = vadd.f32 1.0, %v3830_v62  ;;  %v3832_v6 = vpop.eup %3831  ;;  %v1519_v19 = vand.u32 2147483647, %v6085_v61  ;;  %vm1517_vm3 = vmor %vm1515_vm2, %vm1516_vm1 }
 0x532   : > { %v1512_v32 = vsub.f32 1.0, %v1511_v39  ;;  %v3834_v24 = vpop.eup %3833  ;;  %v1541_v29 = vmul.f32 %v3832_v6, %v6112_v50  ;;  %vm1546_vm14 = vweird.f32 %v3832_v6 }
 0x533   : > { %v1454_v51 = vadd.f32 %v6075_v41, %v1453_v10  ;;  %3835 = vrcp.f32 %v6131_v37  ;;  %v6147_v15 = vadd.f32 1.0, %v3834_v24  ;;  %vm1520_vm13 = vcmp.eq.f32.partialorder %v1519_v19, 8.507059e+37  ;;  %v3841_v19 = vld [vmem:[%s4277_s24 + $0x8] sm:$0xff] }
 0x534   : > { %v1513_v23 = vmul.f32 %v6116_v40, %v1512_v32  ;;  %v1542_v3 = vsub.f32 1.0, %v1541_v29 }
 0x535   : > { %v1458_v47 = vsel %vm1457_vm7, %v6075_v41, %v1454_v51  ;;  %3837 = vrcp.f32 %v6147_v15  ;;  %vm1575_vm7 = vweird.f32 %v6131_v37 }
 0x536   : > { %v3189_v56 = vpop.f32.mrf.mxu0  ;;  %v1543_v13 = vmul.f32 %v3832_v6, %v1542_v3  ;;  %v3840_v3 = vld [vmem:[%s4277_s24] sm:$0xff] }
 0x537   : > { %3214 = vrot.lane.b32.xlu2 %v3189_v56, %s4053_s29  ;;  %v1431_v56 = vand.u32 2147483648, %v6056_v42  ;;  %s6378_s29 = sld [smem:[#allocation16_spill]] }
 0x539   : > { %v1432_v44 = vor.u32 1.1754944e-38, %v1431_v56  ;;  %v3836_v49 = vpop.eup %3835 }
 0x53a   : > { %vm1576_vm6 = vweird.f32 %v3836_v49 }
 0x53b   : > { %v1433_v45 = vsel %vm1430_vm4, %v1432_v44, %v1428_v48  ;;  %v1544_v48 = vadd.f32 %v3832_v6, %v1543_v13  ;;  %v3838_v20 = vpop.eup %3837  ;;  %vm1547_vm4 = vmor %vm1545_vm12, %vm1546_vm14 }
 0x53c   : > { %v1618_v42 = vmul.f32 %v1433_v45, %v6043_v16  ;;  %v1463_v16 = vsel %vm1460_vm8, %v1462_v30, %v1458_v47  ;;  %v1601_v51 = vmul.f32 %v3838_v20, %v6147_v15  ;;  %vm1577_vm8 = vmor %vm1575_vm7, %vm1576_vm6  ;;  %vm1606_vm11 = vweird.f32 %v3838_v20 }
 0x53d   : > { %v1620_v25 = vmul.f32 %v1463_v16, %v6048_v7  ;;  %s768_s23 = sand.u32 1, %s6378_s29  }
 0x53e   : > { %v1602_v18 = vsub.f32 1.0, %v1601_v51  ;;  %s3456_s30 = sshll.u32 %s768_s23, 6  ;;  %s3326_s1 = scalar_lea.sflag [#allocation4], %s768_s23 }
 0x53f   : > { %s6194_s25 = scalar_lea.vmem [#allocation10], %s3456_s30  ;;  %s3988_s30 = scalar_lea.hbm %s6380_s26, 128 }
 0x540   : > { %s3338_s27 = sshll.u32 %s6194_s25, 4  ;;  %p3990_p4 = scmp.lt.s32.totalorder %s3988_s30, %s3984_s19  ;;  %s3339_s27 = int_to_ptr.vmem [resolvable:$true] %s3338_s27 }
 0x542   : > { %p3991_p7 = por %p3990_p4, %p3989_p3 }
 0x544   : > { %p3992_p8 = pnand %p3991_p7, %p3987_p2 }
 0x561   : > { %v3203_v46 = vpop.permute.xlu2 %3202 }
 0x562   : > { %v6120_v9 = vsel %vm2844_vm9, %v2985_v0, %v3203_v46  ;;  %v1514_v0 = vadd.f32 %v6116_v40, %v1513_v23  ;;  %v1548_v46 = vsel %vm1547_vm4, %v3832_v6, %v1544_v48  ;;  %v1609_v6 = vand.u32 2147483647, %v6147_v15 }
 0x563   : > { %v3233_v54 = vmul.f32 %v6120_v9, %v1618_v42 }
 0x564   : > { %v1518_v34 = vsel %vm1517_vm3, %v6116_v40, %v1514_v0  ;;  %vm1610_vm1 = vcmp.eq.f32.partialorder %v1609_v6, 8.507059e+37 }
 0x571   : > { %v3201_v33 = vpop.permute.xlu0 %3200 }
 0x572   : > { %v6103_v53 = vsel %vm2844_vm9, %v2982_v38, %v3201_v33  ;;  %v1484_v38 = vadd.f32 %v6087_v8, %v1483_v14  ;;  %v1571_v33 = vmul.f32 %v3836_v49, %v6131_v37 }
 0x573   : > { %v3232_v26 = vmul.f32 %v6103_v53, %v1616_v5 }
 0x574   : > { %v1488_v21 = vsel %vm1487_vm0, %v6087_v8, %v1484_v38  ;;  %v2994_v8 = vpop.f32.mrf.mxu1  ;;  %v1572_v10 = vsub.f32 1.0, %v1571_v33  ;;  %vm1605_vm0 = vweird.f32 %v6147_v15 }
 0x575   : > { %3276 = vmatmul.f32.vlgmr.msrb.gmra.mxu2 %v3232_v26  ;;  %v1493_v1 = vsel %vm1490_vm15, %v1492_v55, %v1488_v21  ;;  %v1551_v26 = vand.u32 2147483648, %v6112_v50  ;;  %vm1607_vm15 = vmor %vm1605_vm0, %vm1606_vm11 }
 0x576   : > { %v1622_v12 = vmul.f32 %v1493_v1, %v6053_v22  ;;  %v1522_v22 = vor.u32 1.1754944e-38, %v1521_v63  ;;  %v1573_v45 = vmul.f32 %v3836_v49, %v1572_v10  ;;  %v3640_v1 = vld [vmem:[%s6379_s22] ss:$0 sm:$0xff] }
 0x577   : > { %v1552_v59 = vor.u32 1.1754944e-38, %v1551_v26  ;;  %v3844_v26 = vld [vmem:[%s4277_s24 + $0x20] sm:$0xff] }
 0x578   : > { %v1523_v61 = vsel %vm1520_vm13, %v1522_v22, %v1518_v34  ;;  %v1574_v58 = vadd.f32 %v3836_v49, %v1573_v45  ;;  %v3845_v45 = vld [vmem:[%s4277_s24 + $0x28] sm:$0xff] }
 0x579   : > { %v3209_v43 = vpop.permute.xlu2 %3208  ;;  %v1624_v2 = vmul.f32 %v1523_v61, %v6060_v11  ;;  %v1581_v11 = vand.u32 2147483648, %v6131_v37  ;;  %v3843_v61 = vld [vmem:[%s4277_s24 + $0x18] sm:$0xff] }
 0x57a   : > { %v6164_v44 = vsel %vm2844_vm9, %v2994_v8, %v3209_v43  ;;  %v1578_v39 = vsel %vm1577_vm8, %v3836_v49, %v1574_v58 }
 0x57b   : > { %v3236_v40 = vmul.f32 %v6164_v44, %v1624_v2  ;;  %v1582_v16 = vor.u32 1.1754944e-38, %v1581_v11  ;;  %v3847_v11 = vld [vmem:[%s4277_s24 + $0x38] sm:$0xff] }
 0x57c   : > { %v2997_v17 = vpop.f32.mrf.mxu1 }
 0x57d   : > { %3279 = vmatmul.f32.gmra.mxu2 %v3233_v54  ;;  %v1603_v54 = vmul.f32 %v3838_v20, %v1602_v18 }
 0x581   : > { %v3205_v41 = vpop.permute.xlu1 %3204 }
 0x582   : > { %v6141_v27 = vsel %vm2844_vm9, %v2988_v28, %v3205_v41  ;;  %v1549_v28 = vand.u32 2147483647, %v6112_v50  ;;  %v1579_v50 = vand.u32 2147483647, %v6131_v37 }
 0x583   : > { %v3234_v7 = vmul.f32 %v6141_v27, %v1620_v25 }
 0x584   : > { %vm1550_vm5 = vcmp.eq.f32.partialorder %v1549_v28, 8.507059e+37  ;;  %vm1580_vm10 = vcmp.eq.f32.partialorder %v1579_v50, 8.507059e+37  ;;  %v3000_v38 = vpop.f32.mrf.mxu1 }
 0x585   : > { %3282 = vmatmul.f32.gmra.mxu2 %v3234_v7  ;;  %v1553_v42 = vsel %vm1550_vm5, %v1552_v59, %v1548_v46  ;;  %v1583_v32 = vsel %vm1580_vm10, %v1582_v16, %v1578_v39  ;;  %v3846_v59 = vld [vmem:[%s4277_s24 + $0x30] sm:$0xff] }
 0x586   : > { %v1626_v62 = vmul.f32 %v1553_v42, %v6068_v36  ;;  %v1611_v36 = vand.u32 2147483648, %v6147_v15  ;;  %v1628_v37 = vmul.f32 %v1583_v32, %v6079_v52 }
 0x588   : > { %v1612_v24 = vor.u32 1.1754944e-38, %v1611_v36 }
 0x589   : > { %v3207_v56 = vpop.permute.xlu0 %3206 }
 0x58a   : > { %v6157_v5 = vsel %vm2844_vm9, %v2991_v31, %v3207_v56  ;;  %v1604_v31 = vadd.f32 %v3838_v20, %v1603_v54 }
 0x58b   : > { %v3235_v57 = vmul.f32 %v6157_v5, %v1622_v12 }
 0x58c   : > { %v1608_v35 = vsel %vm1607_vm15, %v3838_v20, %v1604_v31  ;;  %v3003_v29 = vpop.f32.mrf.mxu1 }
 0x58d   : > { %3285 = vmatmul.f32.gmra.mxu2 %v3235_v57  ;;  %v1613_v23 = vsel %vm1610_vm1, %v1612_v24, %v1608_v35 }
 0x58e   : > { %v1630_v7 = vmul.f32 %v1613_v23, %v6095_v4 }
 0x591   : > { %v3215_v21 = vpop.permute.xlu2 %3214 }
 0x592   : > { %v3231_v52 = vsel %vm2844_vm9, %v3003_v29, %v3215_v21 }
 0x593   : > { %v3239_v55 = vmul.f32 %v3231_v52, %v1630_v7 }
 0x595   : > { %3288 = vmatmul.f32.gmra.mxu2 %v3236_v40 }
 0x599   : > { %v3211_v47 = vpop.permute.xlu1 %3210 }
 0x59a   : > { %v6176_v14 = vsel %vm2844_vm9, %v2997_v17, %v3211_v47 }
 0x59b   : > { %v3237_v30 = vmul.f32 %v6176_v14, %v1626_v62 }
 0x59d   : > { %3291 = vmatmul.f32.gmra.mxu2 %v3237_v30 }
 0x5a1   : > { %v3213_v60 = vpop.permute.xlu0 %3212 }
 0x5a2   : > { %v3230_v25 = vsel %vm2844_vm9, %v3000_v38, %v3213_v60 }
 0x5a3   : > { %v3238_v41 = vmul.f32 %v3230_v25, %v1628_v37 }
 0x5a5   : > { %3294 = vmatmul.f32.gmra.mxu2 %v3238_v41 }
 0x5ad   : > { %3297 = vmatmul.f32.gmra.mxu2 %v3239_v55 }
 0x5f8   : > { %v3277_v15 = vpop.f32.mrf.mxu2 }
 0x5f9   : > { %v3278_v0 = vadd.f32 %v3640_v1, %v3277_v15 }
 0x5fb   : > { %v3301_v49 = vadd.f32 %v3840_v3, %v3278_v0 }
 0x5fd   : > { %v3309_v63 = vadd.f32 %v3301_v49, %v6103_v53  ;;  %v3842_v53 = vld [vmem:[%s4277_s24 + $0x10] sm:$0xff] }
 0x5ff   : > { %3317 = vst [vmem:[%s6194_s25] sm:$0xff] %v3309_v63 }
 0x600   : > { %v3280_v4 = vpop.f32.mrf.mxu2 }
 0x601   : > { %v3281_v12 = vadd.f32 %v3640_v1, %v3280_v4 }
 0x603   : > { %v3302_v8 = vadd.f32 %v3841_v19, %v3281_v12 }
 0x605   : > { %v3310_v56 = vadd.f32 %v3302_v8, %v6120_v9 }
 0x607   : > { %3318 = vst [vmem:[%s6194_s25 + $0x8] sm:$0xff] %v3310_v56 }
 0x608   : > { %v3283_v34 = vpop.f32.mrf.mxu2 }
 0x609   : > { %v3284_v13 = vadd.f32 %v3640_v1, %v3283_v34 }
 0x60b   : > { %v3303_v33 = vadd.f32 %v3842_v53, %v3284_v13 }
 0x60d   : > { %v3311_v57 = vadd.f32 %v3303_v33, %v6141_v27 }
 0x60f   : > { %3319 = vst [vmem:[%s6194_s25 + $0x10] sm:$0xff] %v3311_v57 }
 0x610   : > { %v3286_v22 = vpop.f32.mrf.mxu2 }
 0x611   : > { %v3287_v43 = vadd.f32 %v3640_v1, %v3286_v22 }
 0x613   : > { %v3304_v48 = vadd.f32 %v3843_v61, %v3287_v43 }
 0x615   : > { %v3312_v10 = vadd.f32 %v3304_v48, %v6157_v5 }
 0x617   : > { %3320 = vst [vmem:[%s6194_s25 + $0x18] sm:$0xff] %v3312_v10 }
 0x618   : > { %v3289_v9 = vpop.f32.mrf.mxu2 }
 0x619   : > { %v3290_v20 = vadd.f32 %v3640_v1, %v3289_v9 }
 0x61b   : > { %v3305_v2 = vadd.f32 %v3844_v26, %v3290_v20 }
 0x61d   : > { %v3313_v28 = vadd.f32 %v3305_v2, %v6164_v44 }
 0x61f   : > { %3321 = vst [vmem:[%s6194_s25 + $0x20] sm:$0xff] %v3313_v28 }
 0x620   : > { %v3292_v27 = vpop.f32.mrf.mxu2 }
 0x621   : > { %v3293_v46 = vadd.f32 %v3640_v1, %v3292_v27 }
 0x623   : > { %v3306_v51 = vadd.f32 %v3845_v45, %v3293_v46 }
 0x625   : > { %v3314_v17 = vadd.f32 %v3306_v51, %v6176_v14 }
 0x627   : > { %3322 = vst [vmem:[%s6194_s25 + $0x28] sm:$0xff] %v3314_v17 }
 0x628   : > { %v3295_v5 = vpop.f32.mrf.mxu2 }
 0x629   : > { %v3296_v40 = vadd.f32 %v3640_v1, %v3295_v5 }
 0x62b   : > { %v3307_v42 = vadd.f32 %v3846_v59, %v3296_v40 }
 0x62d   : > { %v3315_v58 = vadd.f32 %v3307_v42, %v3230_v25 }
 0x62f   : > { %3323 = vst [vmem:[%s6194_s25 + $0x30] sm:$0xff] %v3315_v58 }
 0x630   : > { %v3298_v44 = vpop.f32.mrf.mxu2 }
 0x631   : > { %v3299_v18 = vadd.f32 %v3640_v1, %v3298_v44 }
 0x633   : > { %v3308_v62 = vadd.f32 %v3847_v11, %v3299_v18 }
 0x635   : > { %v3316_v50 = vadd.f32 %v3308_v62, %v3231_v52 }
 0x637   : > { %3324 = vst [vmem:[%s6194_s25 + $0x38] sm:$0xff] %v3316_v50 }
 0x638   : > { %3995 = shalt.err (!%p3992_p8)
}
 0x639   : > { %s4055_s29 = smov 128   ;;  %s4056_s23 = smov 8  }
 0x63a   : > { %3556 = dma.vmem_to_hbm [thread:$0]  (%p4215_p5), %s3339_s27, 1024, %s3341_s2, %s3326_s1, %s4055_s29, %s4055_s29, %s4056_s23  }
 0x63b PF: > { %s6382_s25 = sld [smem:[#allocation18_spill]] }
 0x63c   : > { %s6383_s0 = sld [smem:[#allocation15_spill]] }
 0x641   : > { %p3583_p9 = scmp.ge.s32.totalorder %s6382_s25, 2 }
 0x642   : > { %s3355_s4 = sand.u32 1, %s6383_s0  }
 0x643   : > { %p3572_p10 = pnand %p3583_p9, %p4219_p6  ;;  %s3356_s20 = scalar_lea.sflag [#allocation4], %s3355_s4 }
 0x645   : > { %p3573_p11 = pneg %p3572_p10 }
 0x647   : > { %4025 = dma.done.wait (%p3573_p11), %s3356_s20, 1024  }
 0x648   : > { %4027 = vsyncadd (%p3573_p11), %s3356_s20, 4294966272  ;;  %s6385_s25 = sld [smem:[#allocation19_spill]] }
 0x649   : > { %s6386_s4 = sld [smem:[#allocation16_spill]] }
 0x64a   : > { %s6387_s30 = sld [smem:[#allocation17_spill]] }
 0x64b   : > { %s6388_s24 = sld [smem:[#allocation20_spill]] }
 0x64e   : > { %p36_p12 = scmp.ge.s32.totalorder %s6385_s25, 4  }
 0x650   :  { %38 = sbr.rel (!%p36_p12) target bundleno = 19 (0x13), region = 164 }
 0x655   :  { %3362 = vsyncpa [#allocation3], 1 }
 0x656   :  { %3364 = vsyncpa [#allocation3 + $0x1], 1 }
 0x657   :  { %3365 = vsyncpa [#allocation6], 1 }
 0x658   :  { %3366 = vsyncpa [#allocation9], 1 }
 0x659   :  { %3367 = vsyncpa [#allocation4], 1 }
 0x65a   :  { %3369 = vsyncpa [#allocation4 + $0x1], 1 }

</bundles_post_ra>
